<compile_context>
chip_gen: v7x
topology: tpu7x:2x2x1
jax: 0.10.0
libtpu: 0.0.40
codegen_flags: <defaults>
</compile_context>

<pallas_src>
import jax
import jax.numpy as jnp
from jax.experimental import pallas as pl
from jax.experimental.pallas import tpu as pltpu


def _lastlayer_kernel(x_ref, w_ref, b_ref, o_ref):
    # x_ref: (TN, C*HW)   w_ref: (C*HW, 10)   b_ref: (1, 10) f32   o_ref: (TN, 10)
    out = jnp.dot(x_ref[...], w_ref[...], preferred_element_type=jnp.float32)
    o_ref[...] = (out + b_ref[...]).astype(o_ref.dtype)


def lastlayer_forward(x_nchw, weight, bias, *, tn_max=128):
    """AdaptiveAvgPool2d(1) + Linear fused into one matmul.

    x_nchw: (N, 512, H, W); weight: (10, 512); bias: (10,).
    """
    N, C, H, W = x_nchw.shape
    HW = H * W
    CHW = C * HW
    n_out = weight.shape[0]

    # Glue (traced under jit, so these live in the same XLA program):
    #  - contiguous reshape of the NCHW activation, no data reordering
    #  - expanded / pre-scaled weight folds the 1/(H*W) of the avg-pool into the FC
    x_flat = x_nchw.reshape(N, CHW)
    w_exp = jnp.repeat(weight.T.astype(jnp.float32) / float(HW), HW, axis=0)
    w_exp = w_exp.astype(x_nchw.dtype)            # keep MXU operands in the activation dtype
    b2d = bias.reshape(1, n_out).astype(jnp.float32)

    # Batch tile: TN=128 keeps the x block at 4 MiB f32 (8 MiB double-buffered),
    # comfortable under v7x's 64 MiB physical / 32 MiB scoped VMEM.
    if N <= tn_max:
        tn = N                                    # full dim -> always layout-legal
    else:
        tn = max(8, (tn_max // 8) * 8)            # multiple of 8 for sublane tiling
    grid = (pl.cdiv(N, tn),)

    itemsize = jnp.dtype(x_nchw.dtype).itemsize
    x_blk_bytes = tn * CHW * itemsize
    w_blk_bytes = CHW * n_out * itemsize
    b_blk_bytes = n_out * 4
    o_blk_bytes = tn * n_out * itemsize
    vmem_limit = int(2 * (x_blk_bytes + w_blk_bytes + b_blk_bytes + o_blk_bytes)
                     + (4 << 20))                 # double-buffering + slack

    out = pl.pallas_call(
        _lastlayer_kernel,
        out_shape=jax.ShapeDtypeStruct((N, n_out), x_nchw.dtype),
        grid_spec=pltpu.PrefetchScalarGridSpec(
            num_scalar_prefetch=0,
            grid=grid,
            in_specs=[
                pl.BlockSpec((tn, CHW), lambda i: (i, 0)),      # streamed activation tile
                pl.BlockSpec((CHW, n_out), lambda i: (0, 0)),   # resident expanded weight
                pl.BlockSpec((1, n_out), lambda i: (0, 0)),     # resident bias
            ],
            out_specs=pl.BlockSpec((tn, n_out), lambda i: (i, 0)),
        ),
        compiler_params=pltpu.CompilerParams(
            dimension_semantics=("parallel",),
            vmem_limit_bytes=vmem_limit,
        ),
    )(x_flat, w_exp, b2d)
    return out


def reference_forward(x_nchw, weight, bias):
    pooled = jnp.mean(x_nchw, axis=(2, 3))        # (N, 512)
    return pooled @ weight.T + bias


if __name__ == "__main__":
    key = jax.random.PRNGKey(0)
    k_x, k_w, k_b = jax.random.split(key, 3)

    # Small but module-consistent shapes: fc requires 512 input channels.
    N, C, H, W = 2, 512, 4, 4
    x = jax.random.normal(k_x, (N, C, H, W), dtype=jnp.float32)

    # Deterministic synthetic parameters (PyTorch Linear(512, 10) shapes/init).
    bound = 1.0 / jnp.sqrt(jnp.float32(C))
    weight = jax.random.uniform(k_w, (10, C), minval=-bound, maxval=bound,
                                dtype=jnp.float32)
    bias = jax.random.uniform(k_b, (10,), minval=-bound, maxval=bound,
                              dtype=jnp.float32)

    fwd = jax.jit(lastlayer_forward)              # weight expansion/transpose fused under jit
    out = fwd(x, weight, bias)
    out = jax.block_until_ready(out)

    ref = reference_forward(x, weight, bias)
    assert out.shape == (N, 10), out.shape
    assert jnp.allclose(out, ref, atol=1e-4, rtol=1e-4), (out, ref)

    print("KERNEL_OK")
</pallas_src>

<mosaic_0001>
module attributes {stable_mosaic.version = 11 : i64} {
  func.func @_lastlayer_kernel(%arg0: i32, %arg1: memref<2x8192xf32, #tpu.memory_space<vmem>>, %arg2: memref<8192x10xf32, #tpu.memory_space<vmem>>, %arg3: memref<1x10xf32, #tpu.memory_space<vmem>>, %arg4: memref<2x10xf32, #tpu.memory_space<vmem>>) attributes {dimension_semantics = [#tpu.dimension_semantics<parallel>], iteration_bounds = array<i64: 1>, scalar_prefetch = 0 : i64, scratch_operands = 0 : i64, tpu.core_type = #tpu.core_type<tc>, window_params = [{transform_indices = @transform_0, window_bounds = array<i64: 2, 8192>}, {pipeline_mode = #tpu.pipeline_mode<synchronous>, transform_indices = @transform_1, window_bounds = array<i64: 8192, 10>}, {pipeline_mode = #tpu.pipeline_mode<synchronous>, transform_indices = @transform_2, window_bounds = array<i64: 1, 10>}, {transform_indices = @transform_3, window_bounds = array<i64: 2, 10>}]} {
    %c0 = arith.constant 0 : index
    %c0_0 = arith.constant 0 : index
    %0 = vector.load %arg1[%c0, %c0_0] : memref<2x8192xf32, #tpu.memory_space<vmem>>, vector<2x8192xf32>
    %c0_1 = arith.constant 0 : index
    %c0_2 = arith.constant 0 : index
    %1 = vector.load %arg2[%c0_1, %c0_2] : memref<8192x10xf32, #tpu.memory_space<vmem>>, vector<8192x10xf32>
    %cst = arith.constant dense<0.000000e+00> : vector<2x10xf32>
    %2 = tpu.matmul %0, %1, %cst {dimension_numbers = #tpu.dot_dimension_numbers<[1], [0], [0], [1], [0, 0, 1, 1], [], []>} : vector<2x8192xf32>, vector<8192x10xf32>, vector<2x10xf32> -> vector<2x10xf32>
    %c0_3 = arith.constant 0 : index
    %c0_4 = arith.constant 0 : index
    %3 = vector.load %arg3[%c0_3, %c0_4] : memref<1x10xf32, #tpu.memory_space<vmem>>, vector<1x10xf32>
    %4 = vector.broadcast %3 : vector<1x10xf32> to vector<2x10xf32>
    %5 = arith.addf %2, %4 : vector<2x10xf32>
    %c0_5 = arith.constant 0 : index
    %c0_6 = arith.constant 0 : index
    %6 = vector.load %arg4[%c0_5, %c0_6] : memref<2x10xf32, #tpu.memory_space<vmem>>, vector<2x10xf32>
    tpu.vector_store %arg4[%c0_5, %c0_6], %5 {strides = array<i32>} : memref<2x10xf32, #tpu.memory_space<vmem>>, vector<2x10xf32>,
    return
  }
  func.func @transform_0(%arg0: i32) -> (i32, i32) {
    %c0_i32 = arith.constant 0 : i32
    %c0_i32_0 = arith.constant 0 : i32
    return %arg0, %c0_i32 : i32, i32
  }
  func.func @transform_1(%arg0: i32) -> (i32, i32) {
    %c0_i32 = arith.constant 0 : i32
    %c0_i32_0 = arith.constant 0 : i32
    %c0_i32_1 = arith.constant 0 : i32
    return %c0_i32, %c0_i32_0 : i32, i32
  }
  func.func @transform_2(%arg0: i32) -> (i32, i32) {
    %c0_i32 = arith.constant 0 : i32
    %c0_i32_0 = arith.constant 0 : i32
    %c0_i32_1 = arith.constant 0 : i32
    return %c0_i32, %c0_i32_0 : i32, i32
  }
  func.func @transform_3(%arg0: i32) -> (i32, i32) {
    %c0_i32 = arith.constant 0 : i32
    %c0_i32_0 = arith.constant 0 : i32
    return %arg0, %c0_i32 : i32, i32
  }
}

</mosaic_0001>

<bundles_post_ra>
// kernel: lastlayer_forward.1
= control target key start
LH: loop header
LB: loop body
LE: loop exit
PB: predicated region body
PF: predicated region fallthrough
CT: control target
= control target key end

     0   :  { %v5857_v47 = vmov 1983009808   ;;  %v1082_v49 = vlaneseq  ;;  %s9222_s0 = inlined_call_operand.vmem [shape: f32[2,8192], index: 0, kind: input, shape index: {}]   ;;  %s9223_s1 = inlined_call_operand.vmem [shape: f32[8192,10], index: 1, kind: input, shape index: {}]   ;;  %s9224_s2 = inlined_call_operand.vmem [shape: f32[1,10], index: 2, kind: input, shape index: {}]   ;;  %s9225_s3 = inlined_call_operand.hbm [shape: f32[2,10], index: 3, kind: output, shape index: {}]  }
   0x1   :  { %v47_v0 = vld [vmem:[%s9223_s1 + $0x80] sm:$0xff]  ;;  %v48_v1 = vld [vmem:[%s9223_s1 + $0x88] sm:$0xff]  ;;  %v49_v11 = vld [vmem:[%s9223_s1 + $0x90] sm:$0xff]  ;;  %v1080_v48 = vunpack.c.l.s4 %v5857_v47 }
   0x2   :  { %v31_v2 = vld [vmem:[%s9223_s1] sm:$0xff]  ;;  %v4791_v3 = vpack.c.bf16 %v48_v1, %v47_v0  ;;  %v32_v4 = vld [vmem:[%s9223_s1 + $0x8] sm:$0xff]  ;;  %v50_v13 = vld [vmem:[%s9223_s1 + $0x98] sm:$0xff]  ;;  %v1083_v0 = vshrl.u32 %v1082_v49, 7 }
   0x3   :  { %v79_v5 = vld [vmem:[%s9223_s1 + $0x180] sm:$0xff]  ;;  %v80_v6 = vld [vmem:[%s9223_s1 + $0x188] sm:$0xff]  ;;  %v4793_v7 = vpack.c.bf16 %v32_v4, %v31_v2  ;;  %v33_v14 = vld [vmem:[%s9223_s1 + $0x10] sm:$0xff]  ;;  %v4795_v16 = vpack.c.bf16 %v50_v13, %v49_v11  ;;  %v1081_v63 = vunpack.c.0.s8 %v1080_v48 }
   0x4   :  { %v4823_v8 = vpack.c.bf16 %v80_v6, %v79_v5  ;;  %v63_v9 = vld [vmem:[%s9223_s1 + $0x100] sm:$0xff]  ;;  %v64_v10 = vld [vmem:[%s9223_s1 + $0x108] sm:$0xff]  ;;  %4792 = vmatprep.subr.bf16.mxu0 %v4791_v3  ;;  %v34_v15 = vld [vmem:[%s9223_s1 + $0x18] sm:$0xff] }
   0x5   :  { %v4825_v12 = vpack.c.bf16 %v64_v10, %v63_v9  ;;  %4794 = vmatpush3.bf16.msra.mxu0 %v4793_v7  ;;  %v4797_v17 = vpack.c.bf16 %v34_v15, %v33_v14  ;;  %v81_v18 = vld [vmem:[%s9223_s1 + $0x190] sm:$0xff]  ;;  %v82_v19 = vld [vmem:[%s9223_s1 + $0x198] sm:$0xff]  ;;  %v51_v23 = vld [vmem:[%s9223_s1 + $0xa0] sm:$0xff]  ;;  %v6029_v13 = vsub.s32 %v1081_v63, %v1083_v0 }
   0x6   :  { %4824 = vmatprep.subr.bf16.mxu1 %v4823_v8  ;;  %v65_v20 = vld [vmem:[%s9223_s1 + $0x110] sm:$0xff]  ;;  %v4827_v21 = vpack.c.bf16 %v82_v19, %v81_v18  ;;  %v66_v22 = vld [vmem:[%s9223_s1 + $0x118] sm:$0xff]  ;;  %v52_v24 = vld [vmem:[%s9223_s1 + $0xa8] sm:$0xff]  ;;  %4796 = vmatprep.subr.bf16.mxu0 %v4795_v16 }
   0x7   :  { %4826 = vmatpush3.bf16.msra.mxu1 %v4825_v12  ;;  %v4829_v25 = vpack.c.bf16 %v66_v22, %v65_v20  ;;  %v4799_v26 = vpack.c.bf16 %v52_v24, %v51_v23  ;;  %v35_v27 = vld [vmem:[%s9223_s1 + $0x20] sm:$0xff]  ;;  %v36_v28 = vld [vmem:[%s9223_s1 + $0x28] sm:$0xff]  ;;  %v53_v35 = vld [vmem:[%s9223_s1 + $0xb0] sm:$0xff] }
   0x8   :  { %v83_v29 = vld [vmem:[%s9223_s1 + $0x1a0] sm:$0xff]  ;;  %4828 = vmatprep.subr.bf16.mxu1 %v4827_v21  ;;  %v84_v30 = vld [vmem:[%s9223_s1 + $0x1a8] sm:$0xff]  ;;  %v4801_v33 = vpack.c.bf16 %v36_v28, %v35_v27  ;;  %v54_v36 = vld [vmem:[%s9223_s1 + $0xb8] sm:$0xff] }
   0x9   :  { %v67_v31 = vld [vmem:[%s9223_s1 + $0x120] sm:$0xff]  ;;  %v68_v32 = vld [vmem:[%s9223_s1 + $0x128] sm:$0xff]  ;;  %4798 = vmatpush3.bf16.msra.mxu0 %v4797_v17  ;;  %v4831_v34 = vpack.c.bf16 %v84_v30, %v83_v29  ;;  %v37_v37 = vld [vmem:[%s9223_s1 + $0x30] sm:$0xff]  ;;  %v4803_v39 = vpack.c.bf16 %v54_v36, %v53_v35 }
   0xa   :  { %4800 = vmatprep.subr.bf16.mxu0 %v4799_v26  ;;  %v4833_v38 = vpack.c.bf16 %v68_v32, %v67_v31  ;;  %v38_v40 = vld [vmem:[%s9223_s1 + $0x38] sm:$0xff]  ;;  %v85_v41 = vld [vmem:[%s9223_s1 + $0x1b0] sm:$0xff]  ;;  %v55_v46 = vld [vmem:[%s9223_s1 + $0xc0] sm:$0xff] }
   0xb   :  { %4830 = vmatpush3.bf16.msra.mxu1 %v4829_v25  ;;  %v86_v42 = vld [vmem:[%s9223_s1 + $0x1b8] sm:$0xff]  ;;  %v69_v44 = vld [vmem:[%s9223_s1 + $0x130] sm:$0xff]  ;;  %v56_v50 = vld [vmem:[%s9223_s1 + $0xc8] sm:$0xff]  ;;  %v4805_v51 = vpack.c.bf16 %v38_v40, %v37_v37 }
   0xc   :  { %4832 = vmatprep.subr.bf16.mxu1 %v4831_v34  ;;  %v4835_v43 = vpack.c.bf16 %v86_v42, %v85_v41  ;;  %v70_v45 = vld [vmem:[%s9223_s1 + $0x138] sm:$0xff]  ;;  %v87_v52 = vld [vmem:[%s9223_s1 + $0x1c0] sm:$0xff]  ;;  %v88_v53 = vld [vmem:[%s9223_s1 + $0x1c8] sm:$0xff]  ;;  %v4807_v55 = vpack.c.bf16 %v56_v50, %v55_v46 }
   0xd   :  { %4802 = vmatpush3.bf16.msra.mxu0 %v4801_v33  ;;  %v4837_v54 = vpack.c.bf16 %v70_v45, %v69_v44  ;;  %v39_v56 = vld [vmem:[%s9223_s1 + $0x40] sm:$0xff]  ;;  %v40_v57 = vld [vmem:[%s9223_s1 + $0x48] sm:$0xff]  ;;  %v4839_v59 = vpack.c.bf16 %v88_v53, %v87_v52  ;;  %v57_v61 = vld [vmem:[%s9223_s1 + $0xd0] sm:$0xff] }
   0xe   :  { %4804 = vmatprep.subr.bf16.mxu0 %v4803_v39  ;;  %v71_v58 = vld [vmem:[%s9223_s1 + $0x140] sm:$0xff]  ;;  %v72_v60 = vld [vmem:[%s9223_s1 + $0x148] sm:$0xff]  ;;  %v58_v62 = vld [vmem:[%s9223_s1 + $0xd8] sm:$0xff]  ;;  %v4809_v3 = vpack.c.bf16 %v40_v57, %v39_v56 }
   0xf   :  { %4834 = vmatpush3.bf16.msra.mxu1 %v4833_v38  ;;  %v89_v1 = vld [vmem:[%s9223_s1 + $0x1d0] sm:$0xff]  ;;  %v90_v2 = vld [vmem:[%s9223_s1 + $0x1d8] sm:$0xff]  ;;  %v4841_v4 = vpack.c.bf16 %v72_v60, %v71_v58  ;;  %v4811_v5 = vpack.c.bf16 %v58_v62, %v57_v61  ;;  %v59_v11 = vld [vmem:[%s9223_s1 + $0xe0] sm:$0xff] }
  0x10   :  { %4836 = vmatprep.subr.bf16.mxu1 %v4835_v43  ;;  %v41_v6 = vld [vmem:[%s9223_s1 + $0x50] sm:$0xff]  ;;  %v42_v7 = vld [vmem:[%s9223_s1 + $0x58] sm:$0xff]  ;;  %v4843_v9 = vpack.c.bf16 %v90_v2, %v89_v1  ;;  %v60_v12 = vld [vmem:[%s9223_s1 + $0xe8] sm:$0xff] }
  0x11   :  { %4806 = vmatpush3.bf16.msra.mxu0 %v4805_v51  ;;  %v73_v8 = vld [vmem:[%s9223_s1 + $0x150] sm:$0xff]  ;;  %v74_v10 = vld [vmem:[%s9223_s1 + $0x158] sm:$0xff]  ;;  %v91_v14 = vld [vmem:[%s9223_s1 + $0x1e0] sm:$0xff]  ;;  %v4813_v16 = vpack.c.bf16 %v42_v7, %v41_v6  ;;  %v4815_v19 = vpack.c.bf16 %v60_v12, %v59_v11 }
  0x12   :  { %4808 = vmatprep.subr.bf16.mxu0 %v4807_v55  ;;  %v92_v15 = vld [vmem:[%s9223_s1 + $0x1e8] sm:$0xff]  ;;  %v43_v17 = vld [vmem:[%s9223_s1 + $0x60] sm:$0xff]  ;;  %v4845_v18 = vpack.c.bf16 %v74_v10, %v73_v8  ;;  %v61_v25 = vld [vmem:[%s9223_s1 + $0xf0] sm:$0xff] }
  0x13   :  { %4838 = vmatpush3.bf16.msra.mxu1 %v4837_v54  ;;  %v44_v20 = vld [vmem:[%s9223_s1 + $0x68] sm:$0xff]  ;;  %v75_v21 = vld [vmem:[%s9223_s1 + $0x160] sm:$0xff]  ;;  %v4847_v23 = vpack.c.bf16 %v92_v15, %v91_v14  ;;  %v62_v26 = vld [vmem:[%s9223_s1 + $0xf8] sm:$0xff] }
  0x14   :  { %4840 = vmatprep.subr.bf16.mxu1 %v4839_v59  ;;  %v15_v22 = vld [vmem:[%s9222_s0] sm:$0xff]  ;;  %v76_v24 = vld [vmem:[%s9223_s1 + $0x168] sm:$0xff]  ;;  %v93_v29 = vld [vmem:[%s9223_s1 + $0x1f0] sm:$0xff]  ;;  %v4817_v31 = vpack.c.bf16 %v44_v20, %v43_v17  ;;  %v4819_v35 = vpack.c.bf16 %v62_v26, %v61_v25 }
  0x15   :  { %4810 = vmatpush3.bf16.msra.mxu0 %v4809_v3  ;;  %v1085_v27 = vrot.slane %v15_v22, %v6029_v13  ;;  %v1078_v28 = vcombine.high %v15_v22, %v15_v22  ;;  %v94_v30 = vld [vmem:[%s9223_s1 + $0x1f8] sm:$0xff]  ;;  %v4849_v34 = vpack.c.bf16 %v76_v24, %v75_v21  ;;  %v45_v36 = vld [vmem:[%s9223_s1 + $0x70] sm:$0xff]  ;;  %v111_v41 = vld [vmem:[%s9223_s1 + $0x280] sm:$0xff] }
  0x16   :  { %4812 = vmatprep.subr.bf16.mxu0 %v4811_v5  ;;  %v46_v37 = vld [vmem:[%s9223_s1 + $0x78] sm:$0xff]  ;;  %v77_v38 = vld [vmem:[%s9223_s1 + $0x170] sm:$0xff]  ;;  %v4851_v39 = vpack.c.bf16 %v94_v30, %v93_v29  ;;  %v112_v42 = vld [vmem:[%s9223_s1 + $0x288] sm:$0xff] }
  0x17   :  { %4842 = vmatpush3.bf16.msra.mxu1 %v4841_v4  ;;  %v1093_v32 = vcombine.high %v1085_v27, %v1085_v27  ;;  %v1092_v33 = vrot.slane %v1078_v28, %v6029_v13  ;;  %v78_v40 = vld [vmem:[%s9223_s1 + $0x178] sm:$0xff]  ;;  %v143_v44 = vld [vmem:[%s9223_s1 + $0x380] sm:$0xff]  ;;  %v144_v45 = vld [vmem:[%s9223_s1 + $0x388] sm:$0xff]  ;;  %v4821_v46 = vpack.c.bf16 %v46_v37, %v45_v36  ;;  %v4855_v48 = vpack.c.bf16 %v112_v42, %v111_v41 }
  0x18   :  { %4844 = vmatprep.subr.bf16.mxu1 %v4843_v9  ;;  %v4853_v47 = vpack.c.bf16 %v78_v40, %v77_v38  ;;  %v95_v49 = vld [vmem:[%s9223_s1 + $0x200] sm:$0xff]  ;;  %v96_v50 = vld [vmem:[%s9223_s1 + $0x208] sm:$0xff]  ;;  %v4887_v52 = vpack.c.bf16 %v144_v45, %v143_v44  ;;  %v113_v54 = vld [vmem:[%s9223_s1 + $0x290] sm:$0xff] }
  0x19   :  { %4814 = vmatpush3.bf16.msra.mxu0 %v4813_v16  ;;  %1478 = vmatprep.mubr.f32.mxu0 %v1093_v32  ;;  %v1094_v43 = vcombine.high %v1092_v33, %v1092_v33  ;;  %v127_v51 = vld [vmem:[%s9223_s1 + $0x300] sm:$0xff]  ;;  %v128_v53 = vld [vmem:[%s9223_s1 + $0x308] sm:$0xff]  ;;  %v114_v55 = vld [vmem:[%s9223_s1 + $0x298] sm:$0xff]  ;;  %v4857_v58 = vpack.c.bf16 %v96_v50, %v95_v49 }
  0x1a   :  { %4816 = vmatprep.subr.bf16.mxu0 %v4815_v19  ;;  %v145_v56 = vld [vmem:[%s9223_s1 + $0x390] sm:$0xff]  ;;  %v146_v57 = vld [vmem:[%s9223_s1 + $0x398] sm:$0xff]  ;;  %v4889_v59 = vpack.c.bf16 %v128_v53, %v127_v51  ;;  %v4859_v60 = vpack.c.bf16 %v114_v55, %v113_v54  ;;  %v115_v2 = vld [vmem:[%s9223_s1 + $0x2a0] sm:$0xff] }
  0x1b   :  { %4846 = vmatpush3.bf16.msra.mxu1 %v4845_v18  ;;  %1548 = vmatprep.mubr.f32.mxu1 %v1094_v43  ;;  %v97_v61 = vld [vmem:[%s9223_s1 + $0x210] sm:$0xff]  ;;  %v98_v62 = vld [vmem:[%s9223_s1 + $0x218] sm:$0xff]  ;;  %v4891_v0 = vpack.c.bf16 %v146_v57, %v145_v56  ;;  %v116_v3 = vld [vmem:[%s9223_s1 + $0x2a8] sm:$0xff] }
  0x1c   :  { %4848 = vmatprep.subr.bf16.mxu1 %v4847_v23  ;;  %v129_v63 = vld [vmem:[%s9223_s1 + $0x310] sm:$0xff]  ;;  %v130_v1 = vld [vmem:[%s9223_s1 + $0x318] sm:$0xff]  ;;  %v147_v4 = vld [vmem:[%s9223_s1 + $0x3a0] sm:$0xff]  ;;  %v4861_v6 = vpack.c.bf16 %v98_v62, %v97_v61  ;;  %v4863_v8 = vpack.c.bf16 %v116_v3, %v115_v2 }
  0x1d   :  { %4818 = vmatpush3.bf16.msra.mxu0 %v4817_v31  ;;  %v148_v5 = vld [vmem:[%s9223_s1 + $0x3a8] sm:$0xff]  ;;  %v4893_v7 = vpack.c.bf16 %v130_v1, %v129_v63  ;;  %v99_v9 = vld [vmem:[%s9223_s1 + $0x220] sm:$0xff]  ;;  %v117_v15 = vld [vmem:[%s9223_s1 + $0x2b0] sm:$0xff] }
  0x1e   :  { %4820 = vmatprep.subr.bf16.mxu0 %v4819_v35  ;;  %v100_v10 = vld [vmem:[%s9223_s1 + $0x228] sm:$0xff]  ;;  %v131_v11 = vld [vmem:[%s9223_s1 + $0x320] sm:$0xff]  ;;  %v4895_v12 = vpack.c.bf16 %v148_v5, %v147_v4  ;;  %v118_v16 = vld [vmem:[%s9223_s1 + $0x2b8] sm:$0xff] }
  0x1f   :  { %4850 = vmatpush3.bf16.msra.mxu1 %v4849_v34  ;;  %v132_v14 = vld [vmem:[%s9223_s1 + $0x328] sm:$0xff]  ;;  %v149_v17 = vld [vmem:[%s9223_s1 + $0x3b0] sm:$0xff]  ;;  %v150_v18 = vld [vmem:[%s9223_s1 + $0x3b8] sm:$0xff]  ;;  %v4865_v19 = vpack.c.bf16 %v100_v10, %v99_v9  ;;  %v4867_v21 = vpack.c.bf16 %v118_v16, %v117_v15 }
  0x20   :  { %4852 = vmatprep.subr.bf16.mxu1 %v4851_v39  ;;  %v4897_v20 = vpack.c.bf16 %v132_v14, %v131_v11  ;;  %v101_v22 = vld [vmem:[%s9223_s1 + $0x230] sm:$0xff]  ;;  %v102_v23 = vld [vmem:[%s9223_s1 + $0x238] sm:$0xff]  ;;  %v4899_v25 = vpack.c.bf16 %v150_v18, %v149_v17  ;;  %v120_v28 = vld [vmem:[%s9223_s1 + $0x2c8] sm:$0xff] }
  0x21   :  { %4822 = vmatpush3.bf16.msra.mxu0 %v4821_v46  ;;  %v133_v24 = vld [vmem:[%s9223_s1 + $0x330] sm:$0xff]  ;;  %v134_v26 = vld [vmem:[%s9223_s1 + $0x338] sm:$0xff]  ;;  %v151_v29 = vld [vmem:[%s9223_s1 + $0x3c0] sm:$0xff]  ;;  %v4869_v32 = vpack.c.bf16 %v102_v23, %v101_v22 }
  0x22   :  { %4856 = vmatprep.subr.bf16.mxu0 %v4855_v48  ;;  %v152_v30 = vld [vmem:[%s9223_s1 + $0x3c8] sm:$0xff]  ;;  %v4901_v35 = vpack.c.bf16 %v134_v26, %v133_v24  ;;  %v103_v37 = vld [vmem:[%s9223_s1 + $0x240] sm:$0xff]  ;;  %v121_v42 = vld [vmem:[%s9223_s1 + $0x2d0] sm:$0xff] }
  0x23   :  { %4854 = vmatpush3.bf16.msra.mxu1 %v4853_v47  ;;  %v16_v31 = vld [vmem:[%s9222_s0 + $0x8] sm:$0xff]  ;;  %v135_v39 = vld [vmem:[%s9223_s1 + $0x340] sm:$0xff]  ;;  %v4903_v40 = vpack.c.bf16 %v152_v30, %v151_v29  ;;  %v122_v43 = vld [vmem:[%s9223_s1 + $0x2d8] sm:$0xff] }
  0x24   :  { %4888 = vmatprep.subr.bf16.mxu1 %v4887_v52  ;;  %1479 = vmatmul.mubr.f32.vlgmr.msra.gmra.mrb[0].mxu0 %v1085_v27  ;;  %v119_v27 = vld [vmem:[%s9223_s1 + $0x2c0] sm:$0xff]  ;;  %v1095_v34 = vcombine.high %v16_v31, %v16_v31  ;;  %v104_v38 = vld [vmem:[%s9223_s1 + $0x248] sm:$0xff]  ;;  %v153_v46 = vld [vmem:[%s9223_s1 + $0x3d0] sm:$0xff]  ;;  %v4875_v51 = vpack.c.bf16 %v122_v43, %v121_v42 }
  0x25   :  { %4858 = vmatpush3.bf16.msra.mxu0 %v4857_v58  ;;  %v4871_v36 = vpack.c.bf16 %v120_v28, %v119_v27  ;;  %v136_v41 = vld [vmem:[%s9223_s1 + $0x348] sm:$0xff]  ;;  %v154_v47 = vld [vmem:[%s9223_s1 + $0x3d8] sm:$0xff]  ;;  %v4873_v48 = vpack.c.bf16 %v104_v38, %v103_v37  ;;  %v105_v52 = vld [vmem:[%s9223_s1 + $0x250] sm:$0xff] }
  0x26   :  { %1549 = vmatmul.mubr.f32.vlgmr.msra.gmra.mrb[0].mxu1 %v1092_v33  ;;  %4860 = vmatprep.subr.bf16.mxu0 %v4859_v60  ;;  %v6190_v33 = vrot.slane %v16_v31, %v6029_v13  ;;  %v6213_v45 = vrot.slane %v1095_v34, %v6029_v13  ;;  %v4905_v50 = vpack.c.bf16 %v136_v41, %v135_v39  ;;  %v106_v53 = vld [vmem:[%s9223_s1 + $0x258] sm:$0xff]  ;;  %v137_v54 = vld [vmem:[%s9223_s1 + $0x350] sm:$0xff]  ;;  %v123_v57 = vld [vmem:[%s9223_s1 + $0x2e0] sm:$0xff] }
  0x27   :  { %4890 = vmatpush3.bf16.msra.mxu1 %v4889_v59  ;;  %v4907_v55 = vpack.c.bf16 %v154_v47, %v153_v46  ;;  %v138_v56 = vld [vmem:[%s9223_s1 + $0x358] sm:$0xff]  ;;  %v124_v58 = vld [vmem:[%s9223_s1 + $0x2e8] sm:$0xff]  ;;  %v155_v59 = vld [vmem:[%s9223_s1 + $0x3e0] sm:$0xff]  ;;  %v4877_v61 = vpack.c.bf16 %v106_v53, %v105_v52 }
  0x28   :  { %4892 = vmatprep.subr.bf16.mxu1 %v4891_v0  ;;  %v1110_v44 = vcombine.high %v6190_v33, %v6190_v33  ;;  %v1111_v49 = vcombine.high %v6213_v45, %v6213_v45  ;;  %v156_v60 = vld [vmem:[%s9223_s1 + $0x3e8] sm:$0xff]  ;;  %v4909_v62 = vpack.c.bf16 %v138_v56, %v137_v54  ;;  %v4879_v63 = vpack.c.bf16 %v124_v58, %v123_v57  ;;  %v107_v0 = vld [vmem:[%s9223_s1 + $0x260] sm:$0xff]  ;;  %v125_v5 = vld [vmem:[%s9223_s1 + $0x2f0] sm:$0xff] }
  0x29   :  { %4862 = vmatpush3.bf16.msra.mxu0 %v4861_v6  ;;  %v108_v1 = vld [vmem:[%s9223_s1 + $0x268] sm:$0xff]  ;;  %v139_v2 = vld [vmem:[%s9223_s1 + $0x360] sm:$0xff]  ;;  %v4911_v3 = vpack.c.bf16 %v156_v60, %v155_v59  ;;  %v126_v6 = vld [vmem:[%s9223_s1 + $0x2f8] sm:$0xff] }
  0x2a   :  { %4864 = vmatprep.subr.bf16.mxu0 %v4863_v8  ;;  %1618 = vmatprep.mubr.f32.mxu0 %v1110_v44  ;;  %v140_v4 = vld [vmem:[%s9223_s1 + $0x368] sm:$0xff]  ;;  %v158_v8 = vld [vmem:[%s9223_s1 + $0x3f8] sm:$0xff]  ;;  %v4881_v9 = vpack.c.bf16 %v108_v1, %v107_v0  ;;  %v4883_v11 = vpack.c.bf16 %v126_v6, %v125_v5  ;;  %v141_v15 = vld [vmem:[%s9223_s1 + $0x370] sm:$0xff] }
  0x2b   :  { %4894 = vmatpush3.bf16.msra.mxu1 %v4893_v7  ;;  %1688 = vmatprep.mubr.f32.mxu1 %v1111_v49  ;;  %v157_v7 = vld [vmem:[%s9223_s1 + $0x3f0] sm:$0xff]  ;;  %v4913_v10 = vpack.c.bf16 %v140_v4, %v139_v2  ;;  %v110_v14 = vld [vmem:[%s9223_s1 + $0x278] sm:$0xff]  ;;  %v175_v18 = vld [vmem:[%s9223_s1 + $0x480] sm:$0xff] }
  0x2c   :  { %4896 = vmatprep.subr.bf16.mxu1 %v4895_v12  ;;  %v109_v12 = vld [vmem:[%s9223_s1 + $0x270] sm:$0xff]  ;;  %v4915_v16 = vpack.c.bf16 %v158_v8, %v157_v7  ;;  %v142_v17 = vld [vmem:[%s9223_s1 + $0x378] sm:$0xff]  ;;  %v159_v23 = vld [vmem:[%s9223_s1 + $0x400] sm:$0xff] }
  0x2d   :  { %4866 = vmatpush3.bf16.msra.mxu0 %v4865_v19  ;;  %v176_v19 = vld [vmem:[%s9223_s1 + $0x488] sm:$0xff]  ;;  %v4885_v22 = vpack.c.bf16 %v110_v14, %v109_v12  ;;  %v4917_v24 = vpack.c.bf16 %v142_v17, %v141_v15  ;;  %v191_v27 = vld [vmem:[%s9223_s1 + $0x500] sm:$0xff]  ;;  %v177_v30 = vld [vmem:[%s9223_s1 + $0x490] sm:$0xff] }
  0x2e   :  { %4868 = vmatprep.subr.bf16.mxu0 %v4867_v21  ;;  %v208_v21 = vld [vmem:[%s9223_s1 + $0x588] sm:$0xff]  ;;  %v178_v31 = vld [vmem:[%s9223_s1 + $0x498] sm:$0xff]  ;;  %v17_v37 = vld [vmem:[%s9222_s0 + $0x10] sm:$0xff] }
  0x2f   :  { %4898 = vmatpush3.bf16.msra.mxu1 %v4897_v20  ;;  %v207_v20 = vld [vmem:[%s9223_s1 + $0x580] sm:$0xff]  ;;  %v160_v26 = vld [vmem:[%s9223_s1 + $0x408] sm:$0xff]  ;;  %v210_v34 = vld [vmem:[%s9223_s1 + $0x598] sm:$0xff]  ;;  %v4923_v38 = vpack.c.bf16 %v178_v31, %v177_v30  ;;  %v6332_v42 = vrot.slane %v17_v37, %v6029_v13  ;;  %v1112_v43 = vcombine.high %v17_v37, %v17_v37 }
  0x30   :  { %4900 = vmatprep.subr.bf16.mxu1 %v4899_v25  ;;  %v4919_v25 = vpack.c.bf16 %v176_v19, %v175_v18  ;;  %v192_v28 = vld [vmem:[%s9223_s1 + $0x508] sm:$0xff]  ;;  %v4951_v29 = vpack.c.bf16 %v208_v21, %v207_v20  ;;  %v161_v39 = vld [vmem:[%s9223_s1 + $0x410] sm:$0xff]  ;;  %v194_v46 = vld [vmem:[%s9223_s1 + $0x518] sm:$0xff] }
  0x31   :  { %4870 = vmatpush3.bf16.msra.mxu0 %v4869_v32  ;;  %v209_v32 = vld [vmem:[%s9223_s1 + $0x590] sm:$0xff]  ;;  %v179_v47 = vld [vmem:[%s9223_s1 + $0x4a0] sm:$0xff]  ;;  %v6353_v52 = vrot.slane %v1112_v43, %v6029_v13  ;;  %v164_v56 = vld [vmem:[%s9223_s1 + $0x428] sm:$0xff] }
  0x32   :  { %4872 = vmatprep.subr.bf16.mxu0 %v4871_v36  ;;  %v4953_v36 = vpack.c.bf16 %v192_v28, %v191_v27  ;;  %v193_v41 = vld [vmem:[%s9223_s1 + $0x510] sm:$0xff]  ;;  %v4955_v44 = vpack.c.bf16 %v210_v34, %v209_v32  ;;  %v211_v49 = vld [vmem:[%s9223_s1 + $0x5a0] sm:$0xff]  ;;  %v196_v59 = vld [vmem:[%s9223_s1 + $0x528] sm:$0xff] }
  0x33   :  { %4902 = vmatpush3.bf16.msra.mxu1 %v4901_v35  ;;  %v4921_v35 = vpack.c.bf16 %v160_v26, %v159_v23  ;;  %v195_v57 = vld [vmem:[%s9223_s1 + $0x520] sm:$0xff]  ;;  %v181_v60 = vld [vmem:[%s9223_s1 + $0x4b0] sm:$0xff]  ;;  %v166_v4 = vld [vmem:[%s9223_s1 + $0x438] sm:$0xff] }
  0x34   :  { %4904 = vmatprep.subr.bf16.mxu1 %v4903_v40  ;;  %v162_v40 = vld [vmem:[%s9223_s1 + $0x418] sm:$0xff]  ;;  %v4961_v1 = vpack.c.bf16 %v196_v59, %v195_v57  ;;  %v197_v5 = vld [vmem:[%s9223_s1 + $0x530] sm:$0xff]  ;;  %v183_v8 = vld [vmem:[%s9223_s1 + $0x4c0] sm:$0xff] }
  0x35   :  { %4874 = vmatpush3.bf16.msra.mxu0 %v4873_v48  ;;  %v180_v48 = vld [vmem:[%s9223_s1 + $0x4a8] sm:$0xff]  ;;  %v4925_v53 = vpack.c.bf16 %v162_v40, %v161_v39  ;;  %v198_v7 = vld [vmem:[%s9223_s1 + $0x538] sm:$0xff]  ;;  %v199_v18 = vld [vmem:[%s9223_s1 + $0x540] sm:$0xff] }
  0x36   :  { %4876 = vmatprep.subr.bf16.mxu0 %v4875_v51  ;;  %v1127_v51 = vcombine.high %v6332_v42, %v6332_v42  ;;  %v4927_v54 = vpack.c.bf16 %v180_v48, %v179_v47  ;;  %v4965_v14 = vpack.c.bf16 %v198_v7, %v197_v5  ;;  %v168_v17 = vld [vmem:[%s9223_s1 + $0x448] sm:$0xff]  ;;  %v185_v21 = vld [vmem:[%s9223_s1 + $0x4d0] sm:$0xff]  ;;  %v202_v32 = vld [vmem:[%s9223_s1 + $0x558] sm:$0xff] }
  0x37   :  { %4906 = vmatpush3.bf16.msra.mxu1 %v4905_v50  ;;  %v212_v50 = vld [vmem:[%s9223_s1 + $0x5a8] sm:$0xff]  ;;  %v217_v23 = vld [vmem:[%s9223_s1 + $0x5d0] sm:$0xff]  ;;  %v187_v34 = vld [vmem:[%s9223_s1 + $0x4e0] sm:$0xff] }
  0x38   :  { %4908 = vmatprep.subr.bf16.mxu1 %v4907_v55  ;;  %v163_v55 = vld [vmem:[%s9223_s1 + $0x420] sm:$0xff]  ;;  %v4959_v58 = vpack.c.bf16 %v212_v50, %v211_v49  ;;  %v200_v20 = vld [vmem:[%s9223_s1 + $0x548] sm:$0xff]  ;;  %v169_v28 = vld [vmem:[%s9223_s1 + $0x450] sm:$0xff] }
  0x39   :  { %4878 = vmatpush3.bf16.msra.mxu0 %v4877_v61  ;;  %v182_v61 = vld [vmem:[%s9223_s1 + $0x4b8] sm:$0xff]  ;;  %v4929_v0 = vpack.c.bf16 %v164_v56, %v163_v55  ;;  %v4969_v26 = vpack.c.bf16 %v200_v20, %v199_v18  ;;  %v201_v30 = vld [vmem:[%s9223_s1 + $0x550] sm:$0xff]  ;;  %v220_v37 = vld [vmem:[%s9223_s1 + $0x5e8] sm:$0xff] }
  0x3a   :  { %4880 = vmatprep.subr.bf16.mxu0 %v4879_v63  ;;  %v214_v63 = vld [vmem:[%s9223_s1 + $0x5b8] sm:$0xff]  ;;  %v4931_v2 = vpack.c.bf16 %v182_v61, %v181_v60  ;;  %v4973_v39 = vpack.c.bf16 %v202_v32, %v201_v30  ;;  %v172_v43 = vld [vmem:[%s9223_s1 + $0x468] sm:$0xff]  ;;  %v189_v48 = vld [vmem:[%s9223_s1 + $0x4f0] sm:$0xff] }
  0x3b   :  { %4910 = vmatpush3.bf16.msra.mxu1 %v4909_v62  ;;  %v213_v62 = vld [vmem:[%s9223_s1 + $0x5b0] sm:$0xff]  ;;  %v204_v47 = vld [vmem:[%s9223_s1 + $0x568] sm:$0xff]  ;;  %v190_v49 = vld [vmem:[%s9223_s1 + $0x4f8] sm:$0xff] }
  0x3c   :  { %4912 = vmatprep.subr.bf16.mxu1 %v4911_v3  ;;  %v165_v3 = vld [vmem:[%s9223_s1 + $0x430] sm:$0xff]  ;;  %v4963_v6 = vpack.c.bf16 %v214_v63, %v213_v62  ;;  %v4947_v55 = vpack.c.bf16 %v190_v49, %v189_v48  ;;  %v174_v57 = vld [vmem:[%s9223_s1 + $0x478] sm:$0xff]  ;;  %v239_v60 = vld [vmem:[%s9223_s1 + $0x680] sm:$0xff] }
  0x3d   :  { %4882 = vmatpush3.bf16.msra.mxu0 %v4881_v9  ;;  %v184_v9 = vld [vmem:[%s9223_s1 + $0x4c8] sm:$0xff]  ;;  %v4933_v12 = vpack.c.bf16 %v166_v4, %v165_v3  ;;  %v221_v50 = vld [vmem:[%s9223_s1 + $0x5f0] sm:$0xff]  ;;  %v206_v59 = vld [vmem:[%s9223_s1 + $0x578] sm:$0xff] }
  0x3e   :  { %4884 = vmatprep.subr.bf16.mxu0 %v4883_v11  ;;  %v216_v11 = vld [vmem:[%s9223_s1 + $0x5c8] sm:$0xff]  ;;  %v4935_v15 = vpack.c.bf16 %v184_v9, %v183_v8  ;;  %v173_v56 = vld [vmem:[%s9223_s1 + $0x470] sm:$0xff]  ;;  %v271_v62 = vld [vmem:[%s9223_s1 + $0x780] sm:$0xff] }
  0x3f   :  { %4914 = vmatpush3.bf16.msra.mxu1 %v4913_v10  ;;  %v215_v10 = vld [vmem:[%s9223_s1 + $0x5c0] sm:$0xff]  ;;  %v240_v61 = vld [vmem:[%s9223_s1 + $0x688] sm:$0xff]  ;;  %v241_v9 = vld [vmem:[%s9223_s1 + $0x690] sm:$0xff] }
  0x40   :  { %4916 = vmatprep.subr.bf16.mxu1 %v4915_v16  ;;  %v167_v16 = vld [vmem:[%s9223_s1 + $0x440] sm:$0xff]  ;;  %v4967_v19 = vpack.c.bf16 %v216_v11, %v215_v10  ;;  %v272_v63 = vld [vmem:[%s9223_s1 + $0x788] sm:$0xff]  ;;  %v4983_v3 = vpack.c.bf16 %v240_v61, %v239_v60  ;;  %v242_v10 = vld [vmem:[%s9223_s1 + $0x698] sm:$0xff] }
  0x41   :  { %4886 = vmatpush3.bf16.msra.mxu0 %v4885_v22  ;;  %v186_v22 = vld [vmem:[%s9223_s1 + $0x4d8] sm:$0xff]  ;;  %v223_v4 = vld [vmem:[%s9223_s1 + $0x600] sm:$0xff]  ;;  %v224_v5 = vld [vmem:[%s9223_s1 + $0x608] sm:$0xff]  ;;  %v5015_v7 = vpack.c.bf16 %v272_v63, %v271_v62  ;;  %v4987_v18 = vpack.c.bf16 %v242_v10, %v241_v9 }
  0x42   :  { %4920 = vmatprep.subr.bf16.mxu0 %v4919_v25  ;;  %v4937_v25 = vpack.c.bf16 %v168_v17, %v167_v16  ;;  %v4939_v27 = vpack.c.bf16 %v186_v22, %v185_v21  ;;  %v256_v8 = vld [vmem:[%s9223_s1 + $0x708] sm:$0xff]  ;;  %v4985_v16 = vpack.c.bf16 %v224_v5, %v223_v4  ;;  %v226_v20 = vld [vmem:[%s9223_s1 + $0x618] sm:$0xff]  ;;  %v257_v21 = vld [vmem:[%s9223_s1 + $0x710] sm:$0xff] }
  0x43   :  { %4918 = vmatpush3.bf16.msra.mxu1 %v4917_v24  ;;  %v218_v24 = vld [vmem:[%s9223_s1 + $0x5d8] sm:$0xff]  ;;  %v261_v48 = vld [vmem:[%s9223_s1 + $0x730] sm:$0xff]  ;;  %v264_v61 = vld [vmem:[%s9223_s1 + $0x748] sm:$0xff] }
  0x44   :  { %4952 = vmatprep.subr.bf16.mxu1 %v4951_v29  ;;  %1619 = vmatmul.mubr.f32.vlgmr.msra.gmra.mrb[2].mxu0 %v6190_v33  ;;  %v4957_v33 = vpack.c.bf16 %v194_v46, %v193_v41  ;;  %v170_v29 = vld [vmem:[%s9223_s1 + $0x458] sm:$0xff]  ;;  %v4971_v31 = vpack.c.bf16 %v218_v24, %v217_v23  ;;  %v171_v41 = vld [vmem:[%s9223_s1 + $0x460] sm:$0xff]  ;;  %v249_v62 = vld [vmem:[%s9223_s1 + $0x6d0] sm:$0xff] }
  0x45   :  { %4922 = vmatpush3.bf16.msra.mxu0 %v4921_v35  ;;  %1758 = vmatprep.mubr.f32.mxu0 %v1127_v51  ;;  %v188_v35 = vld [vmem:[%s9223_s1 + $0x4e8] sm:$0xff]  ;;  %v222_v51 = vld [vmem:[%s9223_s1 + $0x5f8] sm:$0xff]  ;;  %v243_v24 = vld [vmem:[%s9223_s1 + $0x6a0] sm:$0xff] }
  0x46   :  { %1689 = vmatmul.mubr.f32.vlgmr.msra.gmra.mrb[2].mxu1 %v6213_v45  ;;  %4924 = vmatprep.subr.bf16.mxu0 %v4923_v38  ;;  %v1128_v45 = vcombine.high %v6353_v52, %v6353_v52  ;;  %v4941_v38 = vpack.c.bf16 %v170_v29, %v169_v28  ;;  %v4943_v40 = vpack.c.bf16 %v188_v35, %v187_v34  ;;  %v258_v23 = vld [vmem:[%s9223_s1 + $0x718] sm:$0xff]  ;;  %v276_v28 = vld [vmem:[%s9223_s1 + $0x7a8] sm:$0xff]  ;;  %v259_v35 = vld [vmem:[%s9223_s1 + $0x720] sm:$0xff] }
  0x47   :  { %4954 = vmatpush3.bf16.msra.mxu1 %v4953_v36  ;;  %v219_v36 = vld [vmem:[%s9223_s1 + $0x5e0] sm:$0xff]  ;;  %v228_v34 = vld [vmem:[%s9223_s1 + $0x628] sm:$0xff]  ;;  %v250_v63 = vld [vmem:[%s9223_s1 + $0x6d8] sm:$0xff] }
  0x48   :  { %4956 = vmatprep.subr.bf16.mxu1 %v4955_v44  ;;  %1828 = vmatprep.mubr.f32.mxu1 %v1128_v45  ;;  %v203_v44 = vld [vmem:[%s9223_s1 + $0x560] sm:$0xff]  ;;  %v4975_v46 = vpack.c.bf16 %v220_v37, %v219_v36  ;;  %v205_v45 = vld [vmem:[%s9223_s1 + $0x570] sm:$0xff]  ;;  %v5003_v4 = vpack.c.bf16 %v250_v63, %v249_v62  ;;  %v266_v9 = vld [vmem:[%s9223_s1 + $0x758] sm:$0xff] }
  0x49   :  { %4926 = vmatpush3.bf16.msra.mxu0 %v4925_v53  ;;  %v4945_v53 = vpack.c.bf16 %v172_v43, %v171_v41  ;;  %v245_v37 = vld [vmem:[%s9223_s1 + $0x6b0] sm:$0xff]  ;;  %v251_v10 = vld [vmem:[%s9223_s1 + $0x6e0] sm:$0xff] }
  0x4a   :  { %4928 = vmatprep.subr.bf16.mxu0 %v4927_v54  ;;  %v4977_v54 = vpack.c.bf16 %v204_v47, %v203_v44  ;;  %v230_v47 = vld [vmem:[%s9223_s1 + $0x638] sm:$0xff]  ;;  %v233_v5 = vld [vmem:[%s9223_s1 + $0x650] sm:$0xff] }
  0x4b   :  { %4958 = vmatpush3.bf16.msra.mxu1 %v4957_v33  ;;  %v18_v33 = vld [vmem:[%s9222_s0 + $0x18] sm:$0xff]  ;;  %v321_v62 = vld [vmem:[%s9223_s1 + $0x910] sm:$0xff] }
  0x4c   :  { %4960 = vmatprep.subr.bf16.mxu1 %v4959_v58  ;;  %v4979_v58 = vpack.c.bf16 %v222_v51, %v221_v50  ;;  %v6524_v11 = vrot.slane %v18_v33, %v6029_v13  ;;  %v262_v50 = vld [vmem:[%s9223_s1 + $0x738] sm:$0xff]  ;;  %v247_v51 = vld [vmem:[%s9223_s1 + $0x6c0] sm:$0xff] }
  0x4d   :  { %4930 = vmatpush3.bf16.msra.mxu0 %v4929_v0  ;;  %v1129_v0 = vcombine.high %v18_v33, %v18_v33  ;;  %v279_v33 = vld [vmem:[%s9223_s1 + $0x7c0] sm:$0xff] }
  0x4e   :  { %4932 = vmatprep.subr.bf16.mxu0 %v4931_v2  ;;  %v4981_v2 = vpack.c.bf16 %v206_v59, %v205_v45  ;;  %v231_v45 = vld [vmem:[%s9223_s1 + $0x640] sm:$0xff] }
  0x4f   :  { %4962 = vmatpush3.bf16.msra.mxu1 %v4961_v1  ;;  %v4949_v1 = vpack.c.bf16 %v174_v57, %v173_v56  ;;  %v5029_v56 = vpack.c.bf16 %v262_v50, %v261_v48  ;;  %v263_v59 = vld [vmem:[%s9223_s1 + $0x740] sm:$0xff]  ;;  %v288_v48 = vld [vmem:[%s9223_s1 + $0x808] sm:$0xff] }
  0x50   :  { %4964 = vmatprep.subr.bf16.mxu1 %v4963_v6  ;;  %v255_v6 = vld [vmem:[%s9223_s1 + $0x700] sm:$0xff] }
  0x51   :  { %4934 = vmatpush3.bf16.msra.mxu0 %v4933_v12  ;;  %v273_v12 = vld [vmem:[%s9223_s1 + $0x790] sm:$0xff]  ;;  %v5017_v17 = vpack.c.bf16 %v256_v8, %v255_v6  ;;  %v234_v6 = vld [vmem:[%s9223_s1 + $0x658] sm:$0xff] }
  0x52   :  { %4936 = vmatprep.subr.bf16.mxu0 %v4935_v15  ;;  %v6533_v15 = vrot.slane %v1129_v0, %v6029_v13  ;;  %v281_v0 = vld [vmem:[%s9223_s1 + $0x7d0] sm:$0xff] }
  0x53   :  { %4966 = vmatpush3.bf16.msra.mxu1 %v4965_v14  ;;  %v274_v14 = vld [vmem:[%s9223_s1 + $0x798] sm:$0xff] }
  0x54   :  { %4968 = vmatprep.subr.bf16.mxu1 %v4967_v19  ;;  %v225_v19 = vld [vmem:[%s9223_s1 + $0x610] sm:$0xff]  ;;  %v5019_v22 = vpack.c.bf16 %v274_v14, %v273_v12  ;;  %v1145_v29 = vcombine.high %v6533_v15, %v6533_v15  ;;  %v252_v12 = vld [vmem:[%s9223_s1 + $0x6e8] sm:$0xff]  ;;  %v283_v14 = vld [vmem:[%s9223_s1 + $0x7e0] sm:$0xff] }
  0x55   :  { %4938 = vmatpush3.bf16.msra.mxu0 %v4937_v25  ;;  %v244_v25 = vld [vmem:[%s9223_s1 + $0x6a8] sm:$0xff]  ;;  %v4989_v30 = vpack.c.bf16 %v226_v20, %v225_v19  ;;  %v5007_v19 = vpack.c.bf16 %v252_v12, %v251_v10  ;;  %v235_v20 = vld [vmem:[%s9223_s1 + $0x660] sm:$0xff] }
  0x56   :  { %4940 = vmatprep.subr.bf16.mxu0 %v4939_v27  ;;  %v275_v27 = vld [vmem:[%s9223_s1 + $0x7a0] sm:$0xff]  ;;  %v4991_v32 = vpack.c.bf16 %v244_v25, %v243_v24  ;;  %v268_v24 = vld [vmem:[%s9223_s1 + $0x768] sm:$0xff]  ;;  %v253_v25 = vld [vmem:[%s9223_s1 + $0x6f0] sm:$0xff] }
  0x57   :  { %4970 = vmatpush3.bf16.msra.mxu1 %v4969_v26  ;;  %v1144_v26 = vcombine.high %v6524_v11, %v6524_v11  ;;  %v5023_v36 = vpack.c.bf16 %v276_v28, %v275_v27  ;;  %v285_v27 = vld [vmem:[%s9223_s1 + $0x7f0] sm:$0xff]  ;;  %v286_v28 = vld [vmem:[%s9223_s1 + $0x7f8] sm:$0xff]  ;;  %v292_v10 = vld [vmem:[%s9223_s1 + $0x828] sm:$0xff] }
  0x58   :  { %4972 = vmatprep.subr.bf16.mxu1 %v4971_v31  ;;  %v5021_v31 = vpack.c.bf16 %v258_v23, %v257_v21  ;;  %v236_v21 = vld [vmem:[%s9223_s1 + $0x668] sm:$0xff]  ;;  %v323_v12 = vld [vmem:[%s9223_s1 + $0x920] sm:$0xff] }
  0x59   :  { %4942 = vmatpush3.bf16.msra.mxu0 %v4941_v38  ;;  %v246_v38 = vld [vmem:[%s9223_s1 + $0x6b8] sm:$0xff] }
  0x5a   :  { %4944 = vmatprep.subr.bf16.mxu0 %v4943_v40  ;;  %v278_v40 = vld [vmem:[%s9223_s1 + $0x7b8] sm:$0xff]  ;;  %v4995_v44 = vpack.c.bf16 %v246_v38, %v245_v37  ;;  %v303_v37 = vld [vmem:[%s9223_s1 + $0x880] sm:$0xff]  ;;  %v304_v38 = vld [vmem:[%s9223_s1 + $0x888] sm:$0xff] }
  0x5b   :  { %4974 = vmatpush3.bf16.msra.mxu1 %v4973_v39  ;;  %v277_v39 = vld [vmem:[%s9223_s1 + $0x7b0] sm:$0xff] }
  0x5c   :  { %4976 = vmatprep.subr.bf16.mxu1 %v4975_v46  ;;  %v229_v46 = vld [vmem:[%s9223_s1 + $0x630] sm:$0xff]  ;;  %v5027_v49 = vpack.c.bf16 %v278_v40, %v277_v39  ;;  %v335_v39 = vld [vmem:[%s9223_s1 + $0x980] sm:$0xff]  ;;  %v336_v40 = vld [vmem:[%s9223_s1 + $0x988] sm:$0xff] }
  0x5d   :  { %4946 = vmatpush3.bf16.msra.mxu0 %v4945_v53  ;;  %v248_v53 = vld [vmem:[%s9223_s1 + $0x6c8] sm:$0xff]  ;;  %v5079_v50 = vpack.c.bf16 %v336_v40, %v335_v39  ;;  %v313_v39 = vld [vmem:[%s9223_s1 + $0x8d0] sm:$0xff]  ;;  %v314_v40 = vld [vmem:[%s9223_s1 + $0x8d8] sm:$0xff] }
  0x5e   :  { %4948 = vmatprep.subr.bf16.mxu0 %v4947_v55  ;;  %v4997_v55 = vpack.c.bf16 %v230_v47, %v229_v46  ;;  %v4999_v57 = vpack.c.bf16 %v248_v53, %v247_v51  ;;  %v5047_v46 = vpack.c.bf16 %v304_v38, %v303_v37  ;;  %v287_v47 = vld [vmem:[%s9223_s1 + $0x800] sm:$0xff]  ;;  %v320_v51 = vld [vmem:[%s9223_s1 + $0x908] sm:$0xff]  ;;  %v305_v53 = vld [vmem:[%s9223_s1 + $0x890] sm:$0xff] }
  0x5f   :  { %4978 = vmatpush3.bf16.msra.mxu1 %v4977_v54  ;;  %v280_v54 = vld [vmem:[%s9223_s1 + $0x7c8] sm:$0xff] }
  0x60   :  { %4980 = vmatprep.subr.bf16.mxu1 %v4979_v58  ;;  %v232_v58 = vld [vmem:[%s9223_s1 + $0x648] sm:$0xff]  ;;  %v5031_v60 = vpack.c.bf16 %v280_v54, %v279_v33  ;;  %v306_v33 = vld [vmem:[%s9223_s1 + $0x898] sm:$0xff] }
  0x61   :  { %4950 = vmatpush3.bf16.msra.mxu0 %v4949_v1  ;;  %v282_v1 = vld [vmem:[%s9223_s1 + $0x7d8] sm:$0xff]  ;;  %v328_v38 = vld [vmem:[%s9223_s1 + $0x948] sm:$0xff] }
  0x62   :  { %4984 = vmatprep.subr.bf16.mxu0 %v4983_v3  ;;  %v5033_v3 = vpack.c.bf16 %v264_v61, %v263_v59  ;;  %v5035_v8 = vpack.c.bf16 %v282_v1, %v281_v0  ;;  %v5051_v59 = vpack.c.bf16 %v306_v33, %v305_v53  ;;  %v290_v61 = vld [vmem:[%s9223_s1 + $0x818] sm:$0xff]  ;;  %v307_v1 = vld [vmem:[%s9223_s1 + $0x8a0] sm:$0xff] }
  0x63   :  { %4982 = vmatpush3.bf16.msra.mxu1 %v4981_v2  ;;  %v5001_v2 = vpack.c.bf16 %v232_v58, %v231_v45  ;;  %v5049_v45 = vpack.c.bf16 %v288_v48, %v287_v47  ;;  %v322_v0 = vld [vmem:[%s9223_s1 + $0x918] sm:$0xff]  ;;  %v5067_v47 = vpack.c.bf16 %v314_v40, %v313_v39  ;;  %v297_v48 = vld [vmem:[%s9223_s1 + $0x850] sm:$0xff]  ;;  %v315_v33 = vld [vmem:[%s9223_s1 + $0x8e0] sm:$0xff] }
  0x64   :  { %5016 = vmatprep.subr.bf16.mxu1 %v5015_v7  ;;  %1759 = vmatmul.mubr.f32.vlgmr.msra.gmra.mrb[4].mxu0 %v6332_v42  ;;  %v227_v42 = vld [vmem:[%s9223_s1 + $0x620] sm:$0xff]  ;;  %v265_v7 = vld [vmem:[%s9223_s1 + $0x750] sm:$0xff]  ;;  %v330_v53 = vld [vmem:[%s9223_s1 + $0x958] sm:$0xff] }
  0x65   :  { %4986 = vmatpush3.bf16.msra.mxu0 %v4985_v16  ;;  %1898 = vmatprep.mubr.f32.mxu0 %v1144_v26  ;;  %v4993_v41 = vpack.c.bf16 %v228_v34, %v227_v42  ;;  %v284_v16 = vld [vmem:[%s9223_s1 + $0x7e8] sm:$0xff]  ;;  %v254_v26 = vld [vmem:[%s9223_s1 + $0x6f8] sm:$0xff]  ;;  %v237_v42 = vld [vmem:[%s9223_s1 + $0x670] sm:$0xff] }
  0x66   :  { %1829 = vmatmul.mubr.f32.vlgmr.msra.gmra.mrb[4].mxu1 %v6353_v52  ;;  %4988 = vmatprep.subr.bf16.mxu0 %v4987_v18  ;;  %v260_v52 = vld [vmem:[%s9223_s1 + $0x728] sm:$0xff]  ;;  %v5037_v18 = vpack.c.bf16 %v266_v9, %v265_v7  ;;  %v5039_v23 = vpack.c.bf16 %v284_v16, %v283_v14  ;;  %v238_v34 = vld [vmem:[%s9223_s1 + $0x678] sm:$0xff]  ;;  %v309_v16 = vld [vmem:[%s9223_s1 + $0x8b0] sm:$0xff] }
  0x67   :  { %5018 = vmatpush3.bf16.msra.mxu1 %v5017_v17  ;;  %1968 = vmatprep.mubr.f32.mxu1 %v1145_v29  ;;  %v5025_v43 = vpack.c.bf16 %v260_v52, %v259_v35  ;;  %v5005_v17 = vpack.c.bf16 %v234_v6, %v233_v5  ;;  %v5009_v29 = vpack.c.bf16 %v236_v21, %v235_v20  ;;  %v269_v35 = vld [vmem:[%s9223_s1 + $0x770] sm:$0xff]  ;;  %v270_v52 = vld [vmem:[%s9223_s1 + $0x778] sm:$0xff]  ;;  %v340_v5 = vld [vmem:[%s9223_s1 + $0x9a8] sm:$0xff] }
  0x68   :  { %5020 = vmatprep.subr.bf16.mxu1 %v5019_v22  ;;  %v267_v22 = vld [vmem:[%s9223_s1 + $0x760] sm:$0xff]  ;;  %v385_v39 = vld [vmem:[%s9223_s1 + $0xb10] sm:$0xff] }
  0x69   :  { %4990 = vmatpush3.bf16.msra.mxu0 %v4989_v30  ;;  %v19_v30 = vld [vmem:[%s9222_s0 + $0x20] sm:$0xff] }
  0x6a   :  { %4992 = vmatprep.subr.bf16.mxu0 %v4991_v32  ;;  %v5011_v32 = vpack.c.bf16 %v254_v26, %v253_v25  ;;  %v6731_v54 = vrot.slane %v19_v30, %v6029_v13  ;;  %v325_v25 = vld [vmem:[%s9223_s1 + $0x930] sm:$0xff] }
  0x6b   :  { %5022 = vmatpush3.bf16.msra.mxu1 %v5021_v31  ;;  %v5041_v31 = vpack.c.bf16 %v268_v24, %v267_v22  ;;  %v294_v24 = vld [vmem:[%s9223_s1 + $0x838] sm:$0xff] }
  0x6c   :  { %5024 = vmatprep.subr.bf16.mxu1 %v5023_v36  ;;  %v5043_v36 = vpack.c.bf16 %v286_v28, %v285_v27  ;;  %v326_v27 = vld [vmem:[%s9223_s1 + $0x938] sm:$0xff]  ;;  %v311_v28 = vld [vmem:[%s9223_s1 + $0x8c0] sm:$0xff] }
  0x6d   :  { %4994 = vmatpush3.bf16.msra.mxu0 %v4993_v41  ;;  %v1146_v41 = vcombine.high %v19_v30, %v19_v30  ;;  %v343_v30 = vld [vmem:[%s9223_s1 + $0x9c0] sm:$0xff] }
  0x6e   :  { %4996 = vmatprep.subr.bf16.mxu0 %v4995_v44  ;;  %v5045_v44 = vpack.c.bf16 %v270_v52, %v269_v35  ;;  %v295_v35 = vld [vmem:[%s9223_s1 + $0x840] sm:$0xff] }
  0x6f   :  { %5026 = vmatpush3.bf16.msra.mxu1 %v5025_v43  ;;  %v5013_v43 = vpack.c.bf16 %v238_v34, %v237_v42  ;;  %v5093_v42 = vpack.c.bf16 %v326_v27, %v325_v25  ;;  %v327_v52 = vld [vmem:[%s9223_s1 + $0x940] sm:$0xff]  ;;  %v352_v25 = vld [vmem:[%s9223_s1 + $0xa08] sm:$0xff] }
  0x70   :  { %5028 = vmatprep.subr.bf16.mxu1 %v5027_v49  ;;  %v319_v49 = vld [vmem:[%s9223_s1 + $0x900] sm:$0xff] }
  0x71   :  { %4998 = vmatpush3.bf16.msra.mxu0 %v4997_v55  ;;  %v337_v55 = vld [vmem:[%s9223_s1 + $0x990] sm:$0xff]  ;;  %v5081_v58 = vpack.c.bf16 %v320_v51, %v319_v49  ;;  %v298_v49 = vld [vmem:[%s9223_s1 + $0x858] sm:$0xff] }
  0x72   :  { %5000 = vmatprep.subr.bf16.mxu0 %v4999_v57  ;;  %v6740_v57 = vrot.slane %v1146_v41, %v6029_v13  ;;  %v345_v41 = vld [vmem:[%s9223_s1 + $0x9d0] sm:$0xff] }
  0x73   :  { %5030 = vmatpush3.bf16.msra.mxu1 %v5029_v56  ;;  %v338_v56 = vld [vmem:[%s9223_s1 + $0x998] sm:$0xff] }
  0x74   :  { %5032 = vmatprep.subr.bf16.mxu1 %v5031_v60  ;;  %v289_v60 = vld [vmem:[%s9223_s1 + $0x810] sm:$0xff]  ;;  %v5083_v63 = vpack.c.bf16 %v338_v56, %v337_v55  ;;  %v1162_v6 = vcombine.high %v6740_v57, %v6740_v57  ;;  %v316_v55 = vld [vmem:[%s9223_s1 + $0x8e8] sm:$0xff]  ;;  %v347_v56 = vld [vmem:[%s9223_s1 + $0x9e0] sm:$0xff] }
  0x75   :  { %5002 = vmatpush3.bf16.msra.mxu0 %v5001_v2  ;;  %v308_v2 = vld [vmem:[%s9223_s1 + $0x8a8] sm:$0xff]  ;;  %v5053_v7 = vpack.c.bf16 %v290_v61, %v289_v60  ;;  %v5071_v60 = vpack.c.bf16 %v316_v55, %v315_v33  ;;  %v299_v61 = vld [vmem:[%s9223_s1 + $0x860] sm:$0xff] }
  0x76   :  { %5004 = vmatprep.subr.bf16.mxu0 %v5003_v4  ;;  %v339_v4 = vld [vmem:[%s9223_s1 + $0x9a0] sm:$0xff]  ;;  %v5055_v9 = vpack.c.bf16 %v308_v2, %v307_v1  ;;  %v332_v1 = vld [vmem:[%s9223_s1 + $0x968] sm:$0xff]  ;;  %v317_v2 = vld [vmem:[%s9223_s1 + $0x8f0] sm:$0xff] }
  0x77   :  { %5034 = vmatpush3.bf16.msra.mxu1 %v5033_v3  ;;  %v1161_v3 = vcombine.high %v6731_v54, %v6731_v54  ;;  %v5087_v14 = vpack.c.bf16 %v340_v5, %v339_v4  ;;  %v349_v4 = vld [vmem:[%s9223_s1 + $0x9f0] sm:$0xff]  ;;  %v350_v5 = vld [vmem:[%s9223_s1 + $0x9f8] sm:$0xff]  ;;  %v356_v33 = vld [vmem:[%s9223_s1 + $0xa28] sm:$0xff] }
  0x78   :  { %5036 = vmatprep.subr.bf16.mxu1 %v5035_v8  ;;  %v5085_v8 = vpack.c.bf16 %v322_v0, %v321_v62  ;;  %v300_v62 = vld [vmem:[%s9223_s1 + $0x868] sm:$0xff]  ;;  %v387_v55 = vld [vmem:[%s9223_s1 + $0xb20] sm:$0xff] }
  0x79   :  { %5006 = vmatpush3.bf16.msra.mxu0 %v5005_v17  ;;  %v310_v17 = vld [vmem:[%s9223_s1 + $0x8b8] sm:$0xff] }
  0x7a   :  { %5008 = vmatprep.subr.bf16.mxu0 %v5007_v19  ;;  %v342_v19 = vld [vmem:[%s9223_s1 + $0x9b8] sm:$0xff]  ;;  %v5059_v22 = vpack.c.bf16 %v310_v17, %v309_v16  ;;  %v367_v16 = vld [vmem:[%s9223_s1 + $0xa80] sm:$0xff]  ;;  %v368_v17 = vld [vmem:[%s9223_s1 + $0xa88] sm:$0xff] }
  0x7b   :  { %5038 = vmatpush3.bf16.msra.mxu1 %v5037_v18  ;;  %v341_v18 = vld [vmem:[%s9223_s1 + $0x9b0] sm:$0xff] }
  0x7c   :  { %5040 = vmatprep.subr.bf16.mxu1 %v5039_v23  ;;  %v293_v23 = vld [vmem:[%s9223_s1 + $0x830] sm:$0xff]  ;;  %v5091_v26 = vpack.c.bf16 %v342_v19, %v341_v18  ;;  %v399_v18 = vld [vmem:[%s9223_s1 + $0xb80] sm:$0xff]  ;;  %v400_v19 = vld [vmem:[%s9223_s1 + $0xb88] sm:$0xff] }
  0x7d   :  { %5010 = vmatpush3.bf16.msra.mxu0 %v5009_v29  ;;  %v312_v29 = vld [vmem:[%s9223_s1 + $0x8c8] sm:$0xff]  ;;  %v5143_v27 = vpack.c.bf16 %v400_v19, %v399_v18  ;;  %v377_v18 = vld [vmem:[%s9223_s1 + $0xad0] sm:$0xff]  ;;  %v378_v19 = vld [vmem:[%s9223_s1 + $0xad8] sm:$0xff] }
  0x7e   :  { %5012 = vmatprep.subr.bf16.mxu0 %v5011_v32  ;;  %v5061_v32 = vpack.c.bf16 %v294_v24, %v293_v23  ;;  %v5063_v34 = vpack.c.bf16 %v312_v29, %v311_v28  ;;  %v5111_v23 = vpack.c.bf16 %v368_v17, %v367_v16  ;;  %v351_v24 = vld [vmem:[%s9223_s1 + $0xa00] sm:$0xff]  ;;  %v384_v28 = vld [vmem:[%s9223_s1 + $0xb08] sm:$0xff]  ;;  %v369_v29 = vld [vmem:[%s9223_s1 + $0xa90] sm:$0xff] }
  0x7f   :  { %5042 = vmatpush3.bf16.msra.mxu1 %v5041_v31  ;;  %v344_v31 = vld [vmem:[%s9223_s1 + $0x9c8] sm:$0xff] }
  0x80   :  { %5044 = vmatprep.subr.bf16.mxu1 %v5043_v36  ;;  %v296_v36 = vld [vmem:[%s9223_s1 + $0x848] sm:$0xff]  ;;  %v5095_v37 = vpack.c.bf16 %v344_v31, %v343_v30  ;;  %v370_v30 = vld [vmem:[%s9223_s1 + $0xa98] sm:$0xff] }
  0x81   :  { %5014 = vmatpush3.bf16.msra.mxu0 %v5013_v43  ;;  %v346_v43 = vld [vmem:[%s9223_s1 + $0x9d8] sm:$0xff]  ;;  %v392_v17 = vld [vmem:[%s9223_s1 + $0xb48] sm:$0xff] }
  0x82   :  { %5048 = vmatprep.subr.bf16.mxu0 %v5047_v46  ;;  %v5097_v46 = vpack.c.bf16 %v328_v38, %v327_v52  ;;  %v5099_v51 = vpack.c.bf16 %v346_v43, %v345_v41  ;;  %v5115_v52 = vpack.c.bf16 %v370_v30, %v369_v29  ;;  %v354_v38 = vld [vmem:[%s9223_s1 + $0xa18] sm:$0xff]  ;;  %v371_v43 = vld [vmem:[%s9223_s1 + $0xaa0] sm:$0xff] }
  0x83   :  { %5046 = vmatpush3.bf16.msra.mxu1 %v5045_v44  ;;  %v5065_v44 = vpack.c.bf16 %v296_v36, %v295_v35  ;;  %v5113_v35 = vpack.c.bf16 %v352_v25, %v351_v24  ;;  %v386_v41 = vld [vmem:[%s9223_s1 + $0xb18] sm:$0xff]  ;;  %v5131_v24 = vpack.c.bf16 %v378_v19, %v377_v18  ;;  %v361_v25 = vld [vmem:[%s9223_s1 + $0xa50] sm:$0xff]  ;;  %v379_v30 = vld [vmem:[%s9223_s1 + $0xae0] sm:$0xff] }
  0x84   :  { %5080 = vmatprep.subr.bf16.mxu1 %v5079_v50  ;;  %1899 = vmatmul.mubr.f32.vlgmr.msra.gmra.mrb[6].mxu0 %v6524_v11  ;;  %v291_v11 = vld [vmem:[%s9223_s1 + $0x820] sm:$0xff]  ;;  %v329_v50 = vld [vmem:[%s9223_s1 + $0x950] sm:$0xff]  ;;  %v394_v29 = vld [vmem:[%s9223_s1 + $0xb58] sm:$0xff] }
  0x85   :  { %5050 = vmatpush3.bf16.msra.mxu0 %v5049_v45  ;;  %2038 = vmatprep.mubr.f32.mxu0 %v1161_v3  ;;  %v5057_v20 = vpack.c.bf16 %v292_v10, %v291_v11  ;;  %v348_v45 = vld [vmem:[%s9223_s1 + $0x9e8] sm:$0xff]  ;;  %v318_v3 = vld [vmem:[%s9223_s1 + $0x8f8] sm:$0xff]  ;;  %v301_v11 = vld [vmem:[%s9223_s1 + $0x870] sm:$0xff] }
  0x86   :  { %1969 = vmatmul.mubr.f32.vlgmr.msra.gmra.mrb[6].mxu1 %v6533_v15  ;;  %5052 = vmatprep.subr.bf16.mxu0 %v5051_v59  ;;  %v324_v15 = vld [vmem:[%s9223_s1 + $0x928] sm:$0xff]  ;;  %v5101_v59 = vpack.c.bf16 %v330_v53, %v329_v50  ;;  %v5103_v0 = vpack.c.bf16 %v348_v45, %v347_v56  ;;  %v302_v10 = vld [vmem:[%s9223_s1 + $0x878] sm:$0xff]  ;;  %v373_v45 = vld [vmem:[%s9223_s1 + $0xab0] sm:$0xff] }
  0x87   :  { %5082 = vmatpush3.bf16.msra.mxu1 %v5081_v58  ;;  %2108 = vmatprep.mubr.f32.mxu1 %v1162_v6  ;;  %v5089_v21 = vpack.c.bf16 %v324_v15, %v323_v12  ;;  %v5069_v58 = vpack.c.bf16 %v298_v49, %v297_v48  ;;  %v5073_v6 = vpack.c.bf16 %v300_v62, %v299_v61  ;;  %v333_v12 = vld [vmem:[%s9223_s1 + $0x970] sm:$0xff]  ;;  %v334_v15 = vld [vmem:[%s9223_s1 + $0x978] sm:$0xff]  ;;  %v404_v48 = vld [vmem:[%s9223_s1 + $0xba8] sm:$0xff] }
  0x88   :  { %5084 = vmatprep.subr.bf16.mxu1 %v5083_v63  ;;  %v331_v63 = vld [vmem:[%s9223_s1 + $0x960] sm:$0xff]  ;;  %v449_v18 = vld [vmem:[%s9223_s1 + $0xd10] sm:$0xff] }
  0x89   :  { %5054 = vmatpush3.bf16.msra.mxu0 %v5053_v7  ;;  %v20_v7 = vld [vmem:[%s9222_s0 + $0x28] sm:$0xff] }
  0x8a   :  { %5056 = vmatprep.subr.bf16.mxu0 %v5055_v9  ;;  %v5075_v9 = vpack.c.bf16 %v318_v3, %v317_v2  ;;  %v6938_v31 = vrot.slane %v20_v7, %v6029_v13  ;;  %v389_v2 = vld [vmem:[%s9223_s1 + $0xb30] sm:$0xff] }
  0x8b   :  { %5086 = vmatpush3.bf16.msra.mxu1 %v5085_v8  ;;  %v5105_v8 = vpack.c.bf16 %v332_v1, %v331_v63  ;;  %v358_v1 = vld [vmem:[%s9223_s1 + $0xa38] sm:$0xff] }
  0x8c   :  { %5088 = vmatprep.subr.bf16.mxu1 %v5087_v14  ;;  %v5107_v14 = vpack.c.bf16 %v350_v5, %v349_v4  ;;  %v390_v4 = vld [vmem:[%s9223_s1 + $0xb38] sm:$0xff]  ;;  %v375_v5 = vld [vmem:[%s9223_s1 + $0xac0] sm:$0xff] }
  0x8d   :  { %5058 = vmatpush3.bf16.msra.mxu0 %v5057_v20  ;;  %v1163_v20 = vcombine.high %v20_v7, %v20_v7  ;;  %v407_v7 = vld [vmem:[%s9223_s1 + $0xbc0] sm:$0xff] }
  0x8e   :  { %5060 = vmatprep.subr.bf16.mxu0 %v5059_v22  ;;  %v5109_v22 = vpack.c.bf16 %v334_v15, %v333_v12  ;;  %v359_v12 = vld [vmem:[%s9223_s1 + $0xa40] sm:$0xff] }
  0x8f   :  { %5090 = vmatpush3.bf16.msra.mxu1 %v5089_v21  ;;  %v5077_v21 = vpack.c.bf16 %v302_v10, %v301_v11  ;;  %v5157_v11 = vpack.c.bf16 %v390_v4, %v389_v2  ;;  %v391_v15 = vld [vmem:[%s9223_s1 + $0xb40] sm:$0xff]  ;;  %v416_v2 = vld [vmem:[%s9223_s1 + $0xc08] sm:$0xff] }
  0x90   :  { %5092 = vmatprep.subr.bf16.mxu1 %v5091_v26  ;;  %v383_v26 = vld [vmem:[%s9223_s1 + $0xb00] sm:$0xff] }
  0x91   :  { %5062 = vmatpush3.bf16.msra.mxu0 %v5061_v32  ;;  %v401_v32 = vld [vmem:[%s9223_s1 + $0xb90] sm:$0xff]  ;;  %v5145_v36 = vpack.c.bf16 %v384_v28, %v383_v26  ;;  %v362_v26 = vld [vmem:[%s9223_s1 + $0xa58] sm:$0xff] }
  0x92   :  { %5064 = vmatprep.subr.bf16.mxu0 %v5063_v34  ;;  %v6947_v34 = vrot.slane %v1163_v20, %v6029_v13  ;;  %v409_v20 = vld [vmem:[%s9223_s1 + $0xbd0] sm:$0xff] }
  0x93   :  { %5094 = vmatpush3.bf16.msra.mxu1 %v5093_v42  ;;  %v402_v42 = vld [vmem:[%s9223_s1 + $0xb98] sm:$0xff] }
  0x94   :  { %5096 = vmatprep.subr.bf16.mxu1 %v5095_v37  ;;  %v353_v37 = vld [vmem:[%s9223_s1 + $0xa10] sm:$0xff]  ;;  %v5147_v40 = vpack.c.bf16 %v402_v42, %v401_v32  ;;  %v1179_v49 = vcombine.high %v6947_v34, %v6947_v34  ;;  %v380_v32 = vld [vmem:[%s9223_s1 + $0xae8] sm:$0xff]  ;;  %v411_v42 = vld [vmem:[%s9223_s1 + $0xbe0] sm:$0xff] }
  0x95   :  { %5066 = vmatpush3.bf16.msra.mxu0 %v5065_v44  ;;  %v372_v44 = vld [vmem:[%s9223_s1 + $0xaa8] sm:$0xff]  ;;  %v5117_v50 = vpack.c.bf16 %v354_v38, %v353_v37  ;;  %v5135_v37 = vpack.c.bf16 %v380_v32, %v379_v30  ;;  %v363_v38 = vld [vmem:[%s9223_s1 + $0xa60] sm:$0xff] }
  0x96   :  { %5068 = vmatprep.subr.bf16.mxu0 %v5067_v47  ;;  %v403_v47 = vld [vmem:[%s9223_s1 + $0xba0] sm:$0xff]  ;;  %v5119_v53 = vpack.c.bf16 %v372_v44, %v371_v43  ;;  %v396_v43 = vld [vmem:[%s9223_s1 + $0xb68] sm:$0xff]  ;;  %v381_v44 = vld [vmem:[%s9223_s1 + $0xaf0] sm:$0xff] }
  0x97   :  { %5098 = vmatpush3.bf16.msra.mxu1 %v5097_v46  ;;  %v1178_v46 = vcombine.high %v6938_v31, %v6938_v31  ;;  %v5151_v56 = vpack.c.bf16 %v404_v48, %v403_v47  ;;  %v413_v47 = vld [vmem:[%s9223_s1 + $0xbf0] sm:$0xff]  ;;  %v414_v48 = vld [vmem:[%s9223_s1 + $0xbf8] sm:$0xff]  ;;  %v420_v30 = vld [vmem:[%s9223_s1 + $0xc28] sm:$0xff] }
  0x98   :  { %5100 = vmatprep.subr.bf16.mxu1 %v5099_v51  ;;  %v5149_v51 = vpack.c.bf16 %v386_v41, %v385_v39  ;;  %v364_v39 = vld [vmem:[%s9223_s1 + $0xa68] sm:$0xff]  ;;  %v451_v32 = vld [vmem:[%s9223_s1 + $0xd20] sm:$0xff] }
  0x99   :  { %5070 = vmatpush3.bf16.msra.mxu0 %v5069_v58  ;;  %v374_v58 = vld [vmem:[%s9223_s1 + $0xab8] sm:$0xff] }
  0x9a   :  { %5072 = vmatprep.subr.bf16.mxu0 %v5071_v60  ;;  %v406_v60 = vld [vmem:[%s9223_s1 + $0xbb8] sm:$0xff]  ;;  %v5123_v63 = vpack.c.bf16 %v374_v58, %v373_v45  ;;  %v431_v45 = vld [vmem:[%s9223_s1 + $0xc80] sm:$0xff]  ;;  %v432_v58 = vld [vmem:[%s9223_s1 + $0xc88] sm:$0xff] }
  0x9b   :  { %5102 = vmatpush3.bf16.msra.mxu1 %v5101_v59  ;;  %v405_v59 = vld [vmem:[%s9223_s1 + $0xbb0] sm:$0xff] }
  0x9c   :  { %5104 = vmatprep.subr.bf16.mxu1 %v5103_v0  ;;  %v357_v0 = vld [vmem:[%s9223_s1 + $0xa30] sm:$0xff]  ;;  %v5155_v3 = vpack.c.bf16 %v406_v60, %v405_v59  ;;  %v463_v59 = vld [vmem:[%s9223_s1 + $0xd80] sm:$0xff]  ;;  %v464_v60 = vld [vmem:[%s9223_s1 + $0xd88] sm:$0xff] }
  0x9d   :  { %5074 = vmatpush3.bf16.msra.mxu0 %v5073_v6  ;;  %v376_v6 = vld [vmem:[%s9223_s1 + $0xac8] sm:$0xff]  ;;  %v5207_v4 = vpack.c.bf16 %v464_v60, %v463_v59  ;;  %v441_v59 = vld [vmem:[%s9223_s1 + $0xcd0] sm:$0xff]  ;;  %v442_v60 = vld [vmem:[%s9223_s1 + $0xcd8] sm:$0xff] }
  0x9e   :  { %5076 = vmatprep.subr.bf16.mxu0 %v5075_v9  ;;  %v5125_v9 = vpack.c.bf16 %v358_v1, %v357_v0  ;;  %v5127_v10 = vpack.c.bf16 %v376_v6, %v375_v5  ;;  %v5175_v0 = vpack.c.bf16 %v432_v58, %v431_v45  ;;  %v415_v1 = vld [vmem:[%s9223_s1 + $0xc00] sm:$0xff]  ;;  %v448_v5 = vld [vmem:[%s9223_s1 + $0xd08] sm:$0xff]  ;;  %v433_v6 = vld [vmem:[%s9223_s1 + $0xc90] sm:$0xff] }
  0x9f   :  { %5106 = vmatpush3.bf16.msra.mxu1 %v5105_v8  ;;  %v408_v8 = vld [vmem:[%s9223_s1 + $0xbc8] sm:$0xff] }
  0xa0   :  { %5108 = vmatprep.subr.bf16.mxu1 %v5107_v14  ;;  %v360_v14 = vld [vmem:[%s9223_s1 + $0xa48] sm:$0xff]  ;;  %v5159_v16 = vpack.c.bf16 %v408_v8, %v407_v7  ;;  %v434_v7 = vld [vmem:[%s9223_s1 + $0xc98] sm:$0xff] }
  0xa1   :  { %5078 = vmatpush3.bf16.msra.mxu0 %v5077_v21  ;;  %v410_v21 = vld [vmem:[%s9223_s1 + $0xbd8] sm:$0xff]  ;;  %v456_v58 = vld [vmem:[%s9223_s1 + $0xd48] sm:$0xff] }
  0xa2   :  { %5112 = vmatprep.subr.bf16.mxu0 %v5111_v23  ;;  %v5161_v23 = vpack.c.bf16 %v392_v17, %v391_v15  ;;  %v5163_v28 = vpack.c.bf16 %v410_v21, %v409_v20  ;;  %v5179_v15 = vpack.c.bf16 %v434_v7, %v433_v6  ;;  %v418_v17 = vld [vmem:[%s9223_s1 + $0xc18] sm:$0xff]  ;;  %v435_v21 = vld [vmem:[%s9223_s1 + $0xca0] sm:$0xff] }
  0xa3   :  { %5110 = vmatpush3.bf16.msra.mxu1 %v5109_v22  ;;  %v5129_v22 = vpack.c.bf16 %v360_v14, %v359_v12  ;;  %v5177_v12 = vpack.c.bf16 %v416_v2, %v415_v1  ;;  %v450_v20 = vld [vmem:[%s9223_s1 + $0xd18] sm:$0xff]  ;;  %v5195_v1 = vpack.c.bf16 %v442_v60, %v441_v59  ;;  %v425_v2 = vld [vmem:[%s9223_s1 + $0xc50] sm:$0xff]  ;;  %v443_v7 = vld [vmem:[%s9223_s1 + $0xce0] sm:$0xff] }
  0xa4   :  { %5144 = vmatprep.subr.bf16.mxu1 %v5143_v27  ;;  %2039 = vmatmul.mubr.f32.vlgmr.msra.gmra.mrb[8].mxu0 %v6731_v54  ;;  %v355_v54 = vld [vmem:[%s9223_s1 + $0xa20] sm:$0xff]  ;;  %v393_v27 = vld [vmem:[%s9223_s1 + $0xb50] sm:$0xff]  ;;  %v458_v6 = vld [vmem:[%s9223_s1 + $0xd58] sm:$0xff] }
  0xa5   :  { %5114 = vmatpush3.bf16.msra.mxu0 %v5113_v35  ;;  %2178 = vmatprep.mubr.f32.mxu0 %v1178_v46  ;;  %v5121_v61 = vpack.c.bf16 %v356_v33, %v355_v54  ;;  %v412_v35 = vld [vmem:[%s9223_s1 + $0xbe8] sm:$0xff]  ;;  %v382_v46 = vld [vmem:[%s9223_s1 + $0xaf8] sm:$0xff]  ;;  %v365_v54 = vld [vmem:[%s9223_s1 + $0xa70] sm:$0xff] }
  0xa6   :  { %2109 = vmatmul.mubr.f32.vlgmr.msra.gmra.mrb[8].mxu1 %v6740_v57  ;;  %5116 = vmatprep.subr.bf16.mxu0 %v5115_v52  ;;  %v388_v57 = vld [vmem:[%s9223_s1 + $0xb28] sm:$0xff]  ;;  %v5165_v52 = vpack.c.bf16 %v394_v29, %v393_v27  ;;  %v5167_v41 = vpack.c.bf16 %v412_v35, %v411_v42  ;;  %v366_v33 = vld [vmem:[%s9223_s1 + $0xa78] sm:$0xff]  ;;  %v437_v35 = vld [vmem:[%s9223_s1 + $0xcb0] sm:$0xff] }
  0xa7   :  { %5146 = vmatpush3.bf16.msra.mxu1 %v5145_v36  ;;  %2248 = vmatprep.mubr.f32.mxu1 %v1179_v49  ;;  %v5153_v62 = vpack.c.bf16 %v388_v57, %v387_v55  ;;  %v5133_v36 = vpack.c.bf16 %v362_v26, %v361_v25  ;;  %v5137_v49 = vpack.c.bf16 %v364_v39, %v363_v38  ;;  %v397_v55 = vld [vmem:[%s9223_s1 + $0xb70] sm:$0xff]  ;;  %v398_v57 = vld [vmem:[%s9223_s1 + $0xb78] sm:$0xff]  ;;  %v468_v25 = vld [vmem:[%s9223_s1 + $0xda8] sm:$0xff] }
  0xa8   :  { %5148 = vmatprep.subr.bf16.mxu1 %v5147_v40  ;;  %v395_v40 = vld [vmem:[%s9223_s1 + $0xb60] sm:$0xff]  ;;  %v513_v59 = vld [vmem:[%s9223_s1 + $0xf10] sm:$0xff] }
  0xa9   :  { %5118 = vmatpush3.bf16.msra.mxu0 %v5117_v50  ;;  %v21_v50 = vld [vmem:[%s9222_s0 + $0x30] sm:$0xff] }
  0xaa   :  { %5120 = vmatprep.subr.bf16.mxu0 %v5119_v53  ;;  %v5139_v53 = vpack.c.bf16 %v382_v46, %v381_v44  ;;  %v7145_v8 = vrot.slane %v21_v50, %v6029_v13  ;;  %v453_v44 = vld [vmem:[%s9223_s1 + $0xd30] sm:$0xff] }
  0xab   :  { %5150 = vmatpush3.bf16.msra.mxu1 %v5149_v51  ;;  %v5169_v51 = vpack.c.bf16 %v396_v43, %v395_v40  ;;  %v422_v43 = vld [vmem:[%s9223_s1 + $0xc38] sm:$0xff] }
  0xac   :  { %5152 = vmatprep.subr.bf16.mxu1 %v5151_v56  ;;  %v5171_v56 = vpack.c.bf16 %v414_v48, %v413_v47  ;;  %v454_v47 = vld [vmem:[%s9223_s1 + $0xd38] sm:$0xff]  ;;  %v439_v48 = vld [vmem:[%s9223_s1 + $0xcc0] sm:$0xff] }
  0xad   :  { %5122 = vmatpush3.bf16.msra.mxu0 %v5121_v61  ;;  %v1180_v61 = vcombine.high %v21_v50, %v21_v50  ;;  %v471_v50 = vld [vmem:[%s9223_s1 + $0xdc0] sm:$0xff] }
  0xae   :  { %5124 = vmatprep.subr.bf16.mxu0 %v5123_v63  ;;  %v5173_v63 = vpack.c.bf16 %v398_v57, %v397_v55  ;;  %v423_v55 = vld [vmem:[%s9223_s1 + $0xc40] sm:$0xff] }
  0xaf   :  { %5154 = vmatpush3.bf16.msra.mxu1 %v5153_v62  ;;  %v5141_v62 = vpack.c.bf16 %v366_v33, %v365_v54  ;;  %v5221_v54 = vpack.c.bf16 %v454_v47, %v453_v44  ;;  %v455_v57 = vld [vmem:[%s9223_s1 + $0xd40] sm:$0xff]  ;;  %v480_v44 = vld [vmem:[%s9223_s1 + $0xe08] sm:$0xff] }
  0xb0   :  { %5156 = vmatprep.subr.bf16.mxu1 %v5155_v3  ;;  %v447_v3 = vld [vmem:[%s9223_s1 + $0xd00] sm:$0xff] }
  0xb1   :  { %5126 = vmatpush3.bf16.msra.mxu0 %v5125_v9  ;;  %v465_v9 = vld [vmem:[%s9223_s1 + $0xd90] sm:$0xff]  ;;  %v5209_v14 = vpack.c.bf16 %v448_v5, %v447_v3  ;;  %v426_v3 = vld [vmem:[%s9223_s1 + $0xc58] sm:$0xff] }
  0xb2   :  { %5128 = vmatprep.subr.bf16.mxu0 %v5127_v10  ;;  %v7154_v10 = vrot.slane %v1180_v61, %v6029_v13  ;;  %v473_v61 = vld [vmem:[%s9223_s1 + $0xdd0] sm:$0xff] }
  0xb3   :  { %5158 = vmatpush3.bf16.msra.mxu1 %v5157_v11  ;;  %v466_v11 = vld [vmem:[%s9223_s1 + $0xd98] sm:$0xff] }
  0xb4   :  { %5160 = vmatprep.subr.bf16.mxu1 %v5159_v16  ;;  %v417_v16 = vld [vmem:[%s9223_s1 + $0xc10] sm:$0xff]  ;;  %v5211_v19 = vpack.c.bf16 %v466_v11, %v465_v9  ;;  %v1196_v26 = vcombine.high %v7154_v10, %v7154_v10  ;;  %v444_v9 = vld [vmem:[%s9223_s1 + $0xce8] sm:$0xff]  ;;  %v475_v11 = vld [vmem:[%s9223_s1 + $0xde0] sm:$0xff] }
  0xb5   :  { %5130 = vmatpush3.bf16.msra.mxu0 %v5129_v22  ;;  %v436_v22 = vld [vmem:[%s9223_s1 + $0xca8] sm:$0xff]  ;;  %v5181_v27 = vpack.c.bf16 %v418_v17, %v417_v16  ;;  %v5199_v16 = vpack.c.bf16 %v444_v9, %v443_v7  ;;  %v427_v17 = vld [vmem:[%s9223_s1 + $0xc60] sm:$0xff] }
  0xb6   :  { %5132 = vmatprep.subr.bf16.mxu0 %v5131_v24  ;;  %v467_v24 = vld [vmem:[%s9223_s1 + $0xda0] sm:$0xff]  ;;  %v5183_v29 = vpack.c.bf16 %v436_v22, %v435_v21  ;;  %v460_v21 = vld [vmem:[%s9223_s1 + $0xd68] sm:$0xff]  ;;  %v445_v22 = vld [vmem:[%s9223_s1 + $0xcf0] sm:$0xff] }
  0xb7   :  { %5162 = vmatpush3.bf16.msra.mxu1 %v5161_v23  ;;  %v1195_v23 = vcombine.high %v7145_v8, %v7145_v8  ;;  %v5215_v42 = vpack.c.bf16 %v468_v25, %v467_v24  ;;  %v477_v24 = vld [vmem:[%s9223_s1 + $0xdf0] sm:$0xff]  ;;  %v478_v25 = vld [vmem:[%s9223_s1 + $0xdf8] sm:$0xff]  ;;  %v484_v7 = vld [vmem:[%s9223_s1 + $0xe28] sm:$0xff] }
  0xb8   :  { %5164 = vmatprep.subr.bf16.mxu1 %v5163_v28  ;;  %v5213_v28 = vpack.c.bf16 %v450_v20, %v449_v18  ;;  %v428_v18 = vld [vmem:[%s9223_s1 + $0xc68] sm:$0xff]  ;;  %v515_v9 = vld [vmem:[%s9223_s1 + $0xf20] sm:$0xff] }
  0xb9   :  { %5134 = vmatpush3.bf16.msra.mxu0 %v5133_v36  ;;  %v438_v36 = vld [vmem:[%s9223_s1 + $0xcb8] sm:$0xff] }
  0xba   :  { %5136 = vmatprep.subr.bf16.mxu0 %v5135_v37  ;;  %v470_v37 = vld [vmem:[%s9223_s1 + $0xdb8] sm:$0xff]  ;;  %v5187_v40 = vpack.c.bf16 %v438_v36, %v437_v35  ;;  %v495_v35 = vld [vmem:[%s9223_s1 + $0xe80] sm:$0xff]  ;;  %v496_v36 = vld [vmem:[%s9223_s1 + $0xe88] sm:$0xff] }
  0xbb   :  { %5166 = vmatpush3.bf16.msra.mxu1 %v5165_v52  ;;  %v469_v52 = vld [vmem:[%s9223_s1 + $0xdb0] sm:$0xff] }
  0xbc   :  { %5168 = vmatprep.subr.bf16.mxu1 %v5167_v41  ;;  %v421_v41 = vld [vmem:[%s9223_s1 + $0xc30] sm:$0xff]  ;;  %v5219_v46 = vpack.c.bf16 %v470_v37, %v469_v52  ;;  %v527_v52 = vld [vmem:[%s9223_s1 + $0xf80] sm:$0xff]  ;;  %v528_v37 = vld [vmem:[%s9223_s1 + $0xf88] sm:$0xff] }
  0xbd   :  { %5138 = vmatpush3.bf16.msra.mxu0 %v5137_v49  ;;  %v440_v49 = vld [vmem:[%s9223_s1 + $0xcc8] sm:$0xff]  ;;  %v5271_v47 = vpack.c.bf16 %v528_v37, %v527_v52  ;;  %v505_v52 = vld [vmem:[%s9223_s1 + $0xed0] sm:$0xff]  ;;  %v506_v37 = vld [vmem:[%s9223_s1 + $0xed8] sm:$0xff] }
  0xbe   :  { %5140 = vmatprep.subr.bf16.mxu0 %v5139_v53  ;;  %v5189_v53 = vpack.c.bf16 %v422_v43, %v421_v41  ;;  %v5191_v33 = vpack.c.bf16 %v440_v49, %v439_v48  ;;  %v5239_v41 = vpack.c.bf16 %v496_v36, %v495_v35  ;;  %v479_v43 = vld [vmem:[%s9223_s1 + $0xe00] sm:$0xff]  ;;  %v512_v48 = vld [vmem:[%s9223_s1 + $0xf08] sm:$0xff]  ;;  %v497_v49 = vld [vmem:[%s9223_s1 + $0xe90] sm:$0xff] }
  0xbf   :  { %5170 = vmatpush3.bf16.msra.mxu1 %v5169_v51  ;;  %v472_v51 = vld [vmem:[%s9223_s1 + $0xdc8] sm:$0xff] }
  0xc0   :  { %5172 = vmatprep.subr.bf16.mxu1 %v5171_v56  ;;  %v424_v56 = vld [vmem:[%s9223_s1 + $0xc48] sm:$0xff]  ;;  %v5223_v45 = vpack.c.bf16 %v472_v51, %v471_v50  ;;  %v498_v50 = vld [vmem:[%s9223_s1 + $0xe98] sm:$0xff] }
  0xc1   :  { %5142 = vmatpush3.bf16.msra.mxu0 %v5141_v62  ;;  %v474_v62 = vld [vmem:[%s9223_s1 + $0xdd8] sm:$0xff]  ;;  %v520_v36 = vld [vmem:[%s9223_s1 + $0xf48] sm:$0xff] }
  0xc2   :  { %5176 = vmatprep.subr.bf16.mxu0 %v5175_v0  ;;  %v5225_v0 = vpack.c.bf16 %v456_v58, %v455_v57  ;;  %v5227_v5 = vpack.c.bf16 %v474_v62, %v473_v61  ;;  %v5243_v57 = vpack.c.bf16 %v498_v50, %v497_v49  ;;  %v482_v58 = vld [vmem:[%s9223_s1 + $0xe18] sm:$0xff]  ;;  %v499_v62 = vld [vmem:[%s9223_s1 + $0xea0] sm:$0xff] }
  0xc3   :  { %5174 = vmatpush3.bf16.msra.mxu1 %v5173_v63  ;;  %v5193_v63 = vpack.c.bf16 %v424_v56, %v423_v55  ;;  %v5241_v55 = vpack.c.bf16 %v480_v44, %v479_v43  ;;  %v514_v61 = vld [vmem:[%s9223_s1 + $0xf18] sm:$0xff]  ;;  %v5259_v43 = vpack.c.bf16 %v506_v37, %v505_v52  ;;  %v489_v44 = vld [vmem:[%s9223_s1 + $0xe50] sm:$0xff]  ;;  %v507_v50 = vld [vmem:[%s9223_s1 + $0xee0] sm:$0xff] }
  0xc4   :  { %5208 = vmatprep.subr.bf16.mxu1 %v5207_v4  ;;  %2179 = vmatmul.mubr.f32.vlgmr.msra.gmra.mrb[10].mxu0 %v6938_v31  ;;  %v419_v31 = vld [vmem:[%s9223_s1 + $0xc20] sm:$0xff]  ;;  %v457_v4 = vld [vmem:[%s9223_s1 + $0xd50] sm:$0xff]  ;;  %v522_v49 = vld [vmem:[%s9223_s1 + $0xf58] sm:$0xff] }
  0xc5   :  { %5178 = vmatpush3.bf16.msra.mxu0 %v5177_v12  ;;  %2318 = vmatprep.mubr.f32.mxu0 %v1195_v23  ;;  %v5185_v38 = vpack.c.bf16 %v420_v30, %v419_v31  ;;  %v476_v12 = vld [vmem:[%s9223_s1 + $0xde8] sm:$0xff]  ;;  %v446_v23 = vld [vmem:[%s9223_s1 + $0xcf8] sm:$0xff]  ;;  %v429_v31 = vld [vmem:[%s9223_s1 + $0xc70] sm:$0xff] }
  0xc6   :  { %2249 = vmatmul.mubr.f32.vlgmr.msra.gmra.mrb[10].mxu1 %v6947_v34  ;;  %5180 = vmatprep.subr.bf16.mxu0 %v5179_v15  ;;  %v452_v34 = vld [vmem:[%s9223_s1 + $0xd28] sm:$0xff]  ;;  %v5229_v15 = vpack.c.bf16 %v458_v6, %v457_v4  ;;  %v5231_v20 = vpack.c.bf16 %v476_v12, %v475_v11  ;;  %v430_v30 = vld [vmem:[%s9223_s1 + $0xc78] sm:$0xff]  ;;  %v501_v12 = vld [vmem:[%s9223_s1 + $0xeb0] sm:$0xff] }
  0xc7   :  { %5210 = vmatpush3.bf16.msra.mxu1 %v5209_v14  ;;  %2388 = vmatprep.mubr.f32.mxu1 %v1196_v26  ;;  %v5217_v39 = vpack.c.bf16 %v452_v34, %v451_v32  ;;  %v5197_v14 = vpack.c.bf16 %v426_v3, %v425_v2  ;;  %v5201_v26 = vpack.c.bf16 %v428_v18, %v427_v17  ;;  %v461_v32 = vld [vmem:[%s9223_s1 + $0xd70] sm:$0xff]  ;;  %v462_v34 = vld [vmem:[%s9223_s1 + $0xd78] sm:$0xff]  ;;  %v532_v2 = vld [vmem:[%s9223_s1 + $0xfa8] sm:$0xff] }
  0xc8   :  { %5212 = vmatprep.subr.bf16.mxu1 %v5211_v19  ;;  %v459_v19 = vld [vmem:[%s9223_s1 + $0xd60] sm:$0xff]  ;;  %v593_v37 = vld [vmem:[%s9223_s1 + $0x1190] sm:$0xff] }
  0xc9   :  { %5182 = vmatpush3.bf16.msra.mxu0 %v5181_v27  ;;  %v22_v27 = vld [vmem:[%s9222_s0 + $0x38] sm:$0xff] }
  0xca   :  { %5184 = vmatprep.subr.bf16.mxu0 %v5183_v29  ;;  %v5203_v29 = vpack.c.bf16 %v446_v23, %v445_v22  ;;  %v7352_v51 = vrot.slane %v22_v27, %v6029_v13  ;;  %v517_v22 = vld [vmem:[%s9223_s1 + $0xf30] sm:$0xff] }
  0xcb   :  { %5214 = vmatpush3.bf16.msra.mxu1 %v5213_v28  ;;  %v5233_v28 = vpack.c.bf16 %v460_v21, %v459_v19  ;;  %v486_v21 = vld [vmem:[%s9223_s1 + $0xe38] sm:$0xff] }
  0xcc   :  { %5216 = vmatprep.subr.bf16.mxu1 %v5215_v42  ;;  %v5235_v42 = vpack.c.bf16 %v478_v25, %v477_v24  ;;  %v518_v24 = vld [vmem:[%s9223_s1 + $0xf38] sm:$0xff]  ;;  %v503_v25 = vld [vmem:[%s9223_s1 + $0xec0] sm:$0xff] }
  0xcd   :  { %5186 = vmatpush3.bf16.msra.mxu0 %v5185_v38  ;;  %v1197_v38 = vcombine.high %v22_v27, %v22_v27  ;;  %v535_v27 = vld [vmem:[%s9223_s1 + $0xfc0] sm:$0xff] }
  0xce   :  { %5188 = vmatprep.subr.bf16.mxu0 %v5187_v40  ;;  %v5237_v40 = vpack.c.bf16 %v462_v34, %v461_v32  ;;  %v487_v32 = vld [vmem:[%s9223_s1 + $0xe40] sm:$0xff] }
  0xcf   :  { %5218 = vmatpush3.bf16.msra.mxu1 %v5217_v39  ;;  %v5205_v39 = vpack.c.bf16 %v430_v30, %v429_v31  ;;  %v5285_v31 = vpack.c.bf16 %v518_v24, %v517_v22  ;;  %v519_v34 = vld [vmem:[%s9223_s1 + $0xf40] sm:$0xff]  ;;  %v560_v22 = vld [vmem:[%s9223_s1 + $0x1088] sm:$0xff] }
  0xd0   :  { %5220 = vmatprep.subr.bf16.mxu1 %v5219_v46  ;;  %v511_v46 = vld [vmem:[%s9223_s1 + $0xf00] sm:$0xff]  ;;  %v592_v24 = vld [vmem:[%s9223_s1 + $0x1188] sm:$0xff] }
  0xd1   :  { %5190 = vmatpush3.bf16.msra.mxu0 %v5189_v53  ;;  %v529_v53 = vld [vmem:[%s9223_s1 + $0xf90] sm:$0xff]  ;;  %v5273_v56 = vpack.c.bf16 %v512_v48, %v511_v46  ;;  %v490_v46 = vld [vmem:[%s9223_s1 + $0xe58] sm:$0xff] }
  0xd2   :  { %5192 = vmatprep.subr.bf16.mxu0 %v5191_v33  ;;  %v7361_v33 = vrot.slane %v1197_v38, %v6029_v13  ;;  %v537_v38 = vld [vmem:[%s9223_s1 + $0xfd0] sm:$0xff] }
  0xd3   :  { %5222 = vmatpush3.bf16.msra.mxu1 %v5221_v54  ;;  %v530_v54 = vld [vmem:[%s9223_s1 + $0xf98] sm:$0xff] }
  0xd4   :  { %5224 = vmatprep.subr.bf16.mxu1 %v5223_v45  ;;  %v481_v45 = vld [vmem:[%s9223_s1 + $0xe10] sm:$0xff]  ;;  %v5275_v60 = vpack.c.bf16 %v530_v54, %v529_v53  ;;  %v1213_v3 = vcombine.high %v7361_v33, %v7361_v33  ;;  %v508_v53 = vld [vmem:[%s9223_s1 + $0xee8] sm:$0xff]  ;;  %v539_v54 = vld [vmem:[%s9223_s1 + $0xfe0] sm:$0xff] }
  0xd5   :  { %5194 = vmatpush3.bf16.msra.mxu0 %v5193_v63  ;;  %v500_v63 = vld [vmem:[%s9223_s1 + $0xea8] sm:$0xff]  ;;  %v5245_v4 = vpack.c.bf16 %v482_v58, %v481_v45  ;;  %v5263_v45 = vpack.c.bf16 %v508_v53, %v507_v50  ;;  %v491_v58 = vld [vmem:[%s9223_s1 + $0xe60] sm:$0xff] }
  0xd6   :  { %5196 = vmatprep.subr.bf16.mxu0 %v5195_v1  ;;  %v531_v1 = vld [vmem:[%s9223_s1 + $0xfa0] sm:$0xff]  ;;  %v5247_v6 = vpack.c.bf16 %v500_v63, %v499_v62  ;;  %v524_v63 = vld [vmem:[%s9223_s1 + $0xf68] sm:$0xff] }
  0xd7   :  { %5226 = vmatpush3.bf16.msra.mxu1 %v5225_v0  ;;  %v1212_v0 = vcombine.high %v7352_v51, %v7352_v51  ;;  %v5279_v11 = vpack.c.bf16 %v532_v2, %v531_v1  ;;  %v510_v1 = vld [vmem:[%s9223_s1 + $0xef8] sm:$0xff]  ;;  %v3670_v2 = vld [vmem:[%s9224_s2] ss:$0 sm:$0xff]  ;;  %v564_v53 = vld [vmem:[%s9223_s1 + $0x10a8] sm:$0xff] }
  0xd8   :  { %5228 = vmatprep.subr.bf16.mxu1 %v5227_v5  ;;  %v5277_v5 = vpack.c.bf16 %v514_v61, %v513_v59  ;;  %v492_v59 = vld [vmem:[%s9223_s1 + $0xe68] sm:$0xff]  ;;  %v563_v50 = vld [vmem:[%s9223_s1 + $0x10a0] sm:$0xff] }
  0xd9   :  { %5198 = vmatpush3.bf16.msra.mxu0 %v5197_v14  ;;  %v502_v14 = vld [vmem:[%s9223_s1 + $0xeb8] sm:$0xff] }
  0xda   :  { %5200 = vmatprep.subr.bf16.mxu0 %v5199_v16  ;;  %v534_v16 = vld [vmem:[%s9223_s1 + $0xfb8] sm:$0xff]  ;;  %v5251_v19 = vpack.c.bf16 %v502_v14, %v501_v12 }
  0xdb   :  { %5230 = vmatpush3.bf16.msra.mxu1 %v5229_v15  ;;  %v533_v15 = vld [vmem:[%s9223_s1 + $0xfb0] sm:$0xff] }
  0xdc   :  { %5232 = vmatprep.subr.bf16.mxu1 %v5231_v20  ;;  %v485_v20 = vld [vmem:[%s9223_s1 + $0xe30] sm:$0xff]  ;;  %v5283_v23 = vpack.c.bf16 %v534_v16, %v533_v15  ;;  %v494_v16 = vld [vmem:[%s9223_s1 + $0xe78] sm:$0xff] }
  0xdd   :  { %5202 = vmatpush3.bf16.msra.mxu0 %v5201_v26  ;;  %v504_v26 = vld [vmem:[%s9223_s1 + $0xec8] sm:$0xff]  ;;  %v493_v15 = vld [vmem:[%s9223_s1 + $0xe70] sm:$0xff] }
  0xde   :  { %5204 = vmatprep.subr.bf16.mxu0 %v5203_v29  ;;  %v5253_v29 = vpack.c.bf16 %v486_v21, %v485_v20  ;;  %v5255_v30 = vpack.c.bf16 %v504_v26, %v503_v25  ;;  %v526_v20 = vld [vmem:[%s9223_s1 + $0xf78] sm:$0xff]  ;;  %v559_v21 = vld [vmem:[%s9223_s1 + $0x1080] sm:$0xff] }
  0xdf   :  { %5234 = vmatpush3.bf16.msra.mxu1 %v5233_v28  ;;  %v536_v28 = vld [vmem:[%s9223_s1 + $0xfc8] sm:$0xff] }
  0xe0   :  { %5236 = vmatprep.subr.bf16.mxu1 %v5235_v42  ;;  %v488_v42 = vld [vmem:[%s9223_s1 + $0xe48] sm:$0xff]  ;;  %v5287_v35 = vpack.c.bf16 %v536_v28, %v535_v27  ;;  %v5269_v27 = vpack.c.bf16 %v494_v16, %v493_v15 }
  0xe1   :  { %5206 = vmatpush3.bf16.msra.mxu0 %v5205_v39  ;;  %v538_v39 = vld [vmem:[%s9223_s1 + $0xfd8] sm:$0xff]  ;;  %v600_v15 = vld [vmem:[%s9223_s1 + $0x11c8] sm:$0xff] }
  0xe2   :  { %5240 = vmatprep.subr.bf16.mxu0 %v5239_v41  ;;  %v5289_v41 = vpack.c.bf16 %v520_v36, %v519_v34  ;;  %v5291_v48 = vpack.c.bf16 %v538_v39, %v537_v38  ;;  %v576_v34 = vld [vmem:[%s9223_s1 + $0x1108] sm:$0xff]  ;;  %v562_v36 = vld [vmem:[%s9223_s1 + $0x1098] sm:$0xff] }
  0xe3   :  { %5238 = vmatpush3.bf16.msra.mxu1 %v5237_v40  ;;  %v5257_v40 = vpack.c.bf16 %v488_v42, %v487_v32  ;;  %v575_v32 = vld [vmem:[%s9223_s1 + $0x1100] sm:$0xff]  ;;  %v594_v38 = vld [vmem:[%s9223_s1 + $0x1198] sm:$0xff] }
  0xe4   :  { %5272 = vmatprep.subr.bf16.mxu1 %v5271_v47  ;;  %2319 = vmatmul.mubr.f32.vlgmr.msra.gmra.mrb[12].mxu0 %v7145_v8  ;;  %v483_v8 = vld [vmem:[%s9223_s1 + $0xe20] sm:$0xff]  ;;  %v521_v47 = vld [vmem:[%s9223_s1 + $0xf50] sm:$0xff] }
  0xe5   :  { %5242 = vmatpush3.bf16.msra.mxu0 %v5241_v55  ;;  %2458 = vmatprep.mubr.f32.mxu0 %v1212_v0  ;;  %v5249_v17 = vpack.c.bf16 %v484_v7, %v483_v8  ;;  %v540_v55 = vld [vmem:[%s9223_s1 + $0xfe8] sm:$0xff]  ;;  %v509_v0 = vld [vmem:[%s9223_s1 + $0xef0] sm:$0xff] }
  0xe6   :  { %2389 = vmatmul.mubr.f32.vlgmr.msra.gmra.mrb[12].mxu1 %v7154_v10  ;;  %5244 = vmatprep.subr.bf16.mxu0 %v5243_v57  ;;  %v516_v10 = vld [vmem:[%s9223_s1 + $0xf28] sm:$0xff]  ;;  %v5293_v57 = vpack.c.bf16 %v522_v49, %v521_v47  ;;  %v5295_v62 = vpack.c.bf16 %v540_v55, %v539_v54  ;;  %v5267_v14 = vpack.c.bf16 %v510_v1, %v509_v0  ;;  %v577_v47 = vld [vmem:[%s9223_s1 + $0x1110] sm:$0xff]  ;;  %v578_v49 = vld [vmem:[%s9223_s1 + $0x1118] sm:$0xff] }
  0xe7   :  { %5274 = vmatpush3.bf16.msra.mxu1 %v5273_v56  ;;  %2528 = vmatprep.mubr.f32.mxu1 %v1213_v3  ;;  %v5281_v18 = vpack.c.bf16 %v516_v10, %v515_v9  ;;  %v5261_v56 = vpack.c.bf16 %v490_v46, %v489_v44  ;;  %v5265_v9 = vpack.c.bf16 %v492_v59, %v491_v58  ;;  %v545_v44 = vld [vmem:[%s9223_s1 + $0x1010] sm:$0xff]  ;;  %v546_v46 = vld [vmem:[%s9223_s1 + $0x1018] sm:$0xff]  ;;  %v595_v55 = vld [vmem:[%s9223_s1 + $0x11a0] sm:$0xff] }
  0xe8   :  { %5276 = vmatprep.subr.bf16.mxu1 %v5275_v60  ;;  %v523_v60 = vld [vmem:[%s9223_s1 + $0xf60] sm:$0xff]  ;;  %v5341_v58 = vpack.c.bf16 %v578_v49, %v577_v47  ;;  %v5311_v59 = vpack.c.bf16 %v564_v53, %v563_v50  ;;  %v566_v0 = vld [vmem:[%s9223_s1 + $0x10b8] sm:$0xff]  ;;  %v597_v1 = vld [vmem:[%s9223_s1 + $0x11b0] sm:$0xff] }
  0xe9   :  { %5246 = vmatpush3.bf16.msra.mxu0 %v5245_v4  ;;  %v5297_v12 = vpack.c.bf16 %v524_v63, %v523_v60  ;;  %v548_v60 = vld [vmem:[%s9223_s1 + $0x1028] sm:$0xff]  ;;  %v565_v63 = vld [vmem:[%s9223_s1 + $0x10b0] sm:$0xff] }
  0xea   :  { %5248 = vmatprep.subr.bf16.mxu0 %v5247_v6  ;;  %v542_v6 = vld [vmem:[%s9223_s1 + $0xff8] sm:$0xff] }
  0xeb   :  { %5278 = vmatpush3.bf16.msra.mxu1 %v5277_v5  ;;  %v541_v5 = vld [vmem:[%s9223_s1 + $0xff0] sm:$0xff] }
  0xec   :  { %5280 = vmatprep.subr.bf16.mxu1 %v5279_v11  ;;  %v23_v11 = vld [vmem:[%s9222_s0 + $0x40] sm:$0xff] }
  0xed   :  { %5250 = vmatpush3.bf16.msra.mxu0 %v5249_v17  ;;  %v525_v17 = vld [vmem:[%s9223_s1 + $0xf70] sm:$0xff]  ;;  %v1214_v25 = vcombine.high %v23_v11, %v23_v11  ;;  %v7564_v52 = vrot.slane %v23_v11, %v6029_v13  ;;  %v582_v11 = vld [vmem:[%s9223_s1 + $0x1138] sm:$0xff] }
  0xee   :  { %5252 = vmatprep.subr.bf16.mxu0 %v5251_v19  ;;  %v5299_v19 = vpack.c.bf16 %v542_v6, %v541_v5  ;;  %v5301_v28 = vpack.c.bf16 %v526_v20, %v525_v17  ;;  %v5315_v5 = vpack.c.bf16 %v566_v0, %v565_v63  ;;  %v549_v6 = vld [vmem:[%s9223_s1 + $0x1030] sm:$0xff]  ;;  %v552_v20 = vld [vmem:[%s9223_s1 + $0x1048] sm:$0xff] }
  0xef   :  { %5282 = vmatpush3.bf16.msra.mxu1 %v5281_v18  ;;  %v7573_v39 = vrot.slane %v1214_v25, %v6029_v13  ;;  %v1229_v54 = vcombine.high %v7564_v52, %v7564_v52  ;;  %v570_v25 = vld [vmem:[%s9223_s1 + $0x10d8] sm:$0xff] }
  0xf0   :  { %5284 = vmatprep.subr.bf16.mxu1 %v5283_v23  ;;  %v591_v23 = vld [vmem:[%s9223_s1 + $0x1180] sm:$0xff] }
  0xf1   :  { %5254 = vmatpush3.bf16.msra.mxu0 %v5253_v29  ;;  %v5303_v29 = vpack.c.bf16 %v560_v22, %v559_v21  ;;  %v5335_v42 = vpack.c.bf16 %v592_v24, %v591_v23  ;;  %v583_v21 = vld [vmem:[%s9223_s1 + $0x1140] sm:$0xff]  ;;  %v584_v23 = vld [vmem:[%s9223_s1 + $0x1148] sm:$0xff]  ;;  %v569_v24 = vld [vmem:[%s9223_s1 + $0x10d0] sm:$0xff] }
  0xf2   :  { %5256 = vmatprep.subr.bf16.mxu0 %v5255_v30  ;;  %v544_v30 = vld [vmem:[%s9223_s1 + $0x1008] sm:$0xff] }
  0xf3   :  { %5286 = vmatpush3.bf16.msra.mxu1 %v5285_v31  ;;  %v543_v31 = vld [vmem:[%s9223_s1 + $0x1000] sm:$0xff] }
  0xf4   :  { %5288 = vmatprep.subr.bf16.mxu1 %v5287_v35  ;;  %v561_v35 = vld [vmem:[%s9223_s1 + $0x1090] sm:$0xff] }
  0xf5   :  { %5258 = vmatpush3.bf16.msra.mxu0 %v5257_v40  ;;  %v5305_v40 = vpack.c.bf16 %v544_v30, %v543_v31 }
  0xf6   :  { %5260 = vmatprep.subr.bf16.mxu0 %v5259_v43  ;;  %v5307_v43 = vpack.c.bf16 %v562_v36, %v561_v35 }
  0xf7   :  { %5290 = vmatpush3.bf16.msra.mxu1 %v5289_v41  ;;  %v3703_v61 = vpop.f32.mrb[0].mxu0  ;;  %v5337_v41 = vpack.c.bf16 %v576_v34, %v575_v32 }
  0xf8   :  { %5292 = vmatprep.subr.bf16.mxu1 %v5291_v48  ;;  %v3704_v3 = vpop.f32.mrb[1].mxu0  ;;  %v5339_v48 = vpack.c.bf16 %v594_v38, %v593_v37 }
  0xf9   :  { %v3738_v4 = vpop.f32.mrb[0].mxu1  ;;  %v3705_v8 = vadd.f32 %v3704_v3, %v3703_v61  ;;  %5262 = vmatpush3.bf16.msra.mxu0 %v5261_v56  ;;  %v596_v56 = vld [vmem:[%s9223_s1 + $0x11a8] sm:$0xff]  ;;  %v579_v61 = vld [vmem:[%s9223_s1 + $0x1120] sm:$0xff] }
  0xfa   :  { %v3739_v7 = vpop.f32.mrb[1].mxu1  ;;  %5264 = vmatprep.subr.bf16.mxu0 %v5263_v45  ;;  %v5309_v45 = vpack.c.bf16 %v546_v46, %v545_v44 }
  0xfb   :  { %v3740_v10 = vadd.f32 %v3739_v7, %v3738_v4  ;;  %5294 = vmatpush3.bf16.msra.mxu1 %v5293_v57  ;;  %v1481_v18 = vadd.f32 %v3705_v8, %v3670_v2  ;;  %v1230_v57 = vcombine.high %v7573_v39, %v7573_v39  ;;  %v598_v2 = vld [vmem:[%s9223_s1 + $0x11b8] sm:$0xff]  ;;  %v581_v7 = vld [vmem:[%s9223_s1 + $0x1130] sm:$0xff] }
  0xfc   :  { %5296 = vmatprep.subr.bf16.mxu1 %v5295_v62  ;;  %v5343_v62 = vpack.c.bf16 %v596_v56, %v595_v55  ;;  %v550_v8 = vld [vmem:[%s9223_s1 + $0x1038] sm:$0xff]  ;;  %v5349_v17 = vpack.c.bf16 %v582_v11, %v581_v7 }
  0xfd   :  { %v7543_v26 = vadd.f32 %v3740_v10, %v1481_v18  ;;  %5266 = vmatpush3.bf16.msra.mxu0 %v5265_v9  ;;  %v5347_v9 = vpack.c.bf16 %v598_v2, %v597_v1  ;;  %v567_v10 = vld [vmem:[%s9223_s1 + $0x10c0] sm:$0xff]  ;;  %v5317_v16 = vpack.c.bf16 %v550_v8, %v549_v6 }
  0xfe   :  { %5268 = vmatprep.subr.bf16.mxu0 %v5267_v14  ;;  %v599_v14 = vld [vmem:[%s9223_s1 + $0x11c0] sm:$0xff] }
  0xff   :  { %5298 = vmatpush3.bf16.msra.mxu1 %v5297_v12  ;;  %v568_v12 = vld [vmem:[%s9223_s1 + $0x10c8] sm:$0xff]  ;;  %v5351_v22 = vpack.c.bf16 %v600_v15, %v599_v14 }
 0x100   :  { %5300 = vmatprep.subr.bf16.mxu1 %v5299_v19  ;;  %v5319_v18 = vpack.c.bf16 %v568_v12, %v567_v10  ;;  %v551_v19 = vld [vmem:[%s9223_s1 + $0x1040] sm:$0xff] }
 0x101   :  { %5270 = vmatpush3.bf16.msra.mxu0 %v5269_v27  ;;  %v601_v27 = vld [vmem:[%s9223_s1 + $0x11d0] sm:$0xff] }
 0x102   :  { %5304 = vmatprep.subr.bf16.mxu0 %v5303_v29 }
 0x103   :  { %5302 = vmatpush3.bf16.msra.mxu1 %v5301_v28  ;;  %v602_v28 = vld [vmem:[%s9223_s1 + $0x11d8] sm:$0xff] }
 0x104   :  { %5336 = vmatprep.subr.bf16.mxu1 %v5335_v42  ;;  %2459 = vmatmul.mubr.f32.vlgmr.msra.gmra.mrb[14].mxu0 %v7352_v51  ;;  %v547_v51 = vld [vmem:[%s9223_s1 + $0x1020] sm:$0xff] }
 0x105   :  { %5306 = vmatpush3.bf16.msra.mxu0 %v5305_v40  ;;  %2598 = vmatprep.mubr.f32.mxu0 %v1229_v54  ;;  %v5313_v3 = vpack.c.bf16 %v548_v60, %v547_v51 }
 0x106   :  { %2529 = vmatmul.mubr.f32.vlgmr.msra.gmra.mrb[14].mxu1 %v7361_v33  ;;  %5308 = vmatprep.subr.bf16.mxu0 %v5307_v43  ;;  %v580_v33 = vld [vmem:[%s9223_s1 + $0x1128] sm:$0xff] }
 0x107   :  { %5338 = vmatpush3.bf16.msra.mxu1 %v5337_v41  ;;  %2668 = vmatprep.mubr.f32.mxu1 %v1230_v57  ;;  %v5345_v4 = vpack.c.bf16 %v580_v33, %v579_v61 }
 0x108   :  { %5340 = vmatprep.subr.bf16.mxu1 %v5339_v48 }
 0x109   :  { %5310 = vmatpush3.bf16.msra.mxu0 %v5309_v45 }
 0x10a   :  { %5312 = vmatprep.subr.bf16.mxu0 %v5311_v59 }
 0x10b   :  { %5342 = vmatpush3.bf16.msra.mxu1 %v5341_v58 }
 0x10c   :  { %5344 = vmatprep.subr.bf16.mxu1 %v5343_v62 }
 0x10d   :  { %5314 = vmatpush3.bf16.msra.mxu0 %v5313_v3 }
 0x10e   :  { %5316 = vmatprep.subr.bf16.mxu0 %v5315_v5 }
 0x10f   :  { %5346 = vmatpush3.bf16.msra.mxu1 %v5345_v4 }
 0x110   :  { %5348 = vmatprep.subr.bf16.mxu1 %v5347_v9 }
 0x111   :  { %8 = vsyncpa [#allocation3], 0  ;;  %5318 = vmatpush3.bf16.msra.mxu0 %v5317_v16  ;;  %v5321_v29 = vpack.c.bf16 %v552_v20, %v551_v19  ;;  %v5353_v31 = vpack.c.bf16 %v584_v23, %v583_v21  ;;  %v5323_v30 = vpack.c.bf16 %v570_v25, %v569_v24  ;;  %v553_v32 = vld [vmem:[%s9223_s1 + $0x1050] sm:$0xff]  ;;  %v554_v42 = vld [vmem:[%s9223_s1 + $0x1058] sm:$0xff]  ;;  %v5355_v35 = vpack.c.bf16 %v602_v28, %v601_v27 }
 0x112   :  { %5320 = vmatprep.subr.bf16.mxu0 %v5319_v18  ;;  %v585_v34 = vld [vmem:[%s9223_s1 + $0x1150] sm:$0xff]  ;;  %v586_v36 = vld [vmem:[%s9223_s1 + $0x1158] sm:$0xff]  ;;  %v571_v37 = vld [vmem:[%s9223_s1 + $0x10e0] sm:$0xff]  ;;  %v5325_v43 = vpack.c.bf16 %v554_v42, %v553_v32  ;;  %vm3654_vm0 = vcmask 74752  }
 0x113   :  { %5350 = vmatpush3.bf16.msra.mxu1 %v5349_v17  ;;  %v572_v38 = vld [vmem:[%s9223_s1 + $0x10e8] sm:$0xff]  ;;  %v603_v40 = vld [vmem:[%s9223_s1 + $0x11e0] sm:$0xff]  ;;  %v5357_v44 = vpack.c.bf16 %v586_v36, %v585_v34  ;;  %v573_v55 = vld [vmem:[%s9223_s1 + $0x10f0] sm:$0xff] }
 0x114   :  { %5352 = vmatprep.subr.bf16.mxu1 %v5351_v22  ;;  %v604_v41 = vld [vmem:[%s9223_s1 + $0x11e8] sm:$0xff]  ;;  %v5327_v46 = vpack.c.bf16 %v572_v38, %v571_v37  ;;  %v555_v47 = vld [vmem:[%s9223_s1 + $0x1060] sm:$0xff]  ;;  %v574_v56 = vld [vmem:[%s9223_s1 + $0x10f8] sm:$0xff] }
 0x115   :  { %5322 = vmatpush3.bf16.msra.mxu0 %v5321_v29  ;;  %v556_v48 = vld [vmem:[%s9223_s1 + $0x1068] sm:$0xff]  ;;  %v587_v49 = vld [vmem:[%s9223_s1 + $0x1160] sm:$0xff]  ;;  %v5359_v53 = vpack.c.bf16 %v604_v41, %v603_v40  ;;  %v605_v58 = vld [vmem:[%s9223_s1 + $0x11f0] sm:$0xff]  ;;  %v5331_v0 = vpack.c.bf16 %v574_v56, %v573_v55 }
 0x116   :  { %5324 = vmatprep.subr.bf16.mxu0 %v5323_v30  ;;  %v588_v54 = vld [vmem:[%s9223_s1 + $0x1168] sm:$0xff]  ;;  %v606_v59 = vld [vmem:[%s9223_s1 + $0x11f8] sm:$0xff]  ;;  %v5329_v61 = vpack.c.bf16 %v556_v48, %v555_v47  ;;  %v557_v1 = vld [vmem:[%s9223_s1 + $0x1070] sm:$0xff] }
 0x117   :  { %5354 = vmatpush3.bf16.msra.mxu1 %v5353_v31  ;;  %v3773_v50 = vpop.f32.mrb[2].mxu0  ;;  %v24_v62 = vld [vmem:[%s9222_s0 + $0x48] sm:$0xff]  ;;  %v5361_v63 = vpack.c.bf16 %v588_v54, %v587_v49  ;;  %v558_v2 = vld [vmem:[%s9223_s1 + $0x1078] sm:$0xff]  ;;  %v589_v3 = vld [vmem:[%s9223_s1 + $0x1170] sm:$0xff]  ;;  %v5363_v5 = vpack.c.bf16 %v606_v59, %v605_v58 }
 0x118   :  { %5356 = vmatprep.subr.bf16.mxu1 %v5355_v35  ;;  %v3774_v57 = vpop.f32.mrb[3].mxu0  ;;  %v590_v6 = vld [vmem:[%s9223_s1 + $0x1178] sm:$0xff]  ;;  %v623_v8 = vld [vmem:[%s9223_s1 + $0x1280] sm:$0xff]  ;;  %v624_v7 = vld [vmem:[%s9223_s1 + $0x1288] sm:$0xff]  ;;  %v1231_v11 = vcombine.high %v24_v62, %v24_v62  ;;  %v5333_v12 = vpack.c.bf16 %v558_v2, %v557_v1  ;;  %v7774_v23 = vrot.slane %v24_v62, %v6029_v13 }
 0x119   :  { %v3808_v45 = vpop.f32.mrb[2].mxu1  ;;  %v3775_v51 = vadd.f32 %v3774_v57, %v3773_v50  ;;  %5326 = vmatpush3.bf16.msra.mxu0 %v5325_v43  ;;  %v655_v9 = vld [vmem:[%s9223_s1 + $0x1380] sm:$0xff]  ;;  %v5365_v14 = vpack.c.bf16 %v590_v6, %v589_v3  ;;  %v5367_v15 = vpack.c.bf16 %v624_v7, %v623_v8  ;;  %v608_v17 = vld [vmem:[%s9223_s1 + $0x1208] sm:$0xff]  ;;  %v625_v21 = vld [vmem:[%s9223_s1 + $0x1290] sm:$0xff] }
 0x11a   :  { %v3809_v60 = vpop.f32.mrb[3].mxu1  ;;  %5328 = vmatprep.subr.bf16.mxu0 %v5327_v46  ;;  %v607_v16 = vld [vmem:[%s9223_s1 + $0x1200] sm:$0xff]  ;;  %v640_v20 = vld [vmem:[%s9223_s1 + $0x1308] sm:$0xff]  ;;  %v626_v22 = vld [vmem:[%s9223_s1 + $0x1298] sm:$0xff]  ;;  %v7783_v27 = vrot.slane %v1231_v11, %v6029_v13  ;;  %v1246_v38 = vcombine.high %v7774_v23, %v7774_v23 }
 0x11b   :  { %v3810_v33 = vadd.f32 %v3809_v60, %v3808_v45  ;;  %5358 = vmatpush3.bf16.msra.mxu1 %v5357_v44  ;;  %v1621_v4 = vadd.f32 %v3775_v51, %v7543_v26  ;;  %v656_v26 = vld [vmem:[%s9223_s1 + $0x1388] sm:$0xff]  ;;  %v639_v18 = vld [vmem:[%s9223_s1 + $0x1300] sm:$0xff]  ;;  %v657_v24 = vld [vmem:[%s9223_s1 + $0x1390] sm:$0xff]  ;;  %v5369_v28 = vpack.c.bf16 %v608_v17, %v607_v16  ;;  %v5371_v31 = vpack.c.bf16 %v626_v22, %v625_v21 }
 0x11c   :  { %5360 = vmatprep.subr.bf16.mxu1 %v5359_v53  ;;  %v5399_v19 = vpack.c.bf16 %v656_v26, %v655_v9  ;;  %v658_v25 = vld [vmem:[%s9223_s1 + $0x1398] sm:$0xff]  ;;  %v5401_v29 = vpack.c.bf16 %v640_v20, %v639_v18  ;;  %v609_v30 = vld [vmem:[%s9223_s1 + $0x1210] sm:$0xff]  ;;  %v627_v36 = vld [vmem:[%s9223_s1 + $0x12a0] sm:$0xff]  ;;  %v1247_v43 = vcombine.high %v7783_v27, %v7783_v27 }
 0x11d   :  { %v7753_v10 = vadd.f32 %v3810_v33, %v1621_v4  ;;  %5330 = vmatpush3.bf16.msra.mxu0 %v5329_v61  ;;  %v610_v32 = vld [vmem:[%s9223_s1 + $0x1218] sm:$0xff]  ;;  %v641_v42 = vld [vmem:[%s9223_s1 + $0x1310] sm:$0xff]  ;;  %v5403_v34 = vpack.c.bf16 %v658_v25, %v657_v24  ;;  %v628_v37 = vld [vmem:[%s9223_s1 + $0x12a8] sm:$0xff] }
 0x11e   :  { %5332 = vmatprep.subr.bf16.mxu0 %v5331_v0  ;;  %v642_v35 = vld [vmem:[%s9223_s1 + $0x1318] sm:$0xff]  ;;  %v659_v40 = vld [vmem:[%s9223_s1 + $0x13a0] sm:$0xff]  ;;  %v660_v41 = vld [vmem:[%s9223_s1 + $0x13a8] sm:$0xff]  ;;  %v5373_v44 = vpack.c.bf16 %v610_v32, %v609_v30  ;;  %v5375_v47 = vpack.c.bf16 %v628_v37, %v627_v36 }
 0x11f   :  { %5362 = vmatpush3.bf16.msra.mxu1 %v5361_v63  ;;  %v5405_v46 = vpack.c.bf16 %v642_v35, %v641_v42  ;;  %v612_v48 = vld [vmem:[%s9223_s1 + $0x1228] sm:$0xff]  ;;  %v643_v49 = vld [vmem:[%s9223_s1 + $0x1320] sm:$0xff]  ;;  %v5407_v50 = vpack.c.bf16 %v660_v41, %v659_v40  ;;  %v629_v53 = vld [vmem:[%s9223_s1 + $0x12b0] sm:$0xff] }
 0x120   :  { %5364 = vmatprep.subr.bf16.mxu1 %v5363_v5  ;;  %v630_v54 = vld [vmem:[%s9223_s1 + $0x12b8] sm:$0xff]  ;;  %v661_v55 = vld [vmem:[%s9223_s1 + $0x13b0] sm:$0xff]  ;;  %v631_v33 = vld [vmem:[%s9223_s1 + $0x12c0] sm:$0xff] }
 0x121   :  { %5334 = vmatpush3.bf16.msra.mxu0 %v5333_v12  ;;  %v662_v56 = vld [vmem:[%s9223_s1 + $0x13b8] sm:$0xff]  ;;  %v5379_v58 = vpack.c.bf16 %v630_v54, %v629_v53  ;;  %v613_v59 = vld [vmem:[%s9223_s1 + $0x1230] sm:$0xff]  ;;  %v632_v63 = vld [vmem:[%s9223_s1 + $0x12c8] sm:$0xff] }
 0x122   :  { %5368 = vmatprep.subr.bf16.mxu0 %v5367_v15  ;;  %v614_v51 = vld [vmem:[%s9223_s1 + $0x1238] sm:$0xff]  ;;  %v645_v60 = vld [vmem:[%s9223_s1 + $0x1330] sm:$0xff]  ;;  %v5411_v61 = vpack.c.bf16 %v662_v56, %v661_v55  ;;  %v663_v0 = vld [vmem:[%s9223_s1 + $0x13c0] sm:$0xff]  ;;  %v5383_v4 = vpack.c.bf16 %v632_v63, %v631_v33 }
 0x123   :  { %5366 = vmatpush3.bf16.msra.mxu1 %v5365_v14  ;;  %v646_v62 = vld [vmem:[%s9223_s1 + $0x1338] sm:$0xff]  ;;  %v664_v1 = vld [vmem:[%s9223_s1 + $0x13c8] sm:$0xff]  ;;  %v5381_v2 = vpack.c.bf16 %v614_v51, %v613_v59  ;;  %v615_v5 = vld [vmem:[%s9223_s1 + $0x1240] sm:$0xff] }
 0x124   :  { %5400 = vmatprep.subr.bf16.mxu1 %v5399_v19  ;;  %2599 = vmatmul.mubr.f32.vlgmr.msra.gmra.mrb[16].mxu0 %v7564_v52  ;;  %v611_v52 = vld [vmem:[%s9223_s1 + $0x1220] sm:$0xff]  ;;  %v5413_v3 = vpack.c.bf16 %v646_v62, %v645_v60  ;;  %v616_v6 = vld [vmem:[%s9223_s1 + $0x1248] sm:$0xff]  ;;  %v5415_v7 = vpack.c.bf16 %v664_v1, %v663_v0  ;;  %v633_v26 = vld [vmem:[%s9223_s1 + $0x12d0] sm:$0xff] }
 0x125   :  { %5370 = vmatpush3.bf16.msra.mxu0 %v5369_v28  ;;  %2738 = vmatprep.mubr.f32.mxu0 %v1246_v38  ;;  %v5377_v57 = vpack.c.bf16 %v612_v48, %v611_v52  ;;  %v647_v8 = vld [vmem:[%s9223_s1 + $0x1340] sm:$0xff]  ;;  %v648_v9 = vld [vmem:[%s9223_s1 + $0x1348] sm:$0xff]  ;;  %v634_v11 = vld [vmem:[%s9223_s1 + $0x12d8] sm:$0xff]  ;;  %v5385_v15 = vpack.c.bf16 %v616_v6, %v615_v5 }
 0x126   :  { %2669 = vmatmul.mubr.f32.vlgmr.msra.gmra.mrb[16].mxu1 %v7573_v39  ;;  %5372 = vmatprep.subr.bf16.mxu0 %v5371_v31  ;;  %v644_v39 = vld [vmem:[%s9223_s1 + $0x1328] sm:$0xff]  ;;  %v665_v12 = vld [vmem:[%s9223_s1 + $0x13d0] sm:$0xff]  ;;  %v666_v14 = vld [vmem:[%s9223_s1 + $0x13d8] sm:$0xff]  ;;  %v5417_v16 = vpack.c.bf16 %v648_v9, %v647_v8  ;;  %v5387_v17 = vpack.c.bf16 %v634_v11, %v633_v26 }
 0x127   :  { %5402 = vmatpush3.bf16.msra.mxu1 %v5401_v29  ;;  %2808 = vmatprep.mubr.f32.mxu1 %v1247_v43  ;;  %v5409_v45 = vpack.c.bf16 %v644_v39, %v643_v49  ;;  %v617_v18 = vld [vmem:[%s9223_s1 + $0x1250] sm:$0xff]  ;;  %v618_v19 = vld [vmem:[%s9223_s1 + $0x1258] sm:$0xff]  ;;  %v5419_v21 = vpack.c.bf16 %v666_v14, %v665_v12  ;;  %v635_v24 = vld [vmem:[%s9223_s1 + $0x12e0] sm:$0xff] }
 0x128   :  { %5404 = vmatprep.subr.bf16.mxu1 %v5403_v34  ;;  %v649_v20 = vld [vmem:[%s9223_s1 + $0x1350] sm:$0xff]  ;;  %v650_v22 = vld [vmem:[%s9223_s1 + $0x1358] sm:$0xff]  ;;  %v636_v25 = vld [vmem:[%s9223_s1 + $0x12e8] sm:$0xff]  ;;  %v5389_v31 = vpack.c.bf16 %v618_v19, %v617_v18 }
 0x129   :  { %5374 = vmatpush3.bf16.msra.mxu0 %v5373_v44  ;;  %v667_v28 = vld [vmem:[%s9223_s1 + $0x13e0] sm:$0xff]  ;;  %v668_v29 = vld [vmem:[%s9223_s1 + $0x13e8] sm:$0xff]  ;;  %v5421_v30 = vpack.c.bf16 %v650_v22, %v649_v20  ;;  %v5391_v32 = vpack.c.bf16 %v636_v25, %v635_v24  ;;  %v637_v40 = vld [vmem:[%s9223_s1 + $0x12f0] sm:$0xff] }
 0x12a   :  { %5376 = vmatprep.subr.bf16.mxu0 %v5375_v47  ;;  %v619_v42 = vld [vmem:[%s9223_s1 + $0x1260] sm:$0xff]  ;;  %v620_v34 = vld [vmem:[%s9223_s1 + $0x1268] sm:$0xff]  ;;  %v5423_v37 = vpack.c.bf16 %v668_v29, %v667_v28  ;;  %v638_v41 = vld [vmem:[%s9223_s1 + $0x12f8] sm:$0xff] }
 0x12b   :  { %5406 = vmatpush3.bf16.msra.mxu1 %v5405_v46  ;;  %v651_v35 = vld [vmem:[%s9223_s1 + $0x1360] sm:$0xff]  ;;  %v652_v38 = vld [vmem:[%s9223_s1 + $0x1368] sm:$0xff]  ;;  %v669_v46 = vld [vmem:[%s9223_s1 + $0x13f0] sm:$0xff]  ;;  %v5393_v49 = vpack.c.bf16 %v620_v34, %v619_v42  ;;  %v5395_v54 = vpack.c.bf16 %v638_v41, %v637_v40 }
 0x12c   :  { %5408 = vmatprep.subr.bf16.mxu1 %v5407_v50  ;;  %v670_v47 = vld [vmem:[%s9223_s1 + $0x13f8] sm:$0xff]  ;;  %v25_v50 = vld [vmem:[%s9222_s0 + $0x50] sm:$0xff]  ;;  %v5425_v53 = vpack.c.bf16 %v652_v38, %v651_v35  ;;  %v687_v51 = vld [vmem:[%s9223_s1 + $0x1480] sm:$0xff] }
 0x12d   :  { %5378 = vmatpush3.bf16.msra.mxu0 %v5377_v57  ;;  %v621_v55 = vld [vmem:[%s9223_s1 + $0x1270] sm:$0xff]  ;;  %v622_v56 = vld [vmem:[%s9223_s1 + $0x1278] sm:$0xff]  ;;  %v688_v60 = vld [vmem:[%s9223_s1 + $0x1488] sm:$0xff]  ;;  %v1248_v62 = vcombine.high %v25_v50, %v25_v50  ;;  %v7984_v9 = vrot.slane %v25_v50, %v6029_v13 }
 0x12e   :  { %5380 = vmatprep.subr.bf16.mxu0 %v5379_v58  ;;  %v653_v57 = vld [vmem:[%s9223_s1 + $0x1370] sm:$0xff]  ;;  %v5427_v58 = vpack.c.bf16 %v670_v47, %v669_v46  ;;  %v654_v59 = vld [vmem:[%s9223_s1 + $0x1378] sm:$0xff]  ;;  %v5397_v63 = vpack.c.bf16 %v622_v56, %v621_v55  ;;  %v5431_v1 = vpack.c.bf16 %v688_v60, %v687_v51  ;;  %v704_v6 = vld [vmem:[%s9223_s1 + $0x1508] sm:$0xff] }
 0x12f   :  { %5410 = vmatpush3.bf16.msra.mxu1 %v5409_v45  ;;  %v5429_v0 = vpack.c.bf16 %v654_v59, %v653_v57  ;;  %v689_v8 = vld [vmem:[%s9223_s1 + $0x1490] sm:$0xff]  ;;  %v722_v11 = vld [vmem:[%s9223_s1 + $0x1598] sm:$0xff]  ;;  %v7993_v12 = vrot.slane %v1248_v62, %v6029_v13  ;;  %v691_v22 = vld [vmem:[%s9223_s1 + $0x14a0] sm:$0xff]  ;;  %v1263_v25 = vcombine.high %v7984_v9, %v7984_v9 }
 0x130   :  { %5412 = vmatprep.subr.bf16.mxu1 %v5411_v61  ;;  %v719_v61 = vld [vmem:[%s9223_s1 + $0x1580] sm:$0xff]  ;;  %v721_v26 = vld [vmem:[%s9223_s1 + $0x1590] sm:$0xff]  ;;  %v674_v18 = vld [vmem:[%s9223_s1 + $0x1418] sm:$0xff] }
 0x131   :  { %5382 = vmatpush3.bf16.msra.mxu0 %v5381_v2  ;;  %v671_v2 = vld [vmem:[%s9223_s1 + $0x1400] sm:$0xff]  ;;  %v705_v19 = vld [vmem:[%s9223_s1 + $0x1510] sm:$0xff]  ;;  %v5467_v20 = vpack.c.bf16 %v722_v11, %v721_v26  ;;  %v692_v24 = vld [vmem:[%s9223_s1 + $0x14a8] sm:$0xff] }
 0x132   :  { %5384 = vmatprep.subr.bf16.mxu0 %v5383_v4  ;;  %v703_v4 = vld [vmem:[%s9223_s1 + $0x1500] sm:$0xff]  ;;  %v724_v29 = vld [vmem:[%s9223_s1 + $0x15a8] sm:$0xff]  ;;  %v5439_v42 = vpack.c.bf16 %v692_v24, %v691_v22  ;;  %v694_v38 = vld [vmem:[%s9223_s1 + $0x14b8] sm:$0xff] }
 0x133   :  { %5414 = vmatpush3.bf16.msra.mxu1 %v5413_v3  ;;  %v672_v3 = vld [vmem:[%s9223_s1 + $0x1408] sm:$0xff]  ;;  %v723_v28 = vld [vmem:[%s9223_s1 + $0x15a0] sm:$0xff]  ;;  %v725_v40 = vld [vmem:[%s9223_s1 + $0x15b0] sm:$0xff] }
 0x134   :  { %5416 = vmatprep.subr.bf16.mxu1 %v5415_v7  ;;  %v690_v7 = vld [vmem:[%s9223_s1 + $0x1498] sm:$0xff]  ;;  %v5433_v14 = vpack.c.bf16 %v672_v3, %v671_v2  ;;  %v676_v34 = vld [vmem:[%s9223_s1 + $0x1428] sm:$0xff]  ;;  %v707_v35 = vld [vmem:[%s9223_s1 + $0x1520] sm:$0xff] }
 0x135   :  { %5386 = vmatpush3.bf16.msra.mxu0 %v5385_v15  ;;  %v5465_v15 = vpack.c.bf16 %v704_v6, %v703_v4  ;;  %v726_v41 = vld [vmem:[%s9223_s1 + $0x15b8] sm:$0xff]  ;;  %v677_v47 = vld [vmem:[%s9223_s1 + $0x1430] sm:$0xff]  ;;  %v728_v55 = vld [vmem:[%s9223_s1 + $0x15c8] sm:$0xff] }
 0x136   :  { %5388 = vmatprep.subr.bf16.mxu0 %v5387_v17  ;;  %v673_v17 = vld [vmem:[%s9223_s1 + $0x1410] sm:$0xff]  ;;  %v710_v50 = vld [vmem:[%s9223_s1 + $0x1538] sm:$0xff]  ;;  %v680_v59 = vld [vmem:[%s9223_s1 + $0x1448] sm:$0xff] }
 0x137   :  { %5418 = vmatpush3.bf16.msra.mxu1 %v5417_v16  ;;  %v3843_v36 = vpop.f32.mrb[4].mxu0  ;;  %v5435_v16 = vpack.c.bf16 %v690_v7, %v689_v8  ;;  %v711_v51 = vld [vmem:[%s9223_s1 + $0x1540] sm:$0xff]  ;;  %v698_v62 = vld [vmem:[%s9223_s1 + $0x14d8] sm:$0xff]  ;;  %v681_v4 = vld [vmem:[%s9223_s1 + $0x1450] sm:$0xff] }
 0x138   :  { %5420 = vmatprep.subr.bf16.mxu1 %v5419_v21  ;;  %v3844_v43 = vpop.f32.mrb[5].mxu0  ;;  %v706_v21 = vld [vmem:[%s9223_s1 + $0x1518] sm:$0xff]  ;;  %v713_v6 = vld [vmem:[%s9223_s1 + $0x1550] sm:$0xff]  ;;  %v699_v26 = vld [vmem:[%s9223_s1 + $0x14e0] sm:$0xff] }
 0x139   :  { %v3878_v44 = vpop.f32.mrb[4].mxu1  ;;  %v3845_v52 = vadd.f32 %v3844_v43, %v3843_v36  ;;  %5390 = vmatpush3.bf16.msra.mxu0 %v5389_v31  ;;  %v1264_v31 = vcombine.high %v7993_v12, %v7993_v12  ;;  %v5471_v36 = vpack.c.bf16 %v724_v29, %v723_v28  ;;  %v714_v7 = vld [vmem:[%s9223_s1 + $0x1558] sm:$0xff]  ;;  %v700_v11 = vld [vmem:[%s9223_s1 + $0x14e8] sm:$0xff]  ;;  %v701_v28 = vld [vmem:[%s9223_s1 + $0x14f0] sm:$0xff] }
 0x13a   :  { %v3879_v48 = vpop.f32.mrb[5].mxu1  ;;  %5392 = vmatprep.subr.bf16.mxu0 %v5391_v32  ;;  %v5469_v32 = vpack.c.bf16 %v706_v21, %v705_v19  ;;  %v683_v19 = vld [vmem:[%s9223_s1 + $0x1460] sm:$0xff]  ;;  %v702_v29 = vld [vmem:[%s9223_s1 + $0x14f8] sm:$0xff] }
 0x13b   :  { %v3880_v39 = vadd.f32 %v3879_v48, %v3878_v44  ;;  %5422 = vmatpush3.bf16.msra.mxu1 %v5421_v30  ;;  %v1761_v45 = vadd.f32 %v3845_v52, %v7753_v10  ;;  %v720_v10 = vld [vmem:[%s9223_s1 + $0x1588] sm:$0xff]  ;;  %v5437_v30 = vpack.c.bf16 %v674_v18, %v673_v17  ;;  %v678_v52 = vld [vmem:[%s9223_s1 + $0x1438] sm:$0xff]  ;;  %v709_v48 = vld [vmem:[%s9223_s1 + $0x1530] sm:$0xff]  ;;  %v5485_v17 = vpack.c.bf16 %v714_v7, %v713_v6 }
 0x13c   :  { %5424 = vmatprep.subr.bf16.mxu1 %v5423_v37  ;;  %v5463_v5 = vpack.c.bf16 %v720_v10, %v719_v61  ;;  %v693_v37 = vld [vmem:[%s9223_s1 + $0x14b0] sm:$0xff]  ;;  %v5445_v56 = vpack.c.bf16 %v678_v52, %v677_v47  ;;  %v5477_v57 = vpack.c.bf16 %v710_v50, %v709_v48  ;;  %v712_v61 = vld [vmem:[%s9223_s1 + $0x1548] sm:$0xff]  ;;  %v5455_v18 = vpack.c.bf16 %v700_v11, %v699_v26  ;;  %v715_v21 = vld [vmem:[%s9223_s1 + $0x1560] sm:$0xff] }
 0x13d   :  { %v7963_v33 = vadd.f32 %v3880_v39, %v1761_v45  ;;  %5394 = vmatpush3.bf16.msra.mxu0 %v5393_v49  ;;  %v5443_v46 = vpack.c.bf16 %v694_v38, %v693_v37  ;;  %v5475_v49 = vpack.c.bf16 %v726_v41, %v725_v40  ;;  %v695_v39 = vld [vmem:[%s9223_s1 + $0x14c0] sm:$0xff]  ;;  %v697_v10 = vld [vmem:[%s9223_s1 + $0x14d0] sm:$0xff]  ;;  %v5481_v2 = vpack.c.bf16 %v712_v61, %v711_v51  ;;  %v686_v41 = vld [vmem:[%s9223_s1 + $0x1478] sm:$0xff] }
 0x13e   :  { %5396 = vmatprep.subr.bf16.mxu0 %v5395_v54  ;;  %v727_v54 = vld [vmem:[%s9223_s1 + $0x15c0] sm:$0xff]  ;;  %v5451_v3 = vpack.c.bf16 %v698_v62, %v697_v10  ;;  %v5459_v38 = vpack.c.bf16 %v702_v29, %v701_v28  ;;  %v685_v40 = vld [vmem:[%s9223_s1 + $0x1470] sm:$0xff]  ;;  %v718_v47 = vld [vmem:[%s9223_s1 + $0x1578] sm:$0xff] }
 0x13f   :  { %5426 = vmatpush3.bf16.msra.mxu1 %v5425_v53  ;;  %v696_v53 = vld [vmem:[%s9223_s1 + $0x14c8] sm:$0xff]  ;;  %v5479_v60 = vpack.c.bf16 %v728_v55, %v727_v54  ;;  %v751_v52 = vld [vmem:[%s9223_s1 + $0x1680] sm:$0xff]  ;;  %v753_v51 = vld [vmem:[%s9223_s1 + $0x1690] sm:$0xff] }
 0x140   :  { %5428 = vmatprep.subr.bf16.mxu1 %v5427_v58  ;;  %v5447_v45 = vpack.c.bf16 %v696_v53, %v695_v39  ;;  %v679_v58 = vld [vmem:[%s9223_s1 + $0x1440] sm:$0xff]  ;;  %v752_v48 = vld [vmem:[%s9223_s1 + $0x1688] sm:$0xff]  ;;  %v5461_v53 = vpack.c.bf16 %v686_v41, %v685_v40  ;;  %v785_v10 = vld [vmem:[%s9223_s1 + $0x1790] sm:$0xff] }
 0x141   :  { %5398 = vmatpush3.bf16.msra.mxu0 %v5397_v63  ;;  %v729_v63 = vld [vmem:[%s9223_s1 + $0x15d0] sm:$0xff]  ;;  %v5495_v55 = vpack.c.bf16 %v752_v48, %v751_v52  ;;  %v786_v62 = vld [vmem:[%s9223_s1 + $0x1798] sm:$0xff]  ;;  %v755_v7 = vld [vmem:[%s9223_s1 + $0x16a0] sm:$0xff] }
 0x142   :  { %5432 = vmatprep.subr.bf16.mxu0 %v5431_v1  ;;  %v5449_v1 = vpack.c.bf16 %v680_v59, %v679_v58  ;;  %v768_v59 = vld [vmem:[%s9223_s1 + $0x1708] sm:$0xff]  ;;  %v5531_v6 = vpack.c.bf16 %v786_v62, %v785_v10  ;;  %v789_v28 = vld [vmem:[%s9223_s1 + $0x17b0] sm:$0xff]  ;;  %v790_v29 = vld [vmem:[%s9223_s1 + $0x17b8] sm:$0xff] }
 0x143   :  { %5430 = vmatpush3.bf16.msra.mxu1 %v5429_v0  ;;  %v730_v0 = vld [vmem:[%s9223_s1 + $0x15d8] sm:$0xff]  ;;  %v756_v26 = vld [vmem:[%s9223_s1 + $0x16a8] sm:$0xff]  ;;  %v775_v52 = vld [vmem:[%s9223_s1 + $0x1740] sm:$0xff] }
 0x144   :  { %5464 = vmatprep.subr.bf16.mxu1 %v5463_v5  ;;  %2739 = vmatmul.mubr.f32.vlgmr.msra.gmra.mrb[18].mxu0 %v7774_v23  ;;  %v675_v23 = vld [vmem:[%s9223_s1 + $0x1420] sm:$0xff]  ;;  %v682_v5 = vld [vmem:[%s9223_s1 + $0x1458] sm:$0xff]  ;;  %v5483_v8 = vpack.c.bf16 %v730_v0, %v729_v63  ;;  %v792_v40 = vld [vmem:[%s9223_s1 + $0x17c8] sm:$0xff] }
 0x145   :  { %5434 = vmatpush3.bf16.msra.mxu0 %v5433_v14  ;;  %2878 = vmatprep.mubr.f32.mxu0 %v1263_v25  ;;  %v5441_v43 = vpack.c.bf16 %v676_v34, %v675_v23  ;;  %v731_v14 = vld [vmem:[%s9223_s1 + $0x15e0] sm:$0xff]  ;;  %v716_v25 = vld [vmem:[%s9223_s1 + $0x1568] sm:$0xff] }
 0x146   :  { %2809 = vmatmul.mubr.f32.vlgmr.msra.gmra.mrb[18].mxu1 %v7783_v27  ;;  %5436 = vmatprep.subr.bf16.mxu0 %v5435_v16  ;;  %v708_v27 = vld [vmem:[%s9223_s1 + $0x1528] sm:$0xff]  ;;  %v5453_v16 = vpack.c.bf16 %v682_v5, %v681_v4  ;;  %v5489_v37 = vpack.c.bf16 %v716_v25, %v715_v21  ;;  %v738_v4 = vld [vmem:[%s9223_s1 + $0x1618] sm:$0xff]  ;;  %v769_v5 = vld [vmem:[%s9223_s1 + $0x1710] sm:$0xff] }
 0x147   :  { %5466 = vmatpush3.bf16.msra.mxu1 %v5465_v15  ;;  %2948 = vmatprep.mubr.f32.mxu1 %v1264_v31  ;;  %v5473_v44 = vpack.c.bf16 %v708_v27, %v707_v35  ;;  %v732_v15 = vld [vmem:[%s9223_s1 + $0x15e8] sm:$0xff]  ;;  %v771_v21 = vld [vmem:[%s9223_s1 + $0x1720] sm:$0xff]  ;;  %v758_v25 = vld [vmem:[%s9223_s1 + $0x16b8] sm:$0xff] }
 0x148   :  { %5468 = vmatprep.subr.bf16.mxu1 %v5467_v20  ;;  %v684_v20 = vld [vmem:[%s9223_s1 + $0x1468] sm:$0xff]  ;;  %v5487_v24 = vpack.c.bf16 %v732_v15, %v731_v14  ;;  %v787_v14 = vld [vmem:[%s9223_s1 + $0x17a0] sm:$0xff] }
 0x149   :  { %5438 = vmatpush3.bf16.msra.mxu0 %v5437_v30  ;;  %v5457_v35 = vpack.c.bf16 %v684_v20, %v683_v19  ;;  %v788_v15 = vld [vmem:[%s9223_s1 + $0x17a8] sm:$0xff]  ;;  %v5503_v19 = vpack.c.bf16 %v756_v26, %v755_v7  ;;  %v763_v10 = vld [vmem:[%s9223_s1 + $0x16e0] sm:$0xff] }
 0x14a   :  { %5440 = vmatprep.subr.bf16.mxu0 %v5439_v42  ;;  %v734_v42 = vld [vmem:[%s9223_s1 + $0x15f8] sm:$0xff]  ;;  %v740_v20 = vld [vmem:[%s9223_s1 + $0x1628] sm:$0xff] }
 0x14b   :  { %5470 = vmatpush3.bf16.msra.mxu1 %v5469_v32  ;;  %v733_v32 = vld [vmem:[%s9223_s1 + $0x15f0] sm:$0xff]  ;;  %v764_v62 = vld [vmem:[%s9223_s1 + $0x16e8] sm:$0xff] }
 0x14c   :  { %5472 = vmatprep.subr.bf16.mxu1 %v5471_v36  ;;  %v26_v36 = vld [vmem:[%s9222_s0 + $0x58] sm:$0xff] }
 0x14d   :  { %5442 = vmatpush3.bf16.msra.mxu0 %v5441_v43  ;;  %v717_v43 = vld [vmem:[%s9223_s1 + $0x1570] sm:$0xff]  ;;  %v1265_v50 = vcombine.high %v26_v36, %v26_v36  ;;  %v8194_v61 = vrot.slane %v26_v36, %v6029_v13  ;;  %v774_v36 = vld [vmem:[%s9223_s1 + $0x1738] sm:$0xff] }
 0x14e   :  { %5444 = vmatprep.subr.bf16.mxu0 %v5443_v46  ;;  %v5491_v46 = vpack.c.bf16 %v734_v42, %v733_v32  ;;  %v5493_v54 = vpack.c.bf16 %v718_v47, %v717_v43  ;;  %v741_v42 = vld [vmem:[%s9223_s1 + $0x1630] sm:$0xff]  ;;  %v744_v47 = vld [vmem:[%s9223_s1 + $0x1648] sm:$0xff] }
 0x14f   :  { %5474 = vmatpush3.bf16.msra.mxu1 %v5473_v44  ;;  %v8203_v63 = vrot.slane %v1265_v50, %v6029_v13  ;;  %v1280_v11 = vcombine.high %v8194_v61, %v8194_v61  ;;  %v762_v50 = vld [vmem:[%s9223_s1 + $0x16d8] sm:$0xff] }
 0x150   :  { %5476 = vmatprep.subr.bf16.mxu1 %v5475_v49  ;;  %v783_v49 = vld [vmem:[%s9223_s1 + $0x1780] sm:$0xff] }
 0x151   :  { %5446 = vmatpush3.bf16.msra.mxu0 %v5445_v56  ;;  %v735_v56 = vld [vmem:[%s9223_s1 + $0x1600] sm:$0xff] }
 0x152   :  { %5448 = vmatprep.subr.bf16.mxu0 %v5447_v45  ;;  %v767_v45 = vld [vmem:[%s9223_s1 + $0x1700] sm:$0xff] }
 0x153   :  { %5478 = vmatpush3.bf16.msra.mxu1 %v5477_v57  ;;  %v736_v57 = vld [vmem:[%s9223_s1 + $0x1608] sm:$0xff] }
 0x154   :  { %5480 = vmatprep.subr.bf16.mxu1 %v5479_v60  ;;  %v754_v60 = vld [vmem:[%s9223_s1 + $0x1698] sm:$0xff]  ;;  %v5497_v0 = vpack.c.bf16 %v736_v57, %v735_v56 }
 0x155   :  { %5450 = vmatpush3.bf16.msra.mxu0 %v5449_v1  ;;  %v5529_v1 = vpack.c.bf16 %v768_v59, %v767_v45  ;;  %v745_v45 = vld [vmem:[%s9223_s1 + $0x1650] sm:$0xff] }
 0x156   :  { %5452 = vmatprep.subr.bf16.mxu0 %v5451_v3  ;;  %v737_v3 = vld [vmem:[%s9223_s1 + $0x1610] sm:$0xff] }
 0x157   :  { %5482 = vmatpush3.bf16.msra.mxu1 %v5481_v2  ;;  %v3913_v22 = vpop.f32.mrb[6].mxu0  ;;  %v5499_v2 = vpack.c.bf16 %v754_v60, %v753_v51  ;;  %v777_v59 = vld [vmem:[%s9223_s1 + $0x1750] sm:$0xff]  ;;  %v778_v60 = vld [vmem:[%s9223_s1 + $0x1758] sm:$0xff] }
 0x158   :  { %5484 = vmatprep.subr.bf16.mxu1 %v5483_v8  ;;  %v3914_v31 = vpop.f32.mrb[7].mxu0  ;;  %v770_v8 = vld [vmem:[%s9223_s1 + $0x1718] sm:$0xff] }
 0x159   :  { %v3948_v30 = vpop.f32.mrb[6].mxu1  ;;  %v3915_v23 = vadd.f32 %v3914_v31, %v3913_v22  ;;  %5454 = vmatpush3.bf16.msra.mxu0 %v5453_v16  ;;  %v1281_v16 = vcombine.high %v8203_v63, %v8203_v63  ;;  %v5535_v22 = vpack.c.bf16 %v788_v15, %v787_v14  ;;  %v765_v14 = vld [vmem:[%s9223_s1 + $0x16f0] sm:$0xff]  ;;  %v766_v15 = vld [vmem:[%s9223_s1 + $0x16f8] sm:$0xff] }
 0x15a   :  { %v3949_v34 = vpop.f32.mrb[7].mxu1  ;;  %5456 = vmatprep.subr.bf16.mxu0 %v5455_v18  ;;  %v5533_v18 = vpack.c.bf16 %v770_v8, %v769_v5  ;;  %v747_v5 = vld [vmem:[%s9223_s1 + $0x1660] sm:$0xff] }
 0x15b   :  { %v3950_v27 = vadd.f32 %v3949_v34, %v3948_v30  ;;  %5486 = vmatpush3.bf16.msra.mxu1 %v5485_v17  ;;  %v1901_v44 = vadd.f32 %v3915_v23, %v7963_v33  ;;  %v784_v33 = vld [vmem:[%s9223_s1 + $0x1788] sm:$0xff]  ;;  %v5501_v17 = vpack.c.bf16 %v738_v4, %v737_v3  ;;  %v742_v23 = vld [vmem:[%s9223_s1 + $0x1638] sm:$0xff]  ;;  %v773_v34 = vld [vmem:[%s9223_s1 + $0x1730] sm:$0xff]  ;;  %v5549_v3 = vpack.c.bf16 %v778_v60, %v777_v59 }
 0x15c   :  { %5488 = vmatprep.subr.bf16.mxu1 %v5487_v24  ;;  %v5527_v58 = vpack.c.bf16 %v784_v33, %v783_v49  ;;  %v757_v24 = vld [vmem:[%s9223_s1 + $0x16b0] sm:$0xff]  ;;  %v5509_v41 = vpack.c.bf16 %v742_v23, %v741_v42  ;;  %v5541_v43 = vpack.c.bf16 %v774_v36, %v773_v34  ;;  %v776_v49 = vld [vmem:[%s9223_s1 + $0x1748] sm:$0xff]  ;;  %v5519_v4 = vpack.c.bf16 %v764_v62, %v763_v10  ;;  %v779_v8 = vld [vmem:[%s9223_s1 + $0x1760] sm:$0xff] }
 0x15d   :  { %v8173_v39 = vadd.f32 %v3950_v27, %v1901_v44  ;;  %5458 = vmatpush3.bf16.msra.mxu0 %v5457_v35  ;;  %v5507_v32 = vpack.c.bf16 %v758_v25, %v757_v24  ;;  %v5539_v35 = vpack.c.bf16 %v790_v29, %v789_v28  ;;  %v759_v27 = vld [vmem:[%s9223_s1 + $0x16c0] sm:$0xff]  ;;  %v761_v33 = vld [vmem:[%s9223_s1 + $0x16d0] sm:$0xff]  ;;  %v5545_v56 = vpack.c.bf16 %v776_v49, %v775_v52  ;;  %v750_v29 = vld [vmem:[%s9223_s1 + $0x1678] sm:$0xff] }
 0x15e   :  { %5460 = vmatprep.subr.bf16.mxu0 %v5459_v38  ;;  %v791_v38 = vld [vmem:[%s9223_s1 + $0x17c0] sm:$0xff]  ;;  %v5515_v57 = vpack.c.bf16 %v762_v50, %v761_v33  ;;  %v5523_v25 = vpack.c.bf16 %v766_v15, %v765_v14  ;;  %v749_v28 = vld [vmem:[%s9223_s1 + $0x1670] sm:$0xff]  ;;  %v782_v42 = vld [vmem:[%s9223_s1 + $0x1778] sm:$0xff] }
 0x15f   :  { %5490 = vmatpush3.bf16.msra.mxu1 %v5489_v37  ;;  %v760_v37 = vld [vmem:[%s9223_s1 + $0x16c8] sm:$0xff]  ;;  %v5543_v48 = vpack.c.bf16 %v792_v40, %v791_v38  ;;  %v815_v23 = vld [vmem:[%s9223_s1 + $0x1880] sm:$0xff]  ;;  %v817_v52 = vld [vmem:[%s9223_s1 + $0x1890] sm:$0xff] }
 0x160   :  { %5492 = vmatprep.subr.bf16.mxu1 %v5491_v46  ;;  %v5511_v44 = vpack.c.bf16 %v760_v37, %v759_v27  ;;  %v743_v46 = vld [vmem:[%s9223_s1 + $0x1640] sm:$0xff]  ;;  %v816_v34 = vld [vmem:[%s9223_s1 + $0x1888] sm:$0xff]  ;;  %v5525_v37 = vpack.c.bf16 %v750_v29, %v749_v28  ;;  %v849_v33 = vld [vmem:[%s9223_s1 + $0x1990] sm:$0xff] }
 0x161   :  { %5462 = vmatpush3.bf16.msra.mxu0 %v5461_v53  ;;  %v793_v53 = vld [vmem:[%s9223_s1 + $0x17d0] sm:$0xff]  ;;  %v5559_v40 = vpack.c.bf16 %v816_v34, %v815_v23  ;;  %v850_v50 = vld [vmem:[%s9223_s1 + $0x1998] sm:$0xff]  ;;  %v819_v60 = vld [vmem:[%s9223_s1 + $0x18a0] sm:$0xff] }
 0x162   :  { %5496 = vmatprep.subr.bf16.mxu0 %v5495_v55  ;;  %v5513_v55 = vpack.c.bf16 %v744_v47, %v743_v46  ;;  %v832_v47 = vld [vmem:[%s9223_s1 + $0x1908] sm:$0xff]  ;;  %v5595_v59 = vpack.c.bf16 %v850_v50, %v849_v33  ;;  %v853_v14 = vld [vmem:[%s9223_s1 + $0x19b0] sm:$0xff]  ;;  %v854_v15 = vld [vmem:[%s9223_s1 + $0x19b8] sm:$0xff] }
 0x163   :  { %5494 = vmatpush3.bf16.msra.mxu1 %v5493_v54  ;;  %v794_v54 = vld [vmem:[%s9223_s1 + $0x17d8] sm:$0xff]  ;;  %v820_v10 = vld [vmem:[%s9223_s1 + $0x18a8] sm:$0xff]  ;;  %v839_v23 = vld [vmem:[%s9223_s1 + $0x1940] sm:$0xff] }
 0x164   :  { %5528 = vmatprep.subr.bf16.mxu1 %v5527_v58  ;;  %2879 = vmatmul.mubr.f32.vlgmr.msra.gmra.mrb[20].mxu0 %v7984_v9  ;;  %v739_v9 = vld [vmem:[%s9223_s1 + $0x1620] sm:$0xff]  ;;  %v746_v58 = vld [vmem:[%s9223_s1 + $0x1658] sm:$0xff]  ;;  %v5547_v51 = vpack.c.bf16 %v794_v54, %v793_v53  ;;  %v856_v28 = vld [vmem:[%s9223_s1 + $0x19c8] sm:$0xff] }
 0x165   :  { %5498 = vmatpush3.bf16.msra.mxu0 %v5497_v0  ;;  %3018 = vmatprep.mubr.f32.mxu0 %v1280_v11  ;;  %v5505_v31 = vpack.c.bf16 %v740_v20, %v739_v9  ;;  %v795_v0 = vld [vmem:[%s9223_s1 + $0x17e0] sm:$0xff]  ;;  %v780_v11 = vld [vmem:[%s9223_s1 + $0x1768] sm:$0xff] }
 0x166   :  { %2949 = vmatmul.mubr.f32.vlgmr.msra.gmra.mrb[20].mxu1 %v7993_v12  ;;  %5500 = vmatprep.subr.bf16.mxu0 %v5499_v2  ;;  %v772_v12 = vld [vmem:[%s9223_s1 + $0x1728] sm:$0xff]  ;;  %v5517_v2 = vpack.c.bf16 %v746_v58, %v745_v45  ;;  %v5553_v24 = vpack.c.bf16 %v780_v11, %v779_v8  ;;  %v802_v45 = vld [vmem:[%s9223_s1 + $0x1818] sm:$0xff]  ;;  %v833_v58 = vld [vmem:[%s9223_s1 + $0x1910] sm:$0xff] }
 0x167   :  { %5530 = vmatpush3.bf16.msra.mxu1 %v5529_v1  ;;  %3088 = vmatprep.mubr.f32.mxu1 %v1281_v16  ;;  %v5537_v30 = vpack.c.bf16 %v772_v12, %v771_v21  ;;  %v796_v1 = vld [vmem:[%s9223_s1 + $0x17e8] sm:$0xff]  ;;  %v835_v8 = vld [vmem:[%s9223_s1 + $0x1920] sm:$0xff]  ;;  %v822_v11 = vld [vmem:[%s9223_s1 + $0x18b8] sm:$0xff] }
 0x168   :  { %5532 = vmatprep.subr.bf16.mxu1 %v5531_v6  ;;  %v748_v6 = vld [vmem:[%s9223_s1 + $0x1668] sm:$0xff]  ;;  %v5551_v26 = vpack.c.bf16 %v796_v1, %v795_v0  ;;  %v851_v0 = vld [vmem:[%s9223_s1 + $0x19a0] sm:$0xff] }
 0x169   :  { %5502 = vmatpush3.bf16.msra.mxu0 %v5501_v17  ;;  %v5521_v21 = vpack.c.bf16 %v748_v6, %v747_v5  ;;  %v852_v1 = vld [vmem:[%s9223_s1 + $0x19a8] sm:$0xff]  ;;  %v5567_v5 = vpack.c.bf16 %v820_v10, %v819_v60  ;;  %v827_v33 = vld [vmem:[%s9223_s1 + $0x18e0] sm:$0xff] }
 0x16a   :  { %5504 = vmatprep.subr.bf16.mxu0 %v5503_v19  ;;  %v798_v19 = vld [vmem:[%s9223_s1 + $0x17f8] sm:$0xff]  ;;  %v804_v6 = vld [vmem:[%s9223_s1 + $0x1828] sm:$0xff] }
 0x16b   :  { %5534 = vmatpush3.bf16.msra.mxu1 %v5533_v18  ;;  %v797_v18 = vld [vmem:[%s9223_s1 + $0x17f0] sm:$0xff]  ;;  %v828_v50 = vld [vmem:[%s9223_s1 + $0x18e8] sm:$0xff] }
 0x16c   :  { %5536 = vmatprep.subr.bf16.mxu1 %v5535_v22  ;;  %v27_v22 = vld [vmem:[%s9222_s0 + $0x60] sm:$0xff] }
 0x16d   :  { %5506 = vmatpush3.bf16.msra.mxu0 %v5505_v31  ;;  %v781_v31 = vld [vmem:[%s9223_s1 + $0x1770] sm:$0xff]  ;;  %v1282_v36 = vcombine.high %v27_v22, %v27_v22  ;;  %v8404_v49 = vrot.slane %v27_v22, %v6029_v13  ;;  %v838_v22 = vld [vmem:[%s9223_s1 + $0x1938] sm:$0xff] }
 0x16e   :  { %5508 = vmatprep.subr.bf16.mxu0 %v5507_v32  ;;  %v5555_v32 = vpack.c.bf16 %v798_v19, %v797_v18  ;;  %v5557_v38 = vpack.c.bf16 %v782_v42, %v781_v31  ;;  %v805_v19 = vld [vmem:[%s9223_s1 + $0x1830] sm:$0xff]  ;;  %v808_v42 = vld [vmem:[%s9223_s1 + $0x1848] sm:$0xff] }
 0x16f   :  { %5538 = vmatpush3.bf16.msra.mxu1 %v5537_v30  ;;  %v8413_v53 = vrot.slane %v1282_v36, %v6029_v13  ;;  %v1297_v62 = vcombine.high %v8404_v49, %v8404_v49  ;;  %v826_v36 = vld [vmem:[%s9223_s1 + $0x18d8] sm:$0xff] }
 0x170   :  { %5540 = vmatprep.subr.bf16.mxu1 %v5539_v35  ;;  %v847_v35 = vld [vmem:[%s9223_s1 + $0x1980] sm:$0xff] }
 0x171   :  { %5510 = vmatpush3.bf16.msra.mxu0 %v5509_v41  ;;  %v799_v41 = vld [vmem:[%s9223_s1 + $0x1800] sm:$0xff] }
 0x172   :  { %5512 = vmatprep.subr.bf16.mxu0 %v5511_v44  ;;  %v831_v44 = vld [vmem:[%s9223_s1 + $0x1900] sm:$0xff] }
 0x173   :  { %5542 = vmatpush3.bf16.msra.mxu1 %v5541_v43  ;;  %v800_v43 = vld [vmem:[%s9223_s1 + $0x1808] sm:$0xff] }
 0x174   :  { %5544 = vmatprep.subr.bf16.mxu1 %v5543_v48  ;;  %v818_v48 = vld [vmem:[%s9223_s1 + $0x1898] sm:$0xff]  ;;  %v5561_v54 = vpack.c.bf16 %v800_v43, %v799_v41 }
 0x175   :  { %5514 = vmatpush3.bf16.msra.mxu0 %v5513_v55  ;;  %v5593_v55 = vpack.c.bf16 %v832_v47, %v831_v44  ;;  %v809_v44 = vld [vmem:[%s9223_s1 + $0x1850] sm:$0xff] }
 0x176   :  { %5516 = vmatprep.subr.bf16.mxu0 %v5515_v57  ;;  %v801_v57 = vld [vmem:[%s9223_s1 + $0x1810] sm:$0xff] }
 0x177   :  { %5546 = vmatpush3.bf16.msra.mxu1 %v5545_v56  ;;  %v3983_v7 = vpop.f32.mrb[8].mxu0  ;;  %v5563_v56 = vpack.c.bf16 %v818_v48, %v817_v52  ;;  %v841_v47 = vld [vmem:[%s9223_s1 + $0x1950] sm:$0xff]  ;;  %v842_v48 = vld [vmem:[%s9223_s1 + $0x1958] sm:$0xff] }
 0x178   :  { %5548 = vmatprep.subr.bf16.mxu1 %v5547_v51  ;;  %v3984_v16 = vpop.f32.mrb[9].mxu0  ;;  %v834_v51 = vld [vmem:[%s9223_s1 + $0x1918] sm:$0xff] }
 0x179   :  { %v4018_v17 = vpop.f32.mrb[8].mxu1  ;;  %v3985_v9 = vadd.f32 %v3984_v16, %v3983_v7  ;;  %5518 = vmatpush3.bf16.msra.mxu0 %v5517_v2  ;;  %v1298_v2 = vcombine.high %v8413_v53, %v8413_v53  ;;  %v5599_v7 = vpack.c.bf16 %v852_v1, %v851_v0  ;;  %v829_v0 = vld [vmem:[%s9223_s1 + $0x18f0] sm:$0xff]  ;;  %v830_v1 = vld [vmem:[%s9223_s1 + $0x18f8] sm:$0xff] }
 0x17a   :  { %v4019_v20 = vpop.f32.mrb[9].mxu1  ;;  %5520 = vmatprep.subr.bf16.mxu0 %v5519_v4  ;;  %v5597_v4 = vpack.c.bf16 %v834_v51, %v833_v58  ;;  %v811_v58 = vld [vmem:[%s9223_s1 + $0x1860] sm:$0xff] }
 0x17b   :  { %v4020_v12 = vadd.f32 %v4019_v20, %v4018_v17  ;;  %5550 = vmatpush3.bf16.msra.mxu1 %v5549_v3  ;;  %v2041_v30 = vadd.f32 %v3985_v9, %v8173_v39  ;;  %v848_v39 = vld [vmem:[%s9223_s1 + $0x1988] sm:$0xff]  ;;  %v5565_v3 = vpack.c.bf16 %v802_v45, %v801_v57  ;;  %v806_v9 = vld [vmem:[%s9223_s1 + $0x1838] sm:$0xff]  ;;  %v837_v20 = vld [vmem:[%s9223_s1 + $0x1930] sm:$0xff]  ;;  %v5613_v57 = vpack.c.bf16 %v842_v48, %v841_v47 }
 0x17c   :  { %5552 = vmatprep.subr.bf16.mxu1 %v5551_v26  ;;  %v5591_v46 = vpack.c.bf16 %v848_v39, %v847_v35  ;;  %v821_v26 = vld [vmem:[%s9223_s1 + $0x18b0] sm:$0xff]  ;;  %v5573_v29 = vpack.c.bf16 %v806_v9, %v805_v19  ;;  %v5605_v31 = vpack.c.bf16 %v838_v22, %v837_v20  ;;  %v840_v35 = vld [vmem:[%s9223_s1 + $0x1948] sm:$0xff]  ;;  %v5583_v45 = vpack.c.bf16 %v828_v50, %v827_v33  ;;  %v843_v51 = vld [vmem:[%s9223_s1 + $0x1960] sm:$0xff] }
 0x17d   :  { %v8383_v27 = vadd.f32 %v4020_v12, %v2041_v30  ;;  %5522 = vmatpush3.bf16.msra.mxu0 %v5521_v21  ;;  %v5571_v18 = vpack.c.bf16 %v822_v11, %v821_v26  ;;  %v5603_v21 = vpack.c.bf16 %v854_v15, %v853_v14  ;;  %v823_v12 = vld [vmem:[%s9223_s1 + $0x18c0] sm:$0xff]  ;;  %v825_v39 = vld [vmem:[%s9223_s1 + $0x18d0] sm:$0xff]  ;;  %v5609_v41 = vpack.c.bf16 %v840_v35, %v839_v23  ;;  %v814_v15 = vld [vmem:[%s9223_s1 + $0x1878] sm:$0xff] }
 0x17e   :  { %5524 = vmatprep.subr.bf16.mxu0 %v5523_v25  ;;  %v855_v25 = vld [vmem:[%s9223_s1 + $0x19c0] sm:$0xff]  ;;  %v5579_v43 = vpack.c.bf16 %v826_v36, %v825_v39  ;;  %v5587_v11 = vpack.c.bf16 %v830_v1, %v829_v0  ;;  %v813_v14 = vld [vmem:[%s9223_s1 + $0x1870] sm:$0xff]  ;;  %v846_v19 = vld [vmem:[%s9223_s1 + $0x1978] sm:$0xff] }
 0x17f   :  { %5554 = vmatpush3.bf16.msra.mxu1 %v5553_v24  ;;  %v824_v24 = vld [vmem:[%s9223_s1 + $0x18c8] sm:$0xff]  ;;  %v5607_v34 = vpack.c.bf16 %v856_v28, %v855_v25  ;;  %v879_v9 = vld [vmem:[%s9223_s1 + $0x1a80] sm:$0xff]  ;;  %v881_v23 = vld [vmem:[%s9223_s1 + $0x1a90] sm:$0xff] }
 0x180   :  { %5556 = vmatprep.subr.bf16.mxu1 %v5555_v32  ;;  %v5575_v30 = vpack.c.bf16 %v824_v24, %v823_v12  ;;  %v807_v32 = vld [vmem:[%s9223_s1 + $0x1840] sm:$0xff]  ;;  %v880_v20 = vld [vmem:[%s9223_s1 + $0x1a88] sm:$0xff]  ;;  %v5589_v24 = vpack.c.bf16 %v814_v15, %v813_v14  ;;  %v913_v39 = vld [vmem:[%s9223_s1 + $0x1b90] sm:$0xff] }
 0x181   :  { %5526 = vmatpush3.bf16.msra.mxu0 %v5525_v37  ;;  %v857_v37 = vld [vmem:[%s9223_s1 + $0x19d0] sm:$0xff]  ;;  %v5623_v28 = vpack.c.bf16 %v880_v20, %v879_v9  ;;  %v914_v36 = vld [vmem:[%s9223_s1 + $0x1b98] sm:$0xff]  ;;  %v883_v48 = vld [vmem:[%s9223_s1 + $0x1aa0] sm:$0xff] }
 0x182   :  { %5560 = vmatprep.subr.bf16.mxu0 %v5559_v40  ;;  %v5577_v40 = vpack.c.bf16 %v808_v42, %v807_v32  ;;  %v896_v42 = vld [vmem:[%s9223_s1 + $0x1b08] sm:$0xff]  ;;  %v5659_v47 = vpack.c.bf16 %v914_v36, %v913_v39  ;;  %v917_v0 = vld [vmem:[%s9223_s1 + $0x1bb0] sm:$0xff]  ;;  %v918_v1 = vld [vmem:[%s9223_s1 + $0x1bb8] sm:$0xff] }
 0x183   :  { %5558 = vmatpush3.bf16.msra.mxu1 %v5557_v38  ;;  %v858_v38 = vld [vmem:[%s9223_s1 + $0x19d8] sm:$0xff]  ;;  %v884_v33 = vld [vmem:[%s9223_s1 + $0x1aa8] sm:$0xff]  ;;  %v903_v9 = vld [vmem:[%s9223_s1 + $0x1b40] sm:$0xff] }
 0x184   :  { %5592 = vmatprep.subr.bf16.mxu1 %v5591_v46  ;;  %3019 = vmatmul.mubr.f32.vlgmr.msra.gmra.mrb[22].mxu0 %v8194_v61  ;;  %v803_v61 = vld [vmem:[%s9223_s1 + $0x1820] sm:$0xff]  ;;  %v810_v46 = vld [vmem:[%s9223_s1 + $0x1858] sm:$0xff]  ;;  %v5611_v52 = vpack.c.bf16 %v858_v38, %v857_v37  ;;  %v920_v14 = vld [vmem:[%s9223_s1 + $0x1bc8] sm:$0xff] }
 0x185   :  { %5562 = vmatpush3.bf16.msra.mxu0 %v5561_v54  ;;  %3158 = vmatprep.mubr.f32.mxu0 %v1297_v62  ;;  %v5569_v16 = vpack.c.bf16 %v804_v6, %v803_v61  ;;  %v859_v54 = vld [vmem:[%s9223_s1 + $0x19e0] sm:$0xff]  ;;  %v844_v62 = vld [vmem:[%s9223_s1 + $0x1968] sm:$0xff] }
 0x186   :  { %3089 = vmatmul.mubr.f32.vlgmr.msra.gmra.mrb[22].mxu1 %v8203_v63  ;;  %5564 = vmatprep.subr.bf16.mxu0 %v5563_v56  ;;  %v836_v63 = vld [vmem:[%s9223_s1 + $0x1928] sm:$0xff]  ;;  %v5581_v56 = vpack.c.bf16 %v810_v46, %v809_v44  ;;  %v5617_v26 = vpack.c.bf16 %v844_v62, %v843_v51  ;;  %v866_v44 = vld [vmem:[%s9223_s1 + $0x1a18] sm:$0xff]  ;;  %v897_v46 = vld [vmem:[%s9223_s1 + $0x1b10] sm:$0xff] }
 0x187   :  { %5594 = vmatpush3.bf16.msra.mxu1 %v5593_v55  ;;  %3228 = vmatprep.mubr.f32.mxu1 %v1298_v2  ;;  %v5601_v17 = vpack.c.bf16 %v836_v63, %v835_v8  ;;  %v860_v55 = vld [vmem:[%s9223_s1 + $0x19e8] sm:$0xff]  ;;  %v899_v51 = vld [vmem:[%s9223_s1 + $0x1b20] sm:$0xff]  ;;  %v886_v62 = vld [vmem:[%s9223_s1 + $0x1ab8] sm:$0xff] }
 0x188   :  { %5596 = vmatprep.subr.bf16.mxu1 %v5595_v59  ;;  %v812_v59 = vld [vmem:[%s9223_s1 + $0x1868] sm:$0xff]  ;;  %v5615_v10 = vpack.c.bf16 %v860_v55, %v859_v54  ;;  %v915_v54 = vld [vmem:[%s9223_s1 + $0x1ba0] sm:$0xff] }
 0x189   :  { %5566 = vmatpush3.bf16.msra.mxu0 %v5565_v3  ;;  %v5585_v8 = vpack.c.bf16 %v812_v59, %v811_v58  ;;  %v916_v55 = vld [vmem:[%s9223_s1 + $0x1ba8] sm:$0xff]  ;;  %v5631_v58 = vpack.c.bf16 %v884_v33, %v883_v48  ;;  %v891_v39 = vld [vmem:[%s9223_s1 + $0x1ae0] sm:$0xff] }
 0x18a   :  { %5568 = vmatprep.subr.bf16.mxu0 %v5567_v5  ;;  %v862_v5 = vld [vmem:[%s9223_s1 + $0x19f8] sm:$0xff]  ;;  %v868_v59 = vld [vmem:[%s9223_s1 + $0x1a28] sm:$0xff] }
 0x18b   :  { %5598 = vmatpush3.bf16.msra.mxu1 %v5597_v4  ;;  %v861_v4 = vld [vmem:[%s9223_s1 + $0x19f0] sm:$0xff]  ;;  %v892_v36 = vld [vmem:[%s9223_s1 + $0x1ae8] sm:$0xff] }
 0x18c   :  { %5600 = vmatprep.subr.bf16.mxu1 %v5599_v7  ;;  %v28_v7 = vld [vmem:[%s9222_s0 + $0x68] sm:$0xff] }
 0x18d   :  { %5570 = vmatpush3.bf16.msra.mxu0 %v5569_v16  ;;  %v845_v16 = vld [vmem:[%s9223_s1 + $0x1970] sm:$0xff]  ;;  %v1299_v22 = vcombine.high %v28_v7, %v28_v7  ;;  %v8614_v35 = vrot.slane %v28_v7, %v6029_v13  ;;  %v902_v7 = vld [vmem:[%s9223_s1 + $0x1b38] sm:$0xff] }
 0x18e   :  { %5572 = vmatprep.subr.bf16.mxu0 %v5571_v18  ;;  %v5619_v18 = vpack.c.bf16 %v862_v5, %v861_v4  ;;  %v5621_v25 = vpack.c.bf16 %v846_v19, %v845_v16  ;;  %v869_v5 = vld [vmem:[%s9223_s1 + $0x1a30] sm:$0xff]  ;;  %v872_v19 = vld [vmem:[%s9223_s1 + $0x1a48] sm:$0xff] }
 0x18f   :  { %5602 = vmatpush3.bf16.msra.mxu1 %v5601_v17  ;;  %v8623_v37 = vrot.slane %v1299_v22, %v6029_v13  ;;  %v1314_v50 = vcombine.high %v8614_v35, %v8614_v35  ;;  %v890_v22 = vld [vmem:[%s9223_s1 + $0x1ad8] sm:$0xff] }
 0x190   :  { %5604 = vmatprep.subr.bf16.mxu1 %v5603_v21  ;;  %v911_v21 = vld [vmem:[%s9223_s1 + $0x1b80] sm:$0xff] }
 0x191   :  { %5574 = vmatpush3.bf16.msra.mxu0 %v5573_v29  ;;  %v863_v29 = vld [vmem:[%s9223_s1 + $0x1a00] sm:$0xff] }
 0x192   :  { %5576 = vmatprep.subr.bf16.mxu0 %v5575_v30  ;;  %v895_v30 = vld [vmem:[%s9223_s1 + $0x1b00] sm:$0xff] }
 0x193   :  { %5606 = vmatpush3.bf16.msra.mxu1 %v5605_v31  ;;  %v864_v31 = vld [vmem:[%s9223_s1 + $0x1a08] sm:$0xff] }
 0x194   :  { %5608 = vmatprep.subr.bf16.mxu1 %v5607_v34  ;;  %v882_v34 = vld [vmem:[%s9223_s1 + $0x1a98] sm:$0xff]  ;;  %v5625_v38 = vpack.c.bf16 %v864_v31, %v863_v29 }
 0x195   :  { %5578 = vmatpush3.bf16.msra.mxu0 %v5577_v40  ;;  %v5657_v40 = vpack.c.bf16 %v896_v42, %v895_v30  ;;  %v873_v30 = vld [vmem:[%s9223_s1 + $0x1a50] sm:$0xff] }
 0x196   :  { %5580 = vmatprep.subr.bf16.mxu0 %v5579_v43  ;;  %v865_v43 = vld [vmem:[%s9223_s1 + $0x1a10] sm:$0xff] }
 0x197   :  { %5610 = vmatpush3.bf16.msra.mxu1 %v5609_v41  ;;  %v4053_v60 = vpop.f32.mrb[10].mxu0  ;;  %v5627_v41 = vpack.c.bf16 %v882_v34, %v881_v23  ;;  %v905_v42 = vld [vmem:[%s9223_s1 + $0x1b50] sm:$0xff]  ;;  %v906_v34 = vld [vmem:[%s9223_s1 + $0x1b58] sm:$0xff] }
 0x198   :  { %5612 = vmatprep.subr.bf16.mxu1 %v5611_v52  ;;  %v4054_v2 = vpop.f32.mrb[11].mxu0  ;;  %v898_v52 = vld [vmem:[%s9223_s1 + $0x1b18] sm:$0xff] }
 0x199   :  { %v4088_v3 = vpop.f32.mrb[10].mxu1  ;;  %v4055_v61 = vadd.f32 %v4054_v2, %v4053_v60  ;;  %5582 = vmatpush3.bf16.msra.mxu0 %v5581_v56  ;;  %v1315_v56 = vcombine.high %v8623_v37, %v8623_v37  ;;  %v5663_v60 = vpack.c.bf16 %v916_v55, %v915_v54  ;;  %v893_v54 = vld [vmem:[%s9223_s1 + $0x1af0] sm:$0xff]  ;;  %v894_v55 = vld [vmem:[%s9223_s1 + $0x1af8] sm:$0xff] }
 0x19a   :  { %v4089_v6 = vpop.f32.mrb[11].mxu1  ;;  %5584 = vmatprep.subr.bf16.mxu0 %v5583_v45  ;;  %v5661_v45 = vpack.c.bf16 %v898_v52, %v897_v46  ;;  %v875_v46 = vld [vmem:[%s9223_s1 + $0x1a60] sm:$0xff] }
 0x19b   :  { %v4090_v63 = vadd.f32 %v4089_v6, %v4088_v3  ;;  %5614 = vmatpush3.bf16.msra.mxu1 %v5613_v57  ;;  %v2181_v17 = vadd.f32 %v4055_v61, %v8383_v27  ;;  %v912_v27 = vld [vmem:[%s9223_s1 + $0x1b88] sm:$0xff]  ;;  %v5629_v57 = vpack.c.bf16 %v866_v44, %v865_v43  ;;  %v870_v61 = vld [vmem:[%s9223_s1 + $0x1a38] sm:$0xff]  ;;  %v901_v6 = vld [vmem:[%s9223_s1 + $0x1b30] sm:$0xff]  ;;  %v5677_v43 = vpack.c.bf16 %v906_v34, %v905_v42 }
 0x19c   :  { %5616 = vmatprep.subr.bf16.mxu1 %v5615_v10  ;;  %v5655_v32 = vpack.c.bf16 %v912_v27, %v911_v21  ;;  %v885_v10 = vld [vmem:[%s9223_s1 + $0x1ab0] sm:$0xff]  ;;  %v5637_v15 = vpack.c.bf16 %v870_v61, %v869_v5  ;;  %v5669_v16 = vpack.c.bf16 %v902_v7, %v901_v6  ;;  %v904_v21 = vld [vmem:[%s9223_s1 + $0x1b48] sm:$0xff]  ;;  %v5647_v44 = vpack.c.bf16 %v892_v36, %v891_v39  ;;  %v907_v52 = vld [vmem:[%s9223_s1 + $0x1b60] sm:$0xff] }
 0x19d   :  { %v8593_v12 = vadd.f32 %v4090_v63, %v2181_v17  ;;  %5586 = vmatpush3.bf16.msra.mxu0 %v5585_v8  ;;  %v5635_v4 = vpack.c.bf16 %v886_v62, %v885_v10  ;;  %v5667_v8 = vpack.c.bf16 %v918_v1, %v917_v0  ;;  %v887_v63 = vld [vmem:[%s9223_s1 + $0x1ac0] sm:$0xff]  ;;  %v889_v27 = vld [vmem:[%s9223_s1 + $0x1ad0] sm:$0xff]  ;;  %v5673_v29 = vpack.c.bf16 %v904_v21, %v903_v9  ;;  %v878_v1 = vld [vmem:[%s9223_s1 + $0x1a78] sm:$0xff] }
 0x19e   :  { %5588 = vmatprep.subr.bf16.mxu0 %v5587_v11  ;;  %v919_v11 = vld [vmem:[%s9223_s1 + $0x1bc0] sm:$0xff]  ;;  %v5643_v31 = vpack.c.bf16 %v890_v22, %v889_v27  ;;  %v5651_v62 = vpack.c.bf16 %v894_v55, %v893_v54  ;;  %v877_v0 = vld [vmem:[%s9223_s1 + $0x1a70] sm:$0xff]  ;;  %v910_v5 = vld [vmem:[%s9223_s1 + $0x1b78] sm:$0xff] }
 0x19f   :  { %5618 = vmatpush3.bf16.msra.mxu1 %v5617_v26  ;;  %v888_v26 = vld [vmem:[%s9223_s1 + $0x1ac8] sm:$0xff]  ;;  %v5671_v20 = vpack.c.bf16 %v920_v14, %v919_v11  ;;  %v943_v61 = vld [vmem:[%s9223_s1 + $0x1c80] sm:$0xff]  ;;  %v945_v9 = vld [vmem:[%s9223_s1 + $0x1c90] sm:$0xff] }
 0x1a0   :  { %5620 = vmatprep.subr.bf16.mxu1 %v5619_v18  ;;  %v5639_v17 = vpack.c.bf16 %v888_v26, %v887_v63  ;;  %v871_v18 = vld [vmem:[%s9223_s1 + $0x1a40] sm:$0xff]  ;;  %v944_v6 = vld [vmem:[%s9223_s1 + $0x1c88] sm:$0xff]  ;;  %v5653_v26 = vpack.c.bf16 %v878_v1, %v877_v0  ;;  %v977_v27 = vld [vmem:[%s9223_s1 + $0x1d90] sm:$0xff] }
 0x1a1   :  { %5590 = vmatpush3.bf16.msra.mxu0 %v5589_v24  ;;  %v921_v24 = vld [vmem:[%s9223_s1 + $0x1bd0] sm:$0xff]  ;;  %v5687_v14 = vpack.c.bf16 %v944_v6, %v943_v61  ;;  %v978_v22 = vld [vmem:[%s9223_s1 + $0x1d98] sm:$0xff]  ;;  %v947_v34 = vld [vmem:[%s9223_s1 + $0x1ca0] sm:$0xff] }
 0x1a2   :  { %5624 = vmatprep.subr.bf16.mxu0 %v5623_v28  ;;  %v5641_v28 = vpack.c.bf16 %v872_v19, %v871_v18  ;;  %v960_v19 = vld [vmem:[%s9223_s1 + $0x1d08] sm:$0xff]  ;;  %v5723_v42 = vpack.c.bf16 %v978_v22, %v977_v27  ;;  %v981_v54 = vld [vmem:[%s9223_s1 + $0x1db0] sm:$0xff]  ;;  %v982_v55 = vld [vmem:[%s9223_s1 + $0x1db8] sm:$0xff] }
 0x1a3   :  { %5622 = vmatpush3.bf16.msra.mxu1 %v5621_v25  ;;  %v922_v25 = vld [vmem:[%s9223_s1 + $0x1bd8] sm:$0xff]  ;;  %v948_v39 = vld [vmem:[%s9223_s1 + $0x1ca8] sm:$0xff]  ;;  %v967_v61 = vld [vmem:[%s9223_s1 + $0x1d40] sm:$0xff] }
 0x1a4   :  { %5656 = vmatprep.subr.bf16.mxu1 %v5655_v32  ;;  %3159 = vmatmul.mubr.f32.vlgmr.msra.gmra.mrb[24].mxu0 %v8404_v49  ;;  %v867_v49 = vld [vmem:[%s9223_s1 + $0x1a20] sm:$0xff]  ;;  %v874_v32 = vld [vmem:[%s9223_s1 + $0x1a58] sm:$0xff]  ;;  %v5675_v23 = vpack.c.bf16 %v922_v25, %v921_v24  ;;  %v984_v0 = vld [vmem:[%s9223_s1 + $0x1dc8] sm:$0xff] }
 0x1a5   :  { %5626 = vmatpush3.bf16.msra.mxu0 %v5625_v38  ;;  %3298 = vmatprep.mubr.f32.mxu0 %v1314_v50  ;;  %v5633_v2 = vpack.c.bf16 %v868_v59, %v867_v49  ;;  %v923_v38 = vld [vmem:[%s9223_s1 + $0x1be0] sm:$0xff]  ;;  %v908_v50 = vld [vmem:[%s9223_s1 + $0x1b68] sm:$0xff] }
 0x1a6   :  { %3229 = vmatmul.mubr.f32.vlgmr.msra.gmra.mrb[24].mxu1 %v8413_v53  ;;  %5628 = vmatprep.subr.bf16.mxu0 %v5627_v41  ;;  %v900_v53 = vld [vmem:[%s9223_s1 + $0x1b28] sm:$0xff]  ;;  %v5645_v41 = vpack.c.bf16 %v874_v32, %v873_v30  ;;  %v5681_v10 = vpack.c.bf16 %v908_v50, %v907_v52  ;;  %v930_v30 = vld [vmem:[%s9223_s1 + $0x1c18] sm:$0xff]  ;;  %v961_v32 = vld [vmem:[%s9223_s1 + $0x1d10] sm:$0xff] }
 0x1a7   :  { %5658 = vmatpush3.bf16.msra.mxu1 %v5657_v40  ;;  %3368 = vmatprep.mubr.f32.mxu1 %v1315_v56  ;;  %v5665_v3 = vpack.c.bf16 %v900_v53, %v899_v51  ;;  %v924_v40 = vld [vmem:[%s9223_s1 + $0x1be8] sm:$0xff]  ;;  %v963_v52 = vld [vmem:[%s9223_s1 + $0x1d20] sm:$0xff]  ;;  %v950_v50 = vld [vmem:[%s9223_s1 + $0x1cb8] sm:$0xff] }
 0x1a8   :  { %5660 = vmatprep.subr.bf16.mxu1 %v5659_v47  ;;  %v876_v47 = vld [vmem:[%s9223_s1 + $0x1a68] sm:$0xff]  ;;  %v5679_v33 = vpack.c.bf16 %v924_v40, %v923_v38  ;;  %v979_v38 = vld [vmem:[%s9223_s1 + $0x1da0] sm:$0xff] }
 0x1a9   :  { %5630 = vmatpush3.bf16.msra.mxu0 %v5629_v57  ;;  %v5649_v51 = vpack.c.bf16 %v876_v47, %v875_v46  ;;  %v980_v40 = vld [vmem:[%s9223_s1 + $0x1da8] sm:$0xff]  ;;  %v5695_v46 = vpack.c.bf16 %v948_v39, %v947_v34  ;;  %v955_v27 = vld [vmem:[%s9223_s1 + $0x1ce0] sm:$0xff] }
 0x1aa   :  { %5632 = vmatprep.subr.bf16.mxu0 %v5631_v58  ;;  %v926_v58 = vld [vmem:[%s9223_s1 + $0x1bf8] sm:$0xff]  ;;  %v932_v47 = vld [vmem:[%s9223_s1 + $0x1c28] sm:$0xff] }
 0x1ab   :  { %5662 = vmatpush3.bf16.msra.mxu1 %v5661_v45  ;;  %v925_v45 = vld [vmem:[%s9223_s1 + $0x1bf0] sm:$0xff]  ;;  %v956_v22 = vld [vmem:[%s9223_s1 + $0x1ce8] sm:$0xff] }
 0x1ac   :  { %5664 = vmatprep.subr.bf16.mxu1 %v5663_v60  ;;  %v29_v60 = vld [vmem:[%s9222_s0 + $0x70] sm:$0xff] }
 0x1ad   :  { %5634 = vmatpush3.bf16.msra.mxu0 %v5633_v2  ;;  %v909_v2 = vld [vmem:[%s9223_s1 + $0x1b70] sm:$0xff]  ;;  %v1316_v7 = vcombine.high %v29_v60, %v29_v60  ;;  %v8824_v21 = vrot.slane %v29_v60, %v6029_v13  ;;  %v966_v60 = vld [vmem:[%s9223_s1 + $0x1d38] sm:$0xff] }
 0x1ae   :  { %5636 = vmatprep.subr.bf16.mxu0 %v5635_v4  ;;  %v5683_v4 = vpack.c.bf16 %v926_v58, %v925_v45  ;;  %v5685_v11 = vpack.c.bf16 %v910_v5, %v909_v2  ;;  %v933_v58 = vld [vmem:[%s9223_s1 + $0x1c30] sm:$0xff]  ;;  %v936_v5 = vld [vmem:[%s9223_s1 + $0x1c48] sm:$0xff] }
 0x1af   :  { %5666 = vmatpush3.bf16.msra.mxu1 %v5665_v3  ;;  %v8833_v24 = vrot.slane %v1316_v7, %v6029_v13  ;;  %v1331_v36 = vcombine.high %v8824_v21, %v8824_v21  ;;  %v954_v7 = vld [vmem:[%s9223_s1 + $0x1cd8] sm:$0xff] }
 0x1b0   :  { %5668 = vmatprep.subr.bf16.mxu1 %v5667_v8  ;;  %v975_v8 = vld [vmem:[%s9223_s1 + $0x1d80] sm:$0xff] }
 0x1b1   :  { %5638 = vmatpush3.bf16.msra.mxu0 %v5637_v15  ;;  %v927_v15 = vld [vmem:[%s9223_s1 + $0x1c00] sm:$0xff] }
 0x1b2   :  { %5640 = vmatprep.subr.bf16.mxu0 %v5639_v17  ;;  %v959_v17 = vld [vmem:[%s9223_s1 + $0x1d00] sm:$0xff] }
 0x1b3   :  { %5670 = vmatpush3.bf16.msra.mxu1 %v5669_v16  ;;  %v928_v16 = vld [vmem:[%s9223_s1 + $0x1c08] sm:$0xff] }
 0x1b4   :  { %5672 = vmatprep.subr.bf16.mxu1 %v5671_v20  ;;  %v946_v20 = vld [vmem:[%s9223_s1 + $0x1c98] sm:$0xff]  ;;  %v5689_v25 = vpack.c.bf16 %v928_v16, %v927_v15 }
 0x1b5   :  { %5642 = vmatpush3.bf16.msra.mxu0 %v5641_v28  ;;  %v5721_v28 = vpack.c.bf16 %v960_v19, %v959_v17  ;;  %v937_v17 = vld [vmem:[%s9223_s1 + $0x1c50] sm:$0xff] }
 0x1b6   :  { %5644 = vmatprep.subr.bf16.mxu0 %v5643_v31  ;;  %v929_v31 = vld [vmem:[%s9223_s1 + $0x1c10] sm:$0xff] }
 0x1b7   :  { %5674 = vmatpush3.bf16.msra.mxu1 %v5673_v29  ;;  %v4123_v48 = vpop.f32.mrb[12].mxu0  ;;  %v5691_v29 = vpack.c.bf16 %v946_v20, %v945_v9  ;;  %v969_v19 = vld [vmem:[%s9223_s1 + $0x1d50] sm:$0xff]  ;;  %v970_v20 = vld [vmem:[%s9223_s1 + $0x1d58] sm:$0xff] }
 0x1b8   :  { %5676 = vmatprep.subr.bf16.mxu1 %v5675_v23  ;;  %v4124_v56 = vpop.f32.mrb[13].mxu0  ;;  %v962_v23 = vld [vmem:[%s9223_s1 + $0x1d18] sm:$0xff] }
 0x1b9   :  { %v4158_v57 = vpop.f32.mrb[12].mxu1  ;;  %v4125_v49 = vadd.f32 %v4124_v56, %v4123_v48  ;;  %5646 = vmatpush3.bf16.msra.mxu0 %v5645_v41  ;;  %v1332_v41 = vcombine.high %v8833_v24, %v8833_v24  ;;  %v5727_v48 = vpack.c.bf16 %v980_v40, %v979_v38  ;;  %v957_v38 = vld [vmem:[%s9223_s1 + $0x1cf0] sm:$0xff]  ;;  %v958_v40 = vld [vmem:[%s9223_s1 + $0x1cf8] sm:$0xff] }
 0x1ba   :  { %v4159_v59 = vpop.f32.mrb[13].mxu1  ;;  %5648 = vmatprep.subr.bf16.mxu0 %v5647_v44  ;;  %v5725_v44 = vpack.c.bf16 %v962_v23, %v961_v32  ;;  %v939_v32 = vld [vmem:[%s9223_s1 + $0x1c60] sm:$0xff] }
 0x1bb   :  { %v4160_v53 = vadd.f32 %v4159_v59, %v4158_v57  ;;  %5678 = vmatpush3.bf16.msra.mxu1 %v5677_v43  ;;  %v2321_v3 = vadd.f32 %v4125_v49, %v8593_v12  ;;  %v976_v12 = vld [vmem:[%s9223_s1 + $0x1d88] sm:$0xff]  ;;  %v5693_v43 = vpack.c.bf16 %v930_v30, %v929_v31  ;;  %v934_v49 = vld [vmem:[%s9223_s1 + $0x1c38] sm:$0xff]  ;;  %v965_v59 = vld [vmem:[%s9223_s1 + $0x1d30] sm:$0xff]  ;;  %v5741_v31 = vpack.c.bf16 %v970_v20, %v969_v19 }
 0x1bc   :  { %5680 = vmatprep.subr.bf16.mxu1 %v5679_v33  ;;  %v5719_v18 = vpack.c.bf16 %v976_v12, %v975_v8  ;;  %v949_v33 = vld [vmem:[%s9223_s1 + $0x1cb0] sm:$0xff]  ;;  %v5701_v1 = vpack.c.bf16 %v934_v49, %v933_v58  ;;  %v5733_v2 = vpack.c.bf16 %v966_v60, %v965_v59  ;;  %v968_v8 = vld [vmem:[%s9223_s1 + $0x1d48] sm:$0xff]  ;;  %v5711_v30 = vpack.c.bf16 %v956_v22, %v955_v27  ;;  %v971_v23 = vld [vmem:[%s9223_s1 + $0x1d60] sm:$0xff] }
 0x1bd   :  { %v8803_v63 = vadd.f32 %v4160_v53, %v2321_v3  ;;  %5650 = vmatpush3.bf16.msra.mxu0 %v5649_v51  ;;  %v5699_v45 = vpack.c.bf16 %v950_v50, %v949_v33  ;;  %v5731_v51 = vpack.c.bf16 %v982_v55, %v981_v54  ;;  %v951_v53 = vld [vmem:[%s9223_s1 + $0x1cc0] sm:$0xff]  ;;  %v953_v12 = vld [vmem:[%s9223_s1 + $0x1cd0] sm:$0xff]  ;;  %v5737_v15 = vpack.c.bf16 %v968_v8, %v967_v61  ;;  %v942_v55 = vld [vmem:[%s9223_s1 + $0x1c78] sm:$0xff] }
 0x1be   :  { %5652 = vmatprep.subr.bf16.mxu0 %v5651_v62  ;;  %v983_v62 = vld [vmem:[%s9223_s1 + $0x1dc0] sm:$0xff]  ;;  %v5707_v16 = vpack.c.bf16 %v954_v7, %v953_v12  ;;  %v5715_v50 = vpack.c.bf16 %v958_v40, %v957_v38  ;;  %v941_v54 = vld [vmem:[%s9223_s1 + $0x1c70] sm:$0xff]  ;;  %v974_v58 = vld [vmem:[%s9223_s1 + $0x1d78] sm:$0xff] }
 0x1bf   :  { %5682 = vmatpush3.bf16.msra.mxu1 %v5681_v10  ;;  %v952_v10 = vld [vmem:[%s9223_s1 + $0x1cc8] sm:$0xff]  ;;  %v5735_v6 = vpack.c.bf16 %v984_v0, %v983_v62  ;;  %v1007_v49 = vld [vmem:[%s9223_s1 + $0x1e80] sm:$0xff]  ;;  %v1009_v61 = vld [vmem:[%s9223_s1 + $0x1e90] sm:$0xff] }
 0x1c0   :  { %5684 = vmatprep.subr.bf16.mxu1 %v5683_v4  ;;  %v5703_v3 = vpack.c.bf16 %v952_v10, %v951_v53  ;;  %v935_v4 = vld [vmem:[%s9223_s1 + $0x1c40] sm:$0xff]  ;;  %v1008_v59 = vld [vmem:[%s9223_s1 + $0x1e88] sm:$0xff]  ;;  %v5717_v10 = vpack.c.bf16 %v942_v55, %v941_v54  ;;  %v1041_v12 = vld [vmem:[%s9223_s1 + $0x1f90] sm:$0xff] }
 0x1c1   :  { %5654 = vmatpush3.bf16.msra.mxu0 %v5653_v26  ;;  %v985_v26 = vld [vmem:[%s9223_s1 + $0x1dd0] sm:$0xff]  ;;  %v5751_v0 = vpack.c.bf16 %v1008_v59, %v1007_v49  ;;  %v1042_v7 = vld [vmem:[%s9223_s1 + $0x1f98] sm:$0xff]  ;;  %v1012_v20 = vld [vmem:[%s9223_s1 + $0x1ea8] sm:$0xff] }
 0x1c2   :  { %5688 = vmatprep.subr.bf16.mxu0 %v5687_v14  ;;  %v5705_v14 = vpack.c.bf16 %v936_v5, %v935_v4  ;;  %v1024_v5 = vld [vmem:[%s9223_s1 + $0x1f08] sm:$0xff]  ;;  %v1026_v19 = vld [vmem:[%s9223_s1 + $0x1f18] sm:$0xff]  ;;  %v1043_v22 = vld [vmem:[%s9223_s1 + $0x1fa0] sm:$0xff] }
 0x1c3   :  { %5686 = vmatpush3.bf16.msra.mxu1 %v5685_v11  ;;  %v986_v11 = vld [vmem:[%s9223_s1 + $0x1dd8] sm:$0xff]  ;;  %v1032_v59 = vld [vmem:[%s9223_s1 + $0x1f48] sm:$0xff] }
 0x1c4   :  { %5720 = vmatprep.subr.bf16.mxu1 %v5719_v18  ;;  %3299 = vmatmul.mubr.f32.vlgmr.msra.gmra.mrb[26].mxu0 %v8614_v35  ;;  %v931_v35 = vld [vmem:[%s9223_s1 + $0x1c20] sm:$0xff]  ;;  %v938_v18 = vld [vmem:[%s9223_s1 + $0x1c58] sm:$0xff]  ;;  %v5739_v9 = vpack.c.bf16 %v986_v11, %v985_v26 }
 0x1c5   :  { %5690 = vmatpush3.bf16.msra.mxu0 %v5689_v25  ;;  %3438 = vmatprep.mubr.f32.mxu0 %v1331_v36  ;;  %v5697_v56 = vpack.c.bf16 %v932_v47, %v931_v35  ;;  %v987_v25 = vld [vmem:[%s9223_s1 + $0x1de0] sm:$0xff]  ;;  %v972_v36 = vld [vmem:[%s9223_s1 + $0x1d68] sm:$0xff]  ;;  %v1046_v38 = vld [vmem:[%s9223_s1 + $0x1fb8] sm:$0xff] }
 0x1c6   :  { %3369 = vmatmul.mubr.f32.vlgmr.msra.gmra.mrb[26].mxu1 %v8623_v37  ;;  %5692 = vmatprep.subr.bf16.mxu0 %v5691_v29  ;;  %v964_v37 = vld [vmem:[%s9223_s1 + $0x1d28] sm:$0xff]  ;;  %v5709_v29 = vpack.c.bf16 %v938_v18, %v937_v17  ;;  %v5745_v33 = vpack.c.bf16 %v972_v36, %v971_v23  ;;  %v994_v17 = vld [vmem:[%s9223_s1 + $0x1e18] sm:$0xff]  ;;  %v1025_v18 = vld [vmem:[%s9223_s1 + $0x1f10] sm:$0xff] }
 0x1c7   :  { %5722 = vmatpush3.bf16.msra.mxu1 %v5721_v28  ;;  %3508 = vmatprep.mubr.f32.mxu1 %v1332_v41  ;;  %v5729_v57 = vpack.c.bf16 %v964_v37, %v963_v52  ;;  %v988_v28 = vld [vmem:[%s9223_s1 + $0x1de8] sm:$0xff]  ;;  %v1045_v36 = vld [vmem:[%s9223_s1 + $0x1fb0] sm:$0xff] }
 0x1c8   :  { %5724 = vmatprep.subr.bf16.mxu1 %v5723_v42  ;;  %v940_v42 = vld [vmem:[%s9223_s1 + $0x1c68] sm:$0xff]  ;;  %v5743_v39 = vpack.c.bf16 %v988_v28, %v987_v25 }
 0x1c9   :  { %5694 = vmatpush3.bf16.msra.mxu0 %v5693_v43  ;;  %v5713_v52 = vpack.c.bf16 %v940_v42, %v939_v32  ;;  %v1044_v25 = vld [vmem:[%s9223_s1 + $0x1fa8] sm:$0xff]  ;;  %v1027_v42 = vld [vmem:[%s9223_s1 + $0x1f20] sm:$0xff] }
 0x1ca   :  { %5696 = vmatprep.subr.bf16.mxu0 %v5695_v46  ;;  %v990_v46 = vld [vmem:[%s9223_s1 + $0x1df8] sm:$0xff]  ;;  %v996_v32 = vld [vmem:[%s9223_s1 + $0x1e28] sm:$0xff]  ;;  %v5791_v23 = vpack.c.bf16 %v1044_v25, %v1043_v22 }
 0x1cb   :  { %5726 = vmatpush3.bf16.msra.mxu1 %v5725_v44  ;;  %v989_v44 = vld [vmem:[%s9223_s1 + $0x1df0] sm:$0xff]  ;;  %v1022_v22 = vld [vmem:[%s9223_s1 + $0x1ef8] sm:$0xff] }
 0x1cc   :  { %5728 = vmatprep.subr.bf16.mxu1 %v5727_v48  ;;  %v30_v48 = vld [vmem:[%s9222_s0 + $0x78] sm:$0xff] }
 0x1cd   :  { %5698 = vmatpush3.bf16.msra.mxu0 %v5697_v56  ;;  %v973_v56 = vld [vmem:[%s9223_s1 + $0x1d70] sm:$0xff]  ;;  %v1333_v60 = vcombine.high %v30_v48, %v30_v48  ;;  %v9034_v8 = vrot.slane %v30_v48, %v6029_v13  ;;  %v1015_v48 = vld [vmem:[%s9223_s1 + $0x1ec0] sm:$0xff] }
 0x1ce   :  { %5700 = vmatprep.subr.bf16.mxu0 %v5699_v45  ;;  %v5747_v45 = vpack.c.bf16 %v990_v46, %v989_v44  ;;  %v5749_v62 = vpack.c.bf16 %v974_v58, %v973_v56  ;;  %v997_v44 = vld [vmem:[%s9223_s1 + $0x1e30] sm:$0xff]  ;;  %v998_v46 = vld [vmem:[%s9223_s1 + $0x1e38] sm:$0xff]  ;;  %v1031_v58 = vld [vmem:[%s9223_s1 + $0x1f40] sm:$0xff] }
 0x1cf   :  { %5730 = vmatpush3.bf16.msra.mxu1 %v5729_v57  ;;  %v9043_v26 = vrot.slane %v1333_v60, %v6029_v13  ;;  %v5787_v13 = vpack.c.bf16 %v1042_v7, %v1041_v12  ;;  %v1348_v27 = vcombine.high %v9034_v8, %v9034_v8  ;;  %v5765_v54 = vpack.c.bf16 %v998_v46, %v997_v44  ;;  %v1049_v60 = vld [vmem:[%s9223_s1 + $0x1fd0] sm:$0xff]  ;;  %v1020_v12 = vld [vmem:[%s9223_s1 + $0x1ee8] sm:$0xff]  ;;  %v1051_v7 = vld [vmem:[%s9223_s1 + $0x1fe0] sm:$0xff] }
 0x1d0   :  { %5732 = vmatprep.subr.bf16.mxu1 %v5731_v51  ;;  %v1039_v51 = vld [vmem:[%s9223_s1 + $0x1f80] sm:$0xff] }
 0x1d1   :  { %5702 = vmatpush3.bf16.msra.mxu0 %v5701_v1  ;;  %v991_v1 = vld [vmem:[%s9223_s1 + $0x1e00] sm:$0xff]  ;;  %v1349_v28 = vcombine.high %v9043_v26, %v9043_v26 }
 0x1d2   :  { %5704 = vmatprep.subr.bf16.mxu0 %v5703_v3  ;;  %v1023_v3 = vld [vmem:[%s9223_s1 + $0x1f00] sm:$0xff] }
 0x1d3   :  { %5734 = vmatpush3.bf16.msra.mxu1 %v5733_v2  ;;  %v992_v2 = vld [vmem:[%s9223_s1 + $0x1e08] sm:$0xff] }
 0x1d4   :  { %5736 = vmatprep.subr.bf16.mxu1 %v5735_v6  ;;  %v1010_v6 = vld [vmem:[%s9223_s1 + $0x1e98] sm:$0xff]  ;;  %v5753_v11 = vpack.c.bf16 %v992_v2, %v991_v1  ;;  %v1001_v2 = vld [vmem:[%s9223_s1 + $0x1e50] sm:$0xff] }
 0x1d5   :  { %5706 = vmatpush3.bf16.msra.mxu0 %v5705_v14  ;;  %v5785_v14 = vpack.c.bf16 %v1024_v5, %v1023_v3  ;;  %v1002_v3 = vld [vmem:[%s9223_s1 + $0x1e58] sm:$0xff] }
 0x1d6   :  { %5708 = vmatprep.subr.bf16.mxu0 %v5707_v16  ;;  %v993_v16 = vld [vmem:[%s9223_s1 + $0x1e10] sm:$0xff] }
 0x1d7   :  { %5738 = vmatpush3.bf16.msra.mxu1 %v5737_v15  ;;  %v4193_v34 = vpop.f32.mrb[14].mxu0  ;;  %v5755_v15 = vpack.c.bf16 %v1010_v6, %v1009_v61  ;;  %v1034_v61 = vld [vmem:[%s9223_s1 + $0x1f58] sm:$0xff]  ;;  %v1019_v6 = vld [vmem:[%s9223_s1 + $0x1ee0] sm:$0xff] }
 0x1d8   :  { %5740 = vmatprep.subr.bf16.mxu1 %v5739_v9  ;;  %v4194_v41 = vpop.f32.mrb[15].mxu0  ;;  %v1011_v9 = vld [vmem:[%s9223_s1 + $0x1ea0] sm:$0xff] }
 0x1d9   :  { %v4228_v43 = vpop.f32.mrb[14].mxu1  ;;  %v4195_v35 = vadd.f32 %v4194_v41, %v4193_v34  ;;  %5710 = vmatpush3.bf16.msra.mxu0 %v5709_v29  ;;  %v5757_v29 = vpack.c.bf16 %v994_v17, %v993_v16  ;;  %v1013_v34 = vld [vmem:[%s9223_s1 + $0x1eb0] sm:$0xff]  ;;  %v5775_v16 = vpack.c.bf16 %v1020_v12, %v1019_v6  ;;  %v1003_v17 = vld [vmem:[%s9223_s1 + $0x1e60] sm:$0xff] }
 0x1da   :  { %v4229_v47 = vpop.f32.mrb[15].mxu1  ;;  %5712 = vmatprep.subr.bf16.mxu0 %v5711_v30  ;;  %v5759_v30 = vpack.c.bf16 %v1012_v20, %v1011_v9  ;;  %v1036_v20 = vld [vmem:[%s9223_s1 + $0x1f68] sm:$0xff] }
 0x1db   :  { %v4230_v37 = vadd.f32 %v4229_v47, %v4228_v43  ;;  %5742 = vmatpush3.bf16.msra.mxu1 %v5741_v31  ;;  %v2461_v57 = vadd.f32 %v4195_v35, %v8803_v63  ;;  %v1040_v63 = vld [vmem:[%s9223_s1 + $0x1f88] sm:$0xff]  ;;  %v5789_v31 = vpack.c.bf16 %v1026_v19, %v1025_v18  ;;  %v1029_v35 = vld [vmem:[%s9223_s1 + $0x1f30] sm:$0xff]  ;;  %v5795_v47 = vpack.c.bf16 %v1046_v38, %v1045_v36 }
 0x1dc   :  { %5744 = vmatprep.subr.bf16.mxu1 %v5743_v39  ;;  %v5783_v4 = vpack.c.bf16 %v1040_v63, %v1039_v51  ;;  %v1014_v39 = vld [vmem:[%s9223_s1 + $0x1eb8] sm:$0xff]  ;;  %v1017_v51 = vld [vmem:[%s9223_s1 + $0x1ed0] sm:$0xff]  ;;  %v1004_v18 = vld [vmem:[%s9223_s1 + $0x1e68] sm:$0xff] }
 0x1dd   :  { %v9013_v53 = vadd.f32 %v4230_v37, %v2461_v57  ;;  %5714 = vmatpush3.bf16.msra.mxu0 %v5713_v52  ;;  %v5763_v43 = vpack.c.bf16 %v1014_v39, %v1013_v34  ;;  %v1030_v52 = vld [vmem:[%s9223_s1 + $0x1f38] sm:$0xff]  ;;  %v1016_v37 = vld [vmem:[%s9223_s1 + $0x1ec8] sm:$0xff]  ;;  %v999_v57 = vld [vmem:[%s9223_s1 + $0x1e40] sm:$0xff] }
 0x1de   :  { %5716 = vmatprep.subr.bf16.mxu0 %v5715_v50  ;;  %v1048_v50 = vld [vmem:[%s9223_s1 + $0x1fc8] sm:$0xff]  ;;  %v5797_v55 = vpack.c.bf16 %v1030_v52, %v1029_v35  ;;  %v5767_v56 = vpack.c.bf16 %v1016_v37, %v1015_v48  ;;  %v1018_v63 = vld [vmem:[%s9223_s1 + $0x1ed8] sm:$0xff]  ;;  %v1005_v34 = vld [vmem:[%s9223_s1 + $0x1e70] sm:$0xff] }
 0x1df   :  { %5746 = vmatpush3.bf16.msra.mxu1 %v5745_v33  ;;  %v1047_v33 = vld [vmem:[%s9223_s1 + $0x1fc0] sm:$0xff]  ;;  %v5771_v1 = vpack.c.bf16 %v1018_v63, %v1017_v51  ;;  %v1006_v39 = vld [vmem:[%s9223_s1 + $0x1e78] sm:$0xff] }
 0x1e0   :  { %5748 = vmatprep.subr.bf16.mxu1 %v5747_v45  ;;  %v1000_v45 = vld [vmem:[%s9223_s1 + $0x1e48] sm:$0xff]  ;;  %v5799_v49 = vpack.c.bf16 %v1048_v50, %v1047_v33  ;;  %v5781_v44 = vpack.c.bf16 %v1006_v39, %v1005_v34 }
 0x1e1   :  { %5718 = vmatpush3.bf16.msra.mxu0 %v5717_v10  ;;  %v1050_v10 = vld [vmem:[%s9223_s1 + $0x1fd8] sm:$0xff] }
 0x1e2   :  { %5752 = vmatprep.subr.bf16.mxu0 %v5751_v0  ;;  %v5801_v0 = vpack.c.bf16 %v1032_v59, %v1031_v58  ;;  %v5803_v5 = vpack.c.bf16 %v1050_v10, %v1049_v60 }
 0x1e3   :  { %5750 = vmatpush3.bf16.msra.mxu1 %v5749_v62  ;;  %v5769_v62 = vpack.c.bf16 %v1000_v45, %v999_v57 }
 0x1e4   :  { %5784 = vmatprep.subr.bf16.mxu1 %v5783_v4  ;;  %3439 = vmatmul.mubr.f32.vlgmr.msra.gmra.mrb[28].mxu0 %v8824_v21  ;;  %v995_v21 = vld [vmem:[%s9223_s1 + $0x1e20] sm:$0xff]  ;;  %v1033_v4 = vld [vmem:[%s9223_s1 + $0x1f50] sm:$0xff] }
 0x1e5   :  { %5754 = vmatpush3.bf16.msra.mxu0 %v5753_v11  ;;  %3578 = vmatprep.mubr.f32.mxu0 %v1348_v27  ;;  %v5761_v40 = vpack.c.bf16 %v996_v32, %v995_v21  ;;  %v1052_v11 = vld [vmem:[%s9223_s1 + $0x1fe8] sm:$0xff]  ;;  %v1021_v27 = vld [vmem:[%s9223_s1 + $0x1ef0] sm:$0xff]  ;;  %v5777_v32 = vpack.c.bf16 %v1004_v18, %v1003_v17 }
 0x1e6   :  { %3509 = vmatmul.mubr.f32.vlgmr.msra.gmra.mrb[28].mxu1 %v8833_v24  ;;  %5756 = vmatprep.subr.bf16.mxu0 %v5755_v15  ;;  %v1028_v24 = vld [vmem:[%s9223_s1 + $0x1f28] sm:$0xff]  ;;  %v5805_v15 = vpack.c.bf16 %v1034_v61, %v1033_v4  ;;  %v5807_v9 = vpack.c.bf16 %v1052_v11, %v1051_v7 }
 0x1e7   :  { %5786 = vmatpush3.bf16.msra.mxu1 %v5785_v14  ;;  %3648 = vmatprep.mubr.f32.mxu1 %v1349_v28  ;;  %v5793_v41 = vpack.c.bf16 %v1028_v24, %v1027_v42  ;;  %v5773_v14 = vpack.c.bf16 %v1002_v3, %v1001_v2  ;;  %v5779_v24 = vpack.c.bf16 %v1022_v22, %v1021_v27 }
 0x1e8   :  { %5788 = vmatprep.subr.bf16.mxu1 %v5787_v13  ;;  %v1035_v13 = vld [vmem:[%s9223_s1 + $0x1f60] sm:$0xff] }
 0x1e9   :  { %5758 = vmatpush3.bf16.msra.mxu0 %v5757_v29  ;;  %v1053_v29 = vld [vmem:[%s9223_s1 + $0x1ff0] sm:$0xff] }
 0x1ea   :  { %5760 = vmatprep.subr.bf16.mxu0 %v5759_v30 }
 0x1eb   :  { %5790 = vmatpush3.bf16.msra.mxu1 %v5789_v31  ;;  %v1054_v31 = vld [vmem:[%s9223_s1 + $0x1ff8] sm:$0xff] }
 0x1ec   :  { %5792 = vmatprep.subr.bf16.mxu1 %v5791_v23  ;;  %v5809_v23 = vpack.c.bf16 %v1036_v20, %v1035_v13  ;;  %v5811_v38 = vpack.c.bf16 %v1054_v31, %v1053_v29 }
 0x1ed   :  { %5762 = vmatpush3.bf16.msra.mxu0 %v5761_v40  ;;  %v1037_v40 = vld [vmem:[%s9223_s1 + $0x1f70] sm:$0xff] }
 0x1ee   :  { %5764 = vmatprep.subr.bf16.mxu0 %v5763_v43 }
 0x1ef   :  { %5794 = vmatpush3.bf16.msra.mxu1 %v5793_v41  ;;  %v1038_v41 = vld [vmem:[%s9223_s1 + $0x1f78] sm:$0xff]  ;;  %s5858_s1 = smov [#allocation2]  }
 0x1f0   :  { %5796 = vmatprep.subr.bf16.mxu1 %v5795_v47  ;;  %v5813_v46 = vpack.c.bf16 %v1038_v41, %v1037_v40  ;;  %s3662_s26 = sshll.u32 %s5858_s1, 4  ;;  %s3663_s26 = int_to_ptr.vmem [resolvable:$true] %s3662_s26 }
 0x1f1   :  { %5766 = vmatpush3.bf16.msra.mxu0 %v5765_v54  ;;  %s5833_s27 = scalar_lea.vmem %s3663_s26, 32  ;;  %p5838_p1 = scmp.lt.s32.totalorder %s3663_s26, %s3663_s26 }
 0x1f2   :  { %5768 = vmatprep.subr.bf16.mxu0 %v5767_v56  ;;  %p5834_p0 = scmp.ne.s32.totalorder %s3663_s26, %s5833_s27  ;;  %p5839_p2 = scmp.lt.s32.totalorder %s5833_s27, %s5833_s27 }
 0x1f3   :  { %5798 = vmatpush3.bf16.msra.mxu1 %v5797_v55 }
 0x1f4   :  { %5800 = vmatprep.subr.bf16.mxu1 %v5799_v49  ;;  %p5840_p3 = por %p5839_p2, %p5838_p1 }
 0x1f5   :  { %5770 = vmatpush3.bf16.msra.mxu0 %v5769_v62 }
 0x1f6   :  { %5772 = vmatprep.subr.bf16.mxu0 %v5771_v1  ;;  %p5841_p4 = pnand %p5840_p3, %p5834_p0 }
 0x1f7   :  { %5802 = vmatpush3.bf16.msra.mxu1 %v5801_v0  ;;  %v4263_v19 = vpop.f32.mrb[16].mxu0 }
 0x1f8   :  { %5804 = vmatprep.subr.bf16.mxu1 %v5803_v5  ;;  %v4264_v25 = vpop.f32.mrb[17].mxu0 }
 0x1f9   :  { %v4298_v28 = vpop.f32.mrb[16].mxu1  ;;  %v4265_v30 = vadd.f32 %v4264_v25, %v4263_v19  ;;  %5774 = vmatpush3.bf16.msra.mxu0 %v5773_v14 }
 0x1fa   :  { %v4299_v21 = vpop.f32.mrb[17].mxu1  ;;  %5776 = vmatprep.subr.bf16.mxu0 %v5775_v16 }
 0x1fb   :  { %v4300_v42 = vadd.f32 %v4299_v21, %v4298_v28  ;;  %5806 = vmatpush3.bf16.msra.mxu1 %v5805_v15  ;;  %v2601_v36 = vadd.f32 %v4265_v30, %v9013_v53 }
 0x1fc   :  { %5808 = vmatprep.subr.bf16.mxu1 %v5807_v9 }
 0x1fd   :  { %v2671_v43 = vadd.f32 %v4300_v42, %v2601_v36  ;;  %5778 = vmatpush3.bf16.msra.mxu0 %v5777_v32 }
 0x1fe   :  { %5780 = vmatprep.subr.bf16.mxu0 %v5779_v24 }
 0x1ff   :  { %5810 = vmatpush3.bf16.msra.mxu1 %v5809_v23 }
 0x200   :  { %5812 = vmatprep.subr.bf16.mxu1 %v5811_v38 }
 0x201   :  { %5782 = vmatpush3.bf16.msra.mxu0 %v5781_v44 }
 0x203   :  { %5814 = vmatpush3.bf16.msra.mxu1 %v5813_v46 }
 0x204   :  { %3579 = vmatmul.mubr.f32.vlgmr.msra.gmra.mrb[30].mxu0 %v9034_v8 }
 0x206   :  { %3649 = vmatmul.mubr.f32.vlgmr.msra.gmra.mrb[30].mxu1 %v9043_v26 }
 0x217   :  { %v4333_v53 = vpop.f32.mrb[18].mxu0 }
 0x218   :  { %v4334_v35 = vpop.f32.mrb[19].mxu0 }
 0x219   :  { %v4368_v47 = vpop.f32.mrb[18].mxu1  ;;  %v4335_v52 = vadd.f32 %v4334_v35, %v4333_v53 }
 0x21a   :  { %v4369_v48 = vpop.f32.mrb[19].mxu1 }
 0x21b   :  { %v4370_v37 = vadd.f32 %v4369_v48, %v4368_v47  ;;  %v2741_v33 = vadd.f32 %v4335_v52, %v2671_v43 }
 0x21d   :  { %v2811_v50 = vadd.f32 %v4370_v37, %v2741_v33 }
 0x237   :  { %v4403_v54 = vpop.f32.mrb[20].mxu0 }
 0x238   :  { %v4404_v55 = vpop.f32.mrb[21].mxu0 }
 0x239   :  { %v4438_v56 = vpop.f32.mrb[20].mxu1  ;;  %v4405_v57 = vadd.f32 %v4404_v55, %v4403_v54 }
 0x23a   :  { %v4439_v45 = vpop.f32.mrb[21].mxu1 }
 0x23b   :  { %v4440_v58 = vadd.f32 %v4439_v45, %v4438_v56  ;;  %v2881_v49 = vadd.f32 %v4405_v57, %v2811_v50 }
 0x23d   :  { %v2951_v59 = vadd.f32 %v4440_v58, %v2881_v49 }
 0x257   :  { %v4473_v51 = vpop.f32.mrb[22].mxu0 }
 0x258   :  { %v4474_v8 = vpop.f32.mrb[23].mxu0 }
 0x259   :  { %v4508_v63 = vpop.f32.mrb[22].mxu1  ;;  %v4475_v26 = vadd.f32 %v4474_v8, %v4473_v51 }
 0x25a   :  { %v4509_v60 = vpop.f32.mrb[23].mxu1 }
 0x25b   :  { %v4510_v10 = vadd.f32 %v4509_v60, %v4508_v63  ;;  %v3021_v62 = vadd.f32 %v4475_v26, %v2951_v59 }
 0x25d   :  { %v3091_v0 = vadd.f32 %v4510_v10, %v3021_v62 }
 0x277   :  { %v4543_v1 = vpop.f32.mrb[24].mxu0 }
 0x278   :  { %v4544_v2 = vpop.f32.mrb[25].mxu0 }
 0x279   :  { %v4578_v3 = vpop.f32.mrb[24].mxu1  ;;  %v4545_v4 = vadd.f32 %v4544_v2, %v4543_v1 }
 0x27a   :  { %v4579_v5 = vpop.f32.mrb[25].mxu1 }
 0x27b   :  { %v4580_v61 = vadd.f32 %v4579_v5, %v4578_v3  ;;  %v3161_v6 = vadd.f32 %v4545_v4, %v3091_v0 }
 0x27d   :  { %v3231_v12 = vadd.f32 %v4580_v61, %v3161_v6 }
 0x297   :  { %v4613_v7 = vpop.f32.mrb[26].mxu0 }
 0x298   :  { %v4614_v11 = vpop.f32.mrb[27].mxu0 }
 0x299   :  { %v4648_v14 = vpop.f32.mrb[26].mxu1  ;;  %v4615_v15 = vadd.f32 %v4614_v11, %v4613_v7 }
 0x29a   :  { %v4649_v16 = vpop.f32.mrb[27].mxu1 }
 0x29b   :  { %v4650_v17 = vadd.f32 %v4649_v16, %v4648_v14  ;;  %v3301_v18 = vadd.f32 %v4615_v15, %v3231_v12 }
 0x29d   :  { %v3371_v13 = vadd.f32 %v4650_v17, %v3301_v18 }
 0x2b7   :  { %v4683_v19 = vpop.f32.mrb[28].mxu0 }
 0x2b8   :  { %v4684_v9 = vpop.f32.mrb[29].mxu0 }
 0x2b9   :  { %v4718_v20 = vpop.f32.mrb[28].mxu1  ;;  %v4685_v27 = vadd.f32 %v4684_v9, %v4683_v19 }
 0x2ba   :  { %v4719_v22 = vpop.f32.mrb[29].mxu1 }
 0x2bb   :  { %v4720_v25 = vadd.f32 %v4719_v22, %v4718_v20  ;;  %v3441_v28 = vadd.f32 %v4685_v27, %v3371_v13 }
 0x2bd   :  { %v3511_v29 = vadd.f32 %v4720_v25, %v3441_v28 }
 0x2d7   :  { %v4753_v31 = vpop.f32.mrb[30].mxu0 }
 0x2d8   :  { %v4754_v30 = vpop.f32.mrb[31].mxu0 }
 0x2d9   :  { %v4788_v21 = vpop.f32.mrb[30].mxu1  ;;  %v4755_v32 = vadd.f32 %v4754_v30, %v4753_v31 }
 0x2da   :  { %v4789_v42 = vpop.f32.mrb[31].mxu1 }
 0x2db   :  { %v4790_v23 = vadd.f32 %v4789_v42, %v4788_v21  ;;  %v3581_v24 = vadd.f32 %v4755_v32, %v3511_v29 }
 0x2dd   :  { %v3651_v34 = vadd.f32 %v4790_v23, %v3581_v24 }
 0x2df   :  { %3655 = vst.msk [vmem:[#allocation2] sm:$0x3] %vm3654_vm0, %v3651_v34 }
 0x2e0   :  { %5844 = shalt.err (!%p5841_p4)
}
 0x2e1   :  { %s5845_s30 = scalar_lea.hbm %s9225_s3, 32 }
 0x2e2   :  { %p5846_p5 = scmp.ne.s32.totalorder %s9225_s3, %s5845_s30  ;;  %p5849_p6 = scmp.lt.u32.totalorder %s5845_s30, %s9225_s3 }
 0x2e4   :  { %p5851_p7 = pnand %p5849_p6, %p5846_p5 }
 0x2e6   :  { %5854 = shalt.err (!%p5851_p7)
}
 0x2e7   :  { %3665 = dma.vmem_to_hbm [thread:$0]  %s3663_s26, 32, %s9225_s3, [#allocation3]  }
 0x2e8   :  { %5855 = dma.done.wait [#allocation3], 32  }
 0x2e9   :  { %5856 = vsyncadd [#allocation3], 4294967264 }
 0x2ea   :  { %3669 = vsyncpa [#allocation3], 1 }

</bundles_post_ra>
